<compile_context>
chip_gen: v7x
topology: tpu7x:2x2x1
jax: 0.10.0
libtpu: 0.0.40
codegen_flags: <defaults>
</compile_context>

<pallas_src>
import jax
import jax.numpy as jnp
from jax.experimental import pallas as pl
from jax.experimental.pallas import tpu as pltpu


C1_OUT, C1_K = 10, 5            # conv1: Conv2d(1, 10, 5)   28x28 -> 24x24
C2_OUT, C2_IN, C2_K = 20, 10, 3  # conv2: Conv2d(10, 20, 3)  12x12 -> 10x10
POOL_OH = 12                    # after MaxPool2d(2,2)
CONV2_OH = 10
FC1_OUT = 500
FC1_PAD = 512                   # pad fc1 hidden dim to a multiple of 128
FC2_OUT = 10


def _vmem():
    # whole array resident in VMEM; no tiling needed at these sizes
    return pl.BlockSpec(memory_space=pltpu.MemorySpace.VMEM)


# -------------------- kernel A: conv1 + ReLU + 2x2 max-pool --------------------

def conv1_pool_kernel(p_ref, w_ref, b_ref, o_ref):
    # p_ref: (4, 25, N*144)  im2col patches, one slab per 2x2 pool corner
    # w_ref: (10, 25)        b_ref: (10, 1)
    # o_ref: (10, N*144)     pooled activations, spatial on lanes
    w = w_ref[...]
    m = jnp.dot(w, p_ref[0], preferred_element_type=jnp.float32)
    for corner in range(1, 4):
        y = jnp.dot(w, p_ref[corner], preferred_element_type=jnp.float32)
        m = jnp.maximum(m, y)
    # bias is corner-independent; ReLU(max(.)) == max(ReLU(.)) (monotone)
    o_ref[...] = jnp.maximum(m + b_ref[...], 0.0)


def conv1_pool(p1c, w1r, b1):
    co = w1r.shape[0]
    cols = p1c.shape[-1]
    return pl.pallas_call(
        conv1_pool_kernel,
        out_shape=jax.ShapeDtypeStruct((co, cols), jnp.float32),
        in_specs=[_vmem(), _vmem(), _vmem()],
        out_specs=_vmem(),
    )(p1c, w1r, b1)


# ------ kernel B: conv2 + ReLU + fc1 + ReLU + fc2 + LogSoftmax (fused head) ------

def conv2_fc_kernel(p2_ref, w2_ref, b2_ref, wfc1_ref, bfc1_ref, wfc2_ref, bfc2_ref,
                    o_ref, y2t_scr):
    # p2_ref : (N, 90, 100) f32   im2col patches of the pooled activation
    # w2_ref : (20, 90) f32       b2_ref : (20, 1) f32
    # wfc1_ref: (20, 100, 512) bf16  (fc1 weight, flatten order co*100 + i*10 + j)
    # bfc1_ref: (1, 512) f32      wfc2_ref: (512, 10) bf16   bfc2_ref: (1, 10) f32
    # o_ref  : (N, 10) f32
    # y2t_scr: (20, N, 100) f32 scratch -> lets fc1 run as 20 (N,100)@(100,512) dots
    n_batch = p2_ref.shape[0]
    w2 = w2_ref[...]
    b2 = b2_ref[...]

    # conv2 + ReLU, spatial on lanes: (20,90) @ (90,100) per image.
    for n in range(n_batch):
        y2_n = jnp.dot(w2, p2_ref[n], preferred_element_type=jnp.float32) + b2
        y2_n = jnp.maximum(y2_n, 0.0)                       # (20, 100)
        for co in range(C2_OUT):
            y2t_scr[co, n:n + 1, :] = y2_n[co:co + 1, :]

    # fc1: h[n, f] = sum_{co, s} y2[n, co, s] * Wfc1[co*100 + s, f]
    # bf16 MXU inputs, f32 accumulation; elementwise math stays f32 (v5e-safe).
    hacc = jnp.zeros((n_batch, FC1_PAD), jnp.float32)
    for co in range(C2_OUT):
        yco = y2t_scr[co]                                   # (N, 100) f32
        hacc = hacc + jnp.dot(yco.astype(jnp.bfloat16), wfc1_ref[co],
                              preferred_element_type=jnp.float32)
    h = jnp.maximum(hacc + bfc1_ref[...], 0.0)              # (N, 512)

    # fc2 + LogSoftmax(dim=1)
    logits = jnp.dot(h.astype(jnp.bfloat16), wfc2_ref[...],
                     preferred_element_type=jnp.float32) + bfc2_ref[...]
    mx = jnp.max(logits, axis=-1, keepdims=True)
    lse = mx + jnp.log(jnp.sum(jnp.exp(logits - mx), axis=-1, keepdims=True))
    o_ref[...] = logits - lse


def conv2_fc_head(p2, w2r, b2, wfc1, bfc1, wfc2, bfc2):
    n = p2.shape[0]
    return pl.pallas_call(
        conv2_fc_kernel,
        out_shape=jax.ShapeDtypeStruct((n, FC2_OUT), jnp.float32),
        in_specs=[_vmem()] * 7,
        out_specs=_vmem(),
        scratch_shapes=[pltpu.VMEM((C2_OUT, n, CONV2_OH * CONV2_OH), jnp.float32)],
    )(p2, w2r, b2, wfc1, bfc1, wfc2, bfc2)


# -------------------- host-side layout plumbing (im2col glue) --------------------

def conv1_pool_patches(x):
    """x: (N,1,28,28) -> (4, 25, N*144).

    Corner (a,b) of the 2x2 pool window, tap (di,dj) of the 5x5 conv:
      patches[a*2+b, di*5+dj, n*144 + pi*12 + pj] = x[n, 0, 2*pi+a+di, 2*pj+b+dj]
    """
    n = x.shape[0]
    xs = x[:, 0]                                            # (N, 28, 28)
    corners = []
    for a in range(2):
        for b in range(2):
            taps = [
                xs[:, a + di:a + di + 23:2, b + dj:b + dj + 23:2].reshape(n * 144)
                for di in range(C1_K) for dj in range(C1_K)
            ]
            corners.append(jnp.stack(taps, axis=0))         # (25, N*144)
    return jnp.stack(corners, axis=0)                       # (4, 25, N*144)


def conv2_patches(pooled, n):
    """pooled: (10, N*144) -> (N, 90, 100), tap order ci*9 + di*3 + dj."""
    pimg = pooled.reshape(C2_IN, n, POOL_OH, POOL_OH).transpose(1, 0, 2, 3)
    taps = [
        pimg[:, :, di:di + CONV2_OH, dj:dj + CONV2_OH].reshape(n, C2_IN, CONV2_OH * CONV2_OH)
        for di in range(C2_K) for dj in range(C2_K)
    ]
    return jnp.stack(taps, axis=2).reshape(n, C2_IN * C2_K * C2_K, CONV2_OH * CONV2_OH)


# -------------------- parameters --------------------

def init_params(key):
    ks = jax.random.split(key, 8)
    return {
        "conv1_w": 0.1 * jax.random.normal(ks[0], (C1_OUT, 1, C1_K, C1_K), jnp.float32),
        "conv1_b": 0.1 * jax.random.normal(ks[1], (C1_OUT,), jnp.float32),
        "conv2_w": 0.1 * jax.random.normal(ks[2], (C2_OUT, C2_IN, C2_K, C2_K), jnp.float32),
        "conv2_b": 0.1 * jax.random.normal(ks[3], (C2_OUT,), jnp.float32),
        "fc1_w": 0.02 * jax.random.normal(ks[4], (2000, FC1_OUT), jnp.float32),
        "fc1_b": 0.02 * jax.random.normal(ks[5], (FC1_OUT,), jnp.float32),
        "fc2_w": 0.05 * jax.random.normal(ks[6], (FC1_OUT, FC2_OUT), jnp.float32),
        "fc2_b": 0.05 * jax.random.normal(ks[7], (FC2_OUT,), jnp.float32),
    }


def prepare_params(p):
    """One-time host-side weight transforms: reshape conv weights for the
    spatial-on-lanes matmuls, pad fc1 hidden 500->512, cast fc weights to bf16."""
    pad = FC1_PAD - FC1_OUT
    w1r = p["conv1_w"].reshape(C1_OUT, C1_K * C1_K)                     # (10, 25)
    b1 = p["conv1_b"].reshape(C1_OUT, 1)
    w2r = p["conv2_w"].reshape(C2_OUT, C2_IN * C2_K * C2_K)             # (20, 90)
    b2 = p["conv2_b"].reshape(C2_OUT, 1)
    wfc1 = jnp.pad(p["fc1_w"], ((0, 0), (0, pad)))                      # (2000, 512)
    wfc1 = wfc1.reshape(C2_OUT, CONV2_OH * CONV2_OH, FC1_PAD).astype(jnp.bfloat16)
    bfc1 = jnp.pad(p["fc1_b"], (0, pad)).reshape(1, FC1_PAD)
    wfc2 = jnp.pad(p["fc2_w"], ((0, pad), (0, 0))).astype(jnp.bfloat16)  # (512, 10)
    bfc2 = p["fc2_b"].reshape(1, FC2_OUT)
    return {"w1r": w1r, "b1": b1, "w2r": w2r, "b2": b2,
            "wfc1": wfc1, "bfc1": bfc1, "wfc2": wfc2, "bfc2": bfc2}


# -------------------- forward --------------------

def simple_net_forward(x, kp):
    n = x.shape[0]
    p1c = conv1_pool_patches(x)                          # input-side layout glue
    pooled = conv1_pool(p1c, kp["w1r"], kp["b1"])        # kernel A: (10, N*144)
    p2 = conv2_patches(pooled, n)                        # tiny intermediate glue
    return conv2_fc_head(p2, kp["w2r"], kp["b2"], kp["wfc1"], kp["bfc1"],
                         kp["wfc2"], kp["bfc2"])         # kernel B: (N, 10)


if __name__ == "__main__":
    key = jax.random.PRNGKey(0)
    k_x, k_p = jax.random.split(key)
    # SimpleNet's flatten (20*10*10) implies 1x28x28 inputs; batch=2.
    x = jax.random.normal(k_x, (2, 1, 28, 28), jnp.float32)
    params = init_params(k_p)
    kp = prepare_params(params)

    fwd = jax.jit(simple_net_forward)
    out = jax.block_until_ready(fwd(x, kp))

    assert out.shape == (2, 10)
    assert bool(jnp.all(jnp.isfinite(out)))
    # log-softmax rows must exponentiate to ~1
    row_sums = jnp.sum(jnp.exp(out), axis=1)
    assert bool(jnp.all(jnp.abs(row_sums - 1.0) < 1e-4))
    print("KERNEL_OK")
</pallas_src>

<mosaic_0001>
module attributes {stable_mosaic.version = 11 : i64} {
  func.func @conv1_pool_kernel(%arg0: memref<4x25x288xf32, #tpu.memory_space<vmem>>, %arg1: memref<10x25xf32, #tpu.memory_space<vmem>>, %arg2: memref<10x1xf32, #tpu.memory_space<vmem>>, %arg3: memref<10x288xf32, #tpu.memory_space<vmem>>) attributes {dimension_semantics = [], scalar_prefetch = 0 : i64, scratch_operands = 0 : i64, tpu.core_type = #tpu.core_type<tc>} {
    %c0 = arith.constant 0 : index
    %c0_0 = arith.constant 0 : index
    %0 = vector.load %arg1[%c0, %c0_0] : memref<10x25xf32, #tpu.memory_space<vmem>>, vector<10x25xf32>
    %c0_1 = arith.constant 0 : index
    %c0_2 = arith.constant 0 : index
    %c0_3 = arith.constant 0 : index
    %1 = vector.load %arg0[%c0_1, %c0_2, %c0_3] : memref<4x25x288xf32, #tpu.memory_space<vmem>>, vector<1x25x288xf32>
    %2 = vector.shape_cast %1 : vector<1x25x288xf32> to vector<25x288xf32>
    %cst = arith.constant dense<0.000000e+00> : vector<10x288xf32>
    %3 = tpu.matmul %0, %2, %cst {dimension_numbers = #tpu.dot_dimension_numbers<[1], [0], [0], [1], [0, 0, 1, 1], [], []>} : vector<10x25xf32>, vector<25x288xf32>, vector<10x288xf32> -> vector<10x288xf32>
    %c1 = arith.constant 1 : index
    %c0_4 = arith.constant 0 : index
    %c0_5 = arith.constant 0 : index
    %4 = vector.load %arg0[%c1, %c0_4, %c0_5] : memref<4x25x288xf32, #tpu.memory_space<vmem>>, vector<1x25x288xf32>
    %5 = vector.shape_cast %4 : vector<1x25x288xf32> to vector<25x288xf32>
    %cst_6 = arith.constant dense<0.000000e+00> : vector<10x288xf32>
    %6 = tpu.matmul %0, %5, %cst_6 {dimension_numbers = #tpu.dot_dimension_numbers<[1], [0], [0], [1], [0, 0, 1, 1], [], []>} : vector<10x25xf32>, vector<25x288xf32>, vector<10x288xf32> -> vector<10x288xf32>
    %7 = arith.maximumf %3, %6 : vector<10x288xf32>
    %c2 = arith.constant 2 : index
    %c0_7 = arith.constant 0 : index
    %c0_8 = arith.constant 0 : index
    %8 = vector.load %arg0[%c2, %c0_7, %c0_8] : memref<4x25x288xf32, #tpu.memory_space<vmem>>, vector<1x25x288xf32>
    %9 = vector.shape_cast %8 : vector<1x25x288xf32> to vector<25x288xf32>
    %cst_9 = arith.constant dense<0.000000e+00> : vector<10x288xf32>
    %10 = tpu.matmul %0, %9, %cst_9 {dimension_numbers = #tpu.dot_dimension_numbers<[1], [0], [0], [1], [0, 0, 1, 1], [], []>} : vector<10x25xf32>, vector<25x288xf32>, vector<10x288xf32> -> vector<10x288xf32>
    %11 = arith.maximumf %7, %10 : vector<10x288xf32>
    %c3 = arith.constant 3 : index
    %c0_10 = arith.constant 0 : index
    %c0_11 = arith.constant 0 : index
    %12 = vector.load %arg0[%c3, %c0_10, %c0_11] : memref<4x25x288xf32, #tpu.memory_space<vmem>>, vector<1x25x288xf32>
    %13 = vector.shape_cast %12 : vector<1x25x288xf32> to vector<25x288xf32>
    %cst_12 = arith.constant dense<0.000000e+00> : vector<10x288xf32>
    %14 = tpu.matmul %0, %13, %cst_12 {dimension_numbers = #tpu.dot_dimension_numbers<[1], [0], [0], [1], [0, 0, 1, 1], [], []>} : vector<10x25xf32>, vector<25x288xf32>, vector<10x288xf32> -> vector<10x288xf32>
    %15 = arith.maximumf %11, %14 : vector<10x288xf32>
    %c0_13 = arith.constant 0 : index
    %c0_14 = arith.constant 0 : index
    %16 = vector.load %arg2[%c0_13, %c0_14] : memref<10x1xf32, #tpu.memory_space<vmem>>, vector<10x1xf32>
    %17 = vector.broadcast %16 : vector<10x1xf32> to vector<10x288xf32>
    %18 = arith.addf %15, %17 : vector<10x288xf32>
    %cst_15 = arith.constant 0.000000e+00 : f32
    %19 = vector.broadcast %cst_15 : f32 to vector<10x288xf32>
    %20 = arith.maximumf %18, %19 : vector<10x288xf32>
    %c0_16 = arith.constant 0 : index
    %c0_17 = arith.constant 0 : index
    %21 = vector.load %arg3[%c0_16, %c0_17] : memref<10x288xf32, #tpu.memory_space<vmem>>, vector<10x288xf32>
    tpu.vector_store %arg3[%c0_16, %c0_17], %20 {strides = array<i32>} : memref<10x288xf32, #tpu.memory_space<vmem>>, vector<10x288xf32>,
    return
  }
}

module attributes {stable_mosaic.version = 11 : i64} {
  func.func @conv2_fc_kernel(%arg0: memref<2x90x100xf32, #tpu.memory_space<vmem>>, %arg1: memref<20x90xf32, #tpu.memory_space<vmem>>, %arg2: memref<20x1xf32, #tpu.memory_space<vmem>>, %arg3: memref<20x100x512xbf16, #tpu.memory_space<vmem>>, %arg4: memref<1x512xf32, #tpu.memory_space<vmem>>, %arg5: memref<512x10xbf16, #tpu.memory_space<vmem>>, %arg6: memref<1x10xf32, #tpu.memory_space<vmem>>, %arg7: memref<2x10xf32, #tpu.memory_space<vmem>>, %arg8: memref<20x2x100xf32, #tpu.memory_space<vmem>>) attributes {dimension_semantics = [], scalar_prefetch = 0 : i64, scratch_operands = 1 : i64, tpu.core_type = #tpu.core_type<tc>} {
    %c0 = arith.constant 0 : index
    %c0_0 = arith.constant 0 : index
    %0 = vector.load %arg1[%c0, %c0_0] : memref<20x90xf32, #tpu.memory_space<vmem>>, vector<20x90xf32>
    %c0_1 = arith.constant 0 : index
    %c0_2 = arith.constant 0 : index
    %1 = vector.load %arg2[%c0_1, %c0_2] : memref<20x1xf32, #tpu.memory_space<vmem>>, vector<20x1xf32>
    %c0_3 = arith.constant 0 : index
    %c0_4 = arith.constant 0 : index
    %c0_5 = arith.constant 0 : index
    %2 = vector.load %arg0[%c0_3, %c0_4, %c0_5] : memref<2x90x100xf32, #tpu.memory_space<vmem>>, vector<1x90x100xf32>
    %3 = vector.shape_cast %2 : vector<1x90x100xf32> to vector<90x100xf32>
    %cst = arith.constant dense<0.000000e+00> : vector<20x100xf32>
    %4 = tpu.matmul %0, %3, %cst {dimension_numbers = #tpu.dot_dimension_numbers<[1], [0], [0], [1], [0, 0, 1, 1], [], []>} : vector<20x90xf32>, vector<90x100xf32>, vector<20x100xf32> -> vector<20x100xf32>
    %5 = vector.broadcast %1 : vector<20x1xf32> to vector<20x100xf32>
    %6 = arith.addf %4, %5 : vector<20x100xf32>
    %cst_6 = arith.constant 0.000000e+00 : f32
    %7 = vector.broadcast %cst_6 : f32 to vector<20x100xf32>
    %8 = arith.maximumf %6, %7 : vector<20x100xf32>
    %9 = vector.extract_strided_slice %8 {offsets = [0, 0], sizes = [1, 100], strides = [1, 1]} : vector<20x100xf32> to vector<1x100xf32>
    %c0_7 = arith.constant 0 : index
    %c0_8 = arith.constant 0 : index
    %c0_9 = arith.constant 0 : index
    %10 = vector.load %arg8[%c0_7, %c0_8, %c0_9] : memref<20x2x100xf32, #tpu.memory_space<vmem>>, vector<1x1x100xf32>
    %11 = vector.shape_cast %10 : vector<1x1x100xf32> to vector<1x100xf32>
    %12 = vector.shape_cast %9 : vector<1x100xf32> to vector<1x1x100xf32>
    tpu.vector_store %arg8[%c0_7, %c0_8, %c0_9], %12 {strides = array<i32>} : memref<20x2x100xf32, #tpu.memory_space<vmem>>, vector<1x1x100xf32>,
    %13 = vector.extract_strided_slice %8 {offsets = [1, 0], sizes = [1, 100], strides = [1, 1]} : vector<20x100xf32> to vector<1x100xf32>
    %c1 = arith.constant 1 : index
    %c0_10 = arith.constant 0 : index
    %c0_11 = arith.constant 0 : index
    %14 = vector.load %arg8[%c1, %c0_10, %c0_11] : memref<20x2x100xf32, #tpu.memory_space<vmem>>, vector<1x1x100xf32>
    %15 = vector.shape_cast %14 : vector<1x1x100xf32> to vector<1x100xf32>
    %16 = vector.shape_cast %13 : vector<1x100xf32> to vector<1x1x100xf32>
    tpu.vector_store %arg8[%c1, %c0_10, %c0_11], %16 {strides = array<i32>} : memref<20x2x100xf32, #tpu.memory_space<vmem>>, vector<1x1x100xf32>,
    %17 = vector.extract_strided_slice %8 {offsets = [2, 0], sizes = [1, 100], strides = [1, 1]} : vector<20x100xf32> to vector<1x100xf32>
    %c2 = arith.constant 2 : index
    %c0_12 = arith.constant 0 : index
    %c0_13 = arith.constant 0 : index
    %18 = vector.load %arg8[%c2, %c0_12, %c0_13] : memref<20x2x100xf32, #tpu.memory_space<vmem>>, vector<1x1x100xf32>
    %19 = vector.shape_cast %18 : vector<1x1x100xf32> to vector<1x100xf32>
    %20 = vector.shape_cast %17 : vector<1x100xf32> to vector<1x1x100xf32>
    tpu.vector_store %arg8[%c2, %c0_12, %c0_13], %20 {strides = array<i32>} : memref<20x2x100xf32, #tpu.memory_space<vmem>>, vector<1x1x100xf32>,
    %21 = vector.extract_strided_slice %8 {offsets = [3, 0], sizes = [1, 100], strides = [1, 1]} : vector<20x100xf32> to vector<1x100xf32>
    %c3 = arith.constant 3 : index
    %c0_14 = arith.constant 0 : index
    %c0_15 = arith.constant 0 : index
    %22 = vector.load %arg8[%c3, %c0_14, %c0_15] : memref<20x2x100xf32, #tpu.memory_space<vmem>>, vector<1x1x100xf32>
    %23 = vector.shape_cast %22 : vector<1x1x100xf32> to vector<1x100xf32>
    %24 = vector.shape_cast %21 : vector<1x100xf32> to vector<1x1x100xf32>
    tpu.vector_store %arg8[%c3, %c0_14, %c0_15], %24 {strides = array<i32>} : memref<20x2x100xf32, #tpu.memory_space<vmem>>, vector<1x1x100xf32>,
    %25 = vector.extract_strided_slice %8 {offsets = [4, 0], sizes = [1, 100], strides = [1, 1]} : vector<20x100xf32> to vector<1x100xf32>
    %c4 = arith.constant 4 : index
    %c0_16 = arith.constant 0 : index
    %c0_17 = arith.constant 0 : index
    %26 = vector.load %arg8[%c4, %c0_16, %c0_17] : memref<20x2x100xf32, #tpu.memory_space<vmem>>, vector<1x1x100xf32>
    %27 = vector.shape_cast %26 : vector<1x1x100xf32> to vector<1x100xf32>
    %28 = vector.shape_cast %25 : vector<1x100xf32> to vector<1x1x100xf32>
    tpu.vector_store %arg8[%c4, %c0_16, %c0_17], %28 {strides = array<i32>} : memref<20x2x100xf32, #tpu.memory_space<vmem>>, vector<1x1x100xf32>,
    %29 = vector.extract_strided_slice %8 {offsets = [5, 0], sizes = [1, 100], strides = [1, 1]} : vector<20x100xf32> to vector<1x100xf32>
    %c5 = arith.constant 5 : index
    %c0_18 = arith.constant 0 : index
    %c0_19 = arith.constant 0 : index
    %30 = vector.load %arg8[%c5, %c0_18, %c0_19] : memref<20x2x100xf32, #tpu.memory_space<vmem>>, vector<1x1x100xf32>
    %31 = vector.shape_cast %30 : vector<1x1x100xf32> to vector<1x100xf32>
    %32 = vector.shape_cast %29 : vector<1x100xf32> to vector<1x1x100xf32>
    tpu.vector_store %arg8[%c5, %c0_18, %c0_19], %32 {strides = array<i32>} : memref<20x2x100xf32, #tpu.memory_space<vmem>>, vector<1x1x100xf32>,
    %33 = vector.extract_strided_slice %8 {offsets = [6, 0], sizes = [1, 100], strides = [1, 1]} : vector<20x100xf32> to vector<1x100xf32>
    %c6 = arith.constant 6 : index
    %c0_20 = arith.constant 0 : index
    %c0_21 = arith.constant 0 : index
    %34 = vector.load %arg8[%c6, %c0_20, %c0_21] : memref<20x2x100xf32, #tpu.memory_space<vmem>>, vector<1x1x100xf32>
    %35 = vector.shape_cast %34 : vector<1x1x100xf32> to vector<1x100xf32>
    %36 = vector.shape_cast %33 : vector<1x100xf32> to vector<1x1x100xf32>
    tpu.vector_store %arg8[%c6, %c0_20, %c0_21], %36 {strides = array<i32>} : memref<20x2x100xf32, #tpu.memory_space<vmem>>, vector<1x1x100xf32>,
    %37 = vector.extract_strided_slice %8 {offsets = [7, 0], sizes = [1, 100], strides = [1, 1]} : vector<20x100xf32> to vector<1x100xf32>
    %c7 = arith.constant 7 : index
    %c0_22 = arith.constant 0 : index
    %c0_23 = arith.constant 0 : index
    %38 = vector.load %arg8[%c7, %c0_22, %c0_23] : memref<20x2x100xf32, #tpu.memory_space<vmem>>, vector<1x1x100xf32>
    %39 = vector.shape_cast %38 : vector<1x1x100xf32> to vector<1x100xf32>
    %40 = vector.shape_cast %37 : vector<1x100xf32> to vector<1x1x100xf32>
    tpu.vector_store %arg8[%c7, %c0_22, %c0_23], %40 {strides = array<i32>} : memref<20x2x100xf32, #tpu.memory_space<vmem>>, vector<1x1x100xf32>,
    %41 = vector.extract_strided_slice %8 {offsets = [8, 0], sizes = [1, 100], strides = [1, 1]} : vector<20x100xf32> to vector<1x100xf32>
    %c8 = arith.constant 8 : index
    %c0_24 = arith.constant 0 : index
    %c0_25 = arith.constant 0 : index
    %42 = vector.load %arg8[%c8, %c0_24, %c0_25] : memref<20x2x100xf32, #tpu.memory_space<vmem>>, vector<1x1x100xf32>
    %43 = vector.shape_cast %42 : vector<1x1x100xf32> to vector<1x100xf32>
    %44 = vector.shape_cast %41 : vector<1x100xf32> to vector<1x1x100xf32>
    tpu.vector_store %arg8[%c8, %c0_24, %c0_25], %44 {strides = array<i32>} : memref<20x2x100xf32, #tpu.memory_space<vmem>>, vector<1x1x100xf32>,
    %45 = vector.extract_strided_slice %8 {offsets = [9, 0], sizes = [1, 100], strides = [1, 1]} : vector<20x100xf32> to vector<1x100xf32>
    %c9 = arith.constant 9 : index
    %c0_26 = arith.constant 0 : index
    %c0_27 = arith.constant 0 : index
    %46 = vector.load %arg8[%c9, %c0_26, %c0_27] : memref<20x2x100xf32, #tpu.memory_space<vmem>>, vector<1x1x100xf32>
    %47 = vector.shape_cast %46 : vector<1x1x100xf32> to vector<1x100xf32>
    %48 = vector.shape_cast %45 : vector<1x100xf32> to vector<1x1x100xf32>
    tpu.vector_store %arg8[%c9, %c0_26, %c0_27], %48 {strides = array<i32>} : memref<20x2x100xf32, #tpu.memory_space<vmem>>, vector<1x1x100xf32>,
    %49 = vector.extract_strided_slice %8 {offsets = [10, 0], sizes = [1, 100], strides = [1, 1]} : vector<20x100xf32> to vector<1x100xf32>
    %c10 = arith.constant 10 : index
    %c0_28 = arith.constant 0 : index
    %c0_29 = arith.constant 0 : index
    %50 = vector.load %arg8[%c10, %c0_28, %c0_29] : memref<20x2x100xf32, #tpu.memory_space<vmem>>, vector<1x1x100xf32>
    %51 = vector.shape_cast %50 : vector<1x1x100xf32> to vector<1x100xf32>
    %52 = vector.shape_cast %49 : vector<1x100xf32> to vector<1x1x100xf32>
    tpu.vector_store %arg8[%c10, %c0_28, %c0_29], %52 {strides = array<i32>} : memref<20x2x100xf32, #tpu.memory_space<vmem>>, vector<1x1x100xf32>,
    %53 = vector.extract_strided_slice %8 {offsets = [11, 0], sizes = [1, 100], strides = [1, 1]} : vector<20x100xf32> to vector<1x100xf32>
    %c11 = arith.constant 11 : index
    %c0_30 = arith.constant 0 : index
    %c0_31 = arith.constant 0 : index
    %54 = vector.load %arg8[%c11, %c0_30, %c0_31] : memref<20x2x100xf32, #tpu.memory_space<vmem>>, vector<1x1x100xf32>
    %55 = vector.shape_cast %54 : vector<1x1x100xf32> to vector<1x100xf32>
    %56 = vector.shape_cast %53 : vector<1x100xf32> to vector<1x1x100xf32>
    tpu.vector_store %arg8[%c11, %c0_30, %c0_31], %56 {strides = array<i32>} : memref<20x2x100xf32, #tpu.memory_space<vmem>>, vector<1x1x100xf32>,
    %57 = vector.extract_strided_slice %8 {offsets = [12, 0], sizes = [1, 100], strides = [1, 1]} : vector<20x100xf32> to vector<1x100xf32>
    %c12 = arith.constant 12 : index
    %c0_32 = arith.constant 0 : index
    %c0_33 = arith.constant 0 : index
    %58 = vector.load %arg8[%c12, %c0_32, %c0_33] : memref<20x2x100xf32, #tpu.memory_space<vmem>>, vector<1x1x100xf32>
    %59 = vector.shape_cast %58 : vector<1x1x100xf32> to vector<1x100xf32>
    %60 = vector.shape_cast %57 : vector<1x100xf32> to vector<1x1x100xf32>
    tpu.vector_store %arg8[%c12, %c0_32, %c0_33], %60 {strides = array<i32>} : memref<20x2x100xf32, #tpu.memory_space<vmem>>, vector<1x1x100xf32>,
    %61 = vector.extract_strided_slice %8 {offsets = [13, 0], sizes = [1, 100], strides = [1, 1]} : vector<20x100xf32> to vector<1x100xf32>
    %c13 = arith.constant 13 : index
    %c0_34 = arith.constant 0 : index
    %c0_35 = arith.constant 0 : index
    %62 = vector.load %arg8[%c13, %c0_34, %c0_35] : memref<20x2x100xf32, #tpu.memory_space<vmem>>, vector<1x1x100xf32>
    %63 = vector.shape_cast %62 : vector<1x1x100xf32> to vector<1x100xf32>
    %64 = vector.shape_cast %61 : vector<1x100xf32> to vector<1x1x100xf32>
    tpu.vector_store %arg8[%c13, %c0_34, %c0_35], %64 {strides = array<i32>} : memref<20x2x100xf32, #tpu.memory_space<vmem>>, vector<1x1x100xf32>,
    %65 = vector.extract_strided_slice %8 {offsets = [14, 0], sizes = [1, 100], strides = [1, 1]} : vector<20x100xf32> to vector<1x100xf32>
    %c14 = arith.constant 14 : index
    %c0_36 = arith.constant 0 : index
    %c0_37 = arith.constant 0 : index
    %66 = vector.load %arg8[%c14, %c0_36, %c0_37] : memref<20x2x100xf32, #tpu.memory_space<vmem>>, vector<1x1x100xf32>
    %67 = vector.shape_cast %66 : vector<1x1x100xf32> to vector<1x100xf32>
    %68 = vector.shape_cast %65 : vector<1x100xf32> to vector<1x1x100xf32>
    tpu.vector_store %arg8[%c14, %c0_36, %c0_37], %68 {strides = array<i32>} : memref<20x2x100xf32, #tpu.memory_space<vmem>>, vector<1x1x100xf32>,
    %69 = vector.extract_strided_slice %8 {offsets = [15, 0], sizes = [1, 100], strides = [1, 1]} : vector<20x100xf32> to vector<1x100xf32>
    %c15 = arith.constant 15 : index
    %c0_38 = arith.constant 0 : index
    %c0_39 = arith.constant 0 : index
    %70 = vector.load %arg8[%c15, %c0_38, %c0_39] : memref<20x2x100xf32, #tpu.memory_space<vmem>>, vector<1x1x100xf32>
    %71 = vector.shape_cast %70 : vector<1x1x100xf32> to vector<1x100xf32>
    %72 = vector.shape_cast %69 : vector<1x100xf32> to vector<1x1x100xf32>
    tpu.vector_store %arg8[%c15, %c0_38, %c0_39], %72 {strides = array<i32>} : memref<20x2x100xf32, #tpu.memory_space<vmem>>, vector<1x1x100xf32>,
    %73 = vector.extract_strided_slice %8 {offsets = [16, 0], sizes = [1, 100], strides = [1, 1]} : vector<20x100xf32> to vector<1x100xf32>
    %c16 = arith.constant 16 : index
    %c0_40 = arith.constant 0 : index
    %c0_41 = arith.constant 0 : index
    %74 = vector.load %arg8[%c16, %c0_40, %c0_41] : memref<20x2x100xf32, #tpu.memory_space<vmem>>, vector<1x1x100xf32>
    %75 = vector.shape_cast %74 : vector<1x1x100xf32> to vector<1x100xf32>
    %76 = vector.shape_cast %73 : vector<1x100xf32> to vector<1x1x100xf32>
    tpu.vector_store %arg8[%c16, %c0_40, %c0_41], %76 {strides = array<i32>} : memref<20x2x100xf32, #tpu.memory_space<vmem>>, vector<1x1x100xf32>,
    %77 = vector.extract_strided_slice %8 {offsets = [17, 0], sizes = [1, 100], strides = [1, 1]} : vector<20x100xf32> to vector<1x100xf32>
    %c17 = arith.constant 17 : index
    %c0_42 = arith.constant 0 : index
    %c0_43 = arith.constant 0 : index
    %78 = vector.load %arg8[%c17, %c0_42, %c0_43] : memref<20x2x100xf32, #tpu.memory_space<vmem>>, vector<1x1x100xf32>
    %79 = vector.shape_cast %78 : vector<1x1x100xf32> to vector<1x100xf32>
    %80 = vector.shape_cast %77 : vector<1x100xf32> to vector<1x1x100xf32>
    tpu.vector_store %arg8[%c17, %c0_42, %c0_43], %80 {strides = array<i32>} : memref<20x2x100xf32, #tpu.memory_space<vmem>>, vector<1x1x100xf32>,
    %81 = vector.extract_strided_slice %8 {offsets = [18, 0], sizes = [1, 100], strides = [1, 1]} : vector<20x100xf32> to vector<1x100xf32>
    %c18 = arith.constant 18 : index
    %c0_44 = arith.constant 0 : index
    %c0_45 = arith.constant 0 : index
    %82 = vector.load %arg8[%c18, %c0_44, %c0_45] : memref<20x2x100xf32, #tpu.memory_space<vmem>>, vector<1x1x100xf32>
    %83 = vector.shape_cast %82 : vector<1x1x100xf32> to vector<1x100xf32>
    %84 = vector.shape_cast %81 : vector<1x100xf32> to vector<1x1x100xf32>
    tpu.vector_store %arg8[%c18, %c0_44, %c0_45], %84 {strides = array<i32>} : memref<20x2x100xf32, #tpu.memory_space<vmem>>, vector<1x1x100xf32>,
    %85 = vector.extract_strided_slice %8 {offsets = [19, 0], sizes = [1, 100], strides = [1, 1]} : vector<20x100xf32> to vector<1x100xf32>
    %c19 = arith.constant 19 : index
    %c0_46 = arith.constant 0 : index
    %c0_47 = arith.constant 0 : index
    %86 = vector.load %arg8[%c19, %c0_46, %c0_47] : memref<20x2x100xf32, #tpu.memory_space<vmem>>, vector<1x1x100xf32>
    %87 = vector.shape_cast %86 : vector<1x1x100xf32> to vector<1x100xf32>
    %88 = vector.shape_cast %85 : vector<1x100xf32> to vector<1x1x100xf32>
    tpu.vector_store %arg8[%c19, %c0_46, %c0_47], %88 {strides = array<i32>} : memref<20x2x100xf32, #tpu.memory_space<vmem>>, vector<1x1x100xf32>,
    %c1_48 = arith.constant 1 : index
    %c0_49 = arith.constant 0 : index
    %c0_50 = arith.constant 0 : index
    %89 = vector.load %arg0[%c1_48, %c0_49, %c0_50] : memref<2x90x100xf32, #tpu.memory_space<vmem>>, vector<1x90x100xf32>
    %90 = vector.shape_cast %89 : vector<1x90x100xf32> to vector<90x100xf32>
    %cst_51 = arith.constant dense<0.000000e+00> : vector<20x100xf32>
    %91 = tpu.matmul %0, %90, %cst_51 {dimension_numbers = #tpu.dot_dimension_numbers<[1], [0], [0], [1], [0, 0, 1, 1], [], []>} : vector<20x90xf32>, vector<90x100xf32>, vector<20x100xf32> -> vector<20x100xf32>
    %92 = vector.broadcast %1 : vector<20x1xf32> to vector<20x100xf32>
    %93 = arith.addf %91, %92 : vector<20x100xf32>
    %cst_52 = arith.constant 0.000000e+00 : f32
    %94 = vector.broadcast %cst_52 : f32 to vector<20x100xf32>
    %95 = arith.maximumf %93, %94 : vector<20x100xf32>
    %96 = vector.extract_strided_slice %95 {offsets = [0, 0], sizes = [1, 100], strides = [1, 1]} : vector<20x100xf32> to vector<1x100xf32>
    %c0_53 = arith.constant 0 : index
    %c1_54 = arith.constant 1 : index
    %c0_55 = arith.constant 0 : index
    %97 = vector.load %arg8[%c0_53, %c1_54, %c0_55] : memref<20x2x100xf32, #tpu.memory_space<vmem>>, vector<1x1x100xf32>
    %98 = vector.shape_cast %97 : vector<1x1x100xf32> to vector<1x100xf32>
    %99 = vector.shape_cast %96 : vector<1x100xf32> to vector<1x1x100xf32>
    tpu.vector_store %arg8[%c0_53, %c1_54, %c0_55], %99 {strides = array<i32>} : memref<20x2x100xf32, #tpu.memory_space<vmem>>, vector<1x1x100xf32>,
    %100 = vector.extract_strided_slice %95 {offsets = [1, 0], sizes = [1, 100], strides = [1, 1]} : vector<20x100xf32> to vector<1x100xf32>
    %c1_56 = arith.constant 1 : index
    %c1_57 = arith.constant 1 : index
    %c0_58 = arith.constant 0 : index
    %101 = vector.load %arg8[%c1_56, %c1_57, %c0_58] : memref<20x2x100xf32, #tpu.memory_space<vmem>>, vector<1x1x100xf32>
    %102 = vector.shape_cast %101 : vector<1x1x100xf32> to vector<1x100xf32>
    %103 = vector.shape_cast %100 : vector<1x100xf32> to vector<1x1x100xf32>
    tpu.vector_store %arg8[%c1_56, %c1_57, %c0_58], %103 {strides = array<i32>} : memref<20x2x100xf32, #tpu.memory_space<vmem>>, vector<1x1x100xf32>,
    %104 = vector.extract_strided_slice %95 {offsets = [2, 0], sizes = [1, 100], strides = [1, 1]} : vector<20x100xf32> to vector<1x100xf32>
    %c2_59 = arith.constant 2 : index
    %c1_60 = arith.constant 1 : index
    %c0_61 = arith.constant 0 : index
    %105 = vector.load %arg8[%c2_59, %c1_60, %c0_61] : memref<20x2x100xf32, #tpu.memory_space<vmem>>, vector<1x1x100xf32>
    %106 = vector.shape_cast %105 : vector<1x1x100xf32> to vector<1x100xf32>
    %107 = vector.shape_cast %104 : vector<1x100xf32> to vector<1x1x100xf32>
    tpu.vector_store %arg8[%c2_59, %c1_60, %c0_61], %107 {strides = array<i32>} : memref<20x2x100xf32, #tpu.memory_space<vmem>>, vector<1x1x100xf32>,
    %108 = vector.extract_strided_slice %95 {offsets = [3, 0], sizes = [1, 100], strides = [1, 1]} : vector<20x100xf32> to vector<1x100xf32>
    %c3_62 = arith.constant 3 : index
    %c1_63 = arith.constant 1 : index
    %c0_64 = arith.constant 0 : index
    %109 = vector.load %arg8[%c3_62, %c1_63, %c0_64] : memref<20x2x100xf32, #tpu.memory_space<vmem>>, vector<1x1x100xf32>
    %110 = vector.shape_cast %109 : vector<1x1x100xf32> to vector<1x100xf32>
    %111 = vector.shape_cast %108 : vector<1x100xf32> to vector<1x1x100xf32>
    tpu.vector_store %arg8[%c3_62, %c1_63, %c0_64], %111 {strides = array<i32>} : memref<20x2x100xf32, #tpu.memory_space<vmem>>, vector<1x1x100xf32>,
    %112 = vector.extract_strided_slice %95 {offsets = [4, 0], sizes = [1, 100], strides = [1, 1]} : vector<20x100xf32> to vector<1x100xf32>
    %c4_65 = arith.constant 4 : index
    %c1_66 = arith.constant 1 : index
    %c0_67 = arith.constant 0 : index
    %113 = vector.load %arg8[%c4_65, %c1_66, %c0_67] : memref<20x2x100xf32, #tpu.memory_space<vmem>>, vector<1x1x100xf32>
    %114 = vector.shape_cast %113 : vector<1x1x100xf32> to vector<1x100xf32>
    %115 = vector.shape_cast %112 : vector<1x100xf32> to vector<1x1x100xf32>
    tpu.vector_store %arg8[%c4_65, %c1_66, %c0_67], %115 {strides = array<i32>} : memref<20x2x100xf32, #tpu.memory_space<vmem>>, vector<1x1x100xf32>,
    %116 = vector.extract_strided_slice %95 {offsets = [5, 0], sizes = [1, 100], strides = [1, 1]} : vector<20x100xf32> to vector<1x100xf32>
    %c5_68 = arith.constant 5 : index
    %c1_69 = arith.constant 1 : index
    %c0_70 = arith.constant 0 : index
    %117 = vector.load %arg8[%c5_68, %c1_69, %c0_70] : memref<20x2x100xf32, #tpu.memory_space<vmem>>, vector<1x1x100xf32>
    %118 = vector.shape_cast %117 : vector<1x1x100xf32> to vector<1x100xf32>
    %119 = vector.shape_cast %116 : vector<1x100xf32> to vector<1x1x100xf32>
    tpu.vector_store %arg8[%c5_68, %c1_69, %c0_70], %119 {strides = array<i32>} : memref<20x2x100xf32, #tpu.memory_space<vmem>>, vector<1x1x100xf32>,
    %120 = vector.extract_strided_slice %95 {offsets = [6, 0], sizes = [1, 100], strides = [1, 1]} : vector<20x100xf32> to vector<1x100xf32>
    %c6_71 = arith.constant 6 : index
    %c1_72 = arith.constant 1 : index
    %c0_73 = arith.constant 0 : index
    %121 = vector.load %arg8[%c6_71, %c1_72, %c0_73] : memref<20x2x100xf32, #tpu.memory_space<vmem>>, vector<1x1x100xf32>
    %122 = vector.shape_cast %121 : vector<1x1x100xf32> to vector<1x100xf32>
    %123 = vector.shape_cast %120 : vector<1x100xf32> to vector<1x1x100xf32>
    tpu.vector_store %arg8[%c6_71, %c1_72, %c0_73], %123 {strides = array<i32>} : memref<20x2x100xf32, #tpu.memory_space<vmem>>, vector<1x1x100xf32>,
    %124 = vector.extract_strided_slice %95 {offsets = [7, 0], sizes = [1, 100], strides = [1, 1]} : vector<20x100xf32> to vector<1x100xf32>
    %c7_74 = arith.constant 7 : index
    %c1_75 = arith.constant 1 : index
    %c0_76 = arith.constant 0 : index
    %125 = vector.load %arg8[%c7_74, %c1_75, %c0_76] : memref<20x2x100xf32, #tpu.memory_space<vmem>>, vector<1x1x100xf32>
    %126 = vector.shape_cast %125 : vector<1x1x100xf32> to vector<1x100xf32>
    %127 = vector.shape_cast %124 : vector<1x100xf32> to vector<1x1x100xf32>
    tpu.vector_store %arg8[%c7_74, %c1_75, %c0_76], %127 {strides = array<i32>} : memref<20x2x100xf32, #tpu.memory_space<vmem>>, vector<1x1x100xf32>,
    %128 = vector.extract_strided_slice %95 {offsets = [8, 0], sizes = [1, 100], strides = [1, 1]} : vector<20x100xf32> to vector<1x100xf32>
    %c8_77 = arith.constant 8 : index
    %c1_78 = arith.constant 1 : index
    %c0_79 = arith.constant 0 : index
    %129 = vector.load %arg8[%c8_77, %c1_78, %c0_79] : memref<20x2x100xf32, #tpu.memory_space<vmem>>, vector<1x1x100xf32>
    %130 = vector.shape_cast %129 : vector<1x1x100xf32> to vector<1x100xf32>
    %131 = vector.shape_cast %128 : vector<1x100xf32> to vector<1x1x100xf32>
    tpu.vector_store %arg8[%c8_77, %c1_78, %c0_79], %131 {strides = array<i32>} : memref<20x2x100xf32, #tpu.memory_space<vmem>>, vector<1x1x100xf32>,
    %132 = vector.extract_strided_slice %95 {offsets = [9, 0], sizes = [1, 100], strides = [1, 1]} : vector<20x100xf32> to vector<1x100xf32>
    %c9_80 = arith.constant 9 : index
    %c1_81 = arith.constant 1 : index
    %c0_82 = arith.constant 0 : index
    %133 = vector.load %arg8[%c9_80, %c1_81, %c0_82] : memref<20x2x100xf32, #tpu.memory_space<vmem>>, vector<1x1x100xf32>
    %134 = vector.shape_cast %133 : vector<1x1x100xf32> to vector<1x100xf32>
    %135 = vector.shape_cast %132 : vector<1x100xf32> to vector<1x1x100xf32>
    tpu.vector_store %arg8[%c9_80, %c1_81, %c0_82], %135 {strides = array<i32>} : memref<20x2x100xf32, #tpu.memory_space<vmem>>, vector<1x1x100xf32>,
    %136 = vector.extract_strided_slice %95 {offsets = [10, 0], sizes = [1, 100], strides = [1, 1]} : vector<20x100xf32> to vector<1x100xf32>
    %c10_83 = arith.constant 10 : index
    %c1_84 = arith.constant 1 : index
    %c0_85 = arith.constant 0 : index
    %137 = vector.load %arg8[%c10_83, %c1_84, %c0_85] : memref<20x2x100xf32, #tpu.memory_space<vmem>>, vector<1x1x100xf32>
    %138 = vector.shape_cast %137 : vector<1x1x100xf32> to vector<1x100xf32>
    %139 = vector.shape_cast %136 : vector<1x100xf32> to vector<1x1x100xf32>
    tpu.vector_store %arg8[%c10_83, %c1_84, %c0_85], %139 {strides = array<i32>} : memref<20x2x100xf32, #tpu.memory_space<vmem>>, vector<1x1x100xf32>,
    %140 = vector.extract_strided_slice %95 {offsets = [11, 0], sizes = [1, 100], strides = [1, 1]} : vector<20x100xf32> to vector<1x100xf32>
    %c11_86 = arith.constant 11 : index
    %c1_87 = arith.constant 1 : index
    %c0_88 = arith.constant 0 : index
    %141 = vector.load %arg8[%c11_86, %c1_87, %c0_88] : memref<20x2x100xf32, #tpu.memory_space<vmem>>, vector<1x1x100xf32>
    %142 = vector.shape_cast %141 : vector<1x1x100xf32> to vector<1x100xf32>
    %143 = vector.shape_cast %140 : vector<1x100xf32> to vector<1x1x100xf32>
    tpu.vector_store %arg8[%c11_86, %c1_87, %c0_88], %143 {strides = array<i32>} : memref<20x2x100xf32, #tpu.memory_space<vmem>>, vector<1x1x100xf32>,
    %144 = vector.extract_strided_slice %95 {offsets = [12, 0], sizes = [1, 100], strides = [1, 1]} : vector<20x100xf32> to vector<1x100xf32>
    %c12_89 = arith.constant 12 : index
    %c1_90 = arith.constant 1 : index
    %c0_91 = arith.constant 0 : index
    %145 = vector.load %arg8[%c12_89, %c1_90, %c0_91] : memref<20x2x100xf32, #tpu.memory_space<vmem>>, vector<1x1x100xf32>
    %146 = vector.shape_cast %145 : vector<1x1x100xf32> to vector<1x100xf32>
    %147 = vector.shape_cast %144 : vector<1x100xf32> to vector<1x1x100xf32>
    tpu.vector_store %arg8[%c12_89, %c1_90, %c0_91], %147 {strides = array<i32>} : memref<20x2x100xf32, #tpu.memory_space<vmem>>, vector<1x1x100xf32>,
    %148 = vector.extract_strided_slice %95 {offsets = [13, 0], sizes = [1, 100], strides = [1, 1]} : vector<20x100xf32> to vector<1x100xf32>
    %c13_92 = arith.constant 13 : index
    %c1_93 = arith.constant 1 : index
    %c0_94 = arith.constant 0 : index
    %149 = vector.load %arg8[%c13_92, %c1_93, %c0_94] : memref<20x2x100xf32, #tpu.memory_space<vmem>>, vector<1x1x100xf32>
    %150 = vector.shape_cast %149 : vector<1x1x100xf32> to vector<1x100xf32>
    %151 = vector.shape_cast %148 : vector<1x100xf32> to vector<1x1x100xf32>
    tpu.vector_store %arg8[%c13_92, %c1_93, %c0_94], %151 {strides = array<i32>} : memref<20x2x100xf32, #tpu.memory_space<vmem>>, vector<1x1x100xf32>,
    %152 = vector.extract_strided_slice %95 {offsets = [14, 0], sizes = [1, 100], strides = [1, 1]} : vector<20x100xf32> to vector<1x100xf32>
    %c14_95 = arith.constant 14 : index
    %c1_96 = arith.constant 1 : index
    %c0_97 = arith.constant 0 : index
    %153 = vector.load %arg8[%c14_95, %c1_96, %c0_97] : memref<20x2x100xf32, #tpu.memory_space<vmem>>, vector<1x1x100xf32>
    %154 = vector.shape_cast %153 : vector<1x1x100xf32> to vector<1x100xf32>
    %155 = vector.shape_cast %152 : vector<1x100xf32> to vector<1x1x100xf32>
    tpu.vector_store %arg8[%c14_95, %c1_96, %c0_97], %155 {strides = array<i32>} : memref<20x2x100xf32, #tpu.memory_space<vmem>>, vector<1x1x100xf32>,
    %156 = vector.extract_strided_slice %95 {offsets = [15, 0], sizes = [1, 100], strides = [1, 1]} : vector<20x100xf32> to vector<1x100xf32>
    %c15_98 = arith.constant 15 : index
    %c1_99 = arith.constant 1 : index
    %c0_100 = arith.constant 0 : index
    %157 = vector.load %arg8[%c15_98, %c1_99, %c0_100] : memref<20x2x100xf32, #tpu.memory_space<vmem>>, vector<1x1x100xf32>
    %158 = vector.shape_cast %157 : vector<1x1x100xf32> to vector<1x100xf32>
    %159 = vector.shape_cast %156 : vector<1x100xf32> to vector<1x1x100xf32>
    tpu.vector_store %arg8[%c15_98, %c1_99, %c0_100], %159 {strides = array<i32>} : memref<20x2x100xf32, #tpu.memory_space<vmem>>, vector<1x1x100xf32>,
    %160 = vector.extract_strided_slice %95 {offsets = [16, 0], sizes = [1, 100], strides = [1, 1]} : vector<20x100xf32> to vector<1x100xf32>
    %c16_101 = arith.constant 16 : index
    %c1_102 = arith.constant 1 : index
    %c0_103 = arith.constant 0 : index
    %161 = vector.load %arg8[%c16_101, %c1_102, %c0_103] : memref<20x2x100xf32, #tpu.memory_space<vmem>>, vector<1x1x100xf32>
    %162 = vector.shape_cast %161 : vector<1x1x100xf32> to vector<1x100xf32>
    %163 = vector.shape_cast %160 : vector<1x100xf32> to vector<1x1x100xf32>
    tpu.vector_store %arg8[%c16_101, %c1_102, %c0_103], %163 {strides = array<i32>} : memref<20x2x100xf32, #tpu.memory_space<vmem>>, vector<1x1x100xf32>,
    %164 = vector.extract_strided_slice %95 {offsets = [17, 0], sizes = [1, 100], strides = [1, 1]} : vector<20x100xf32> to vector<1x100xf32>
    %c17_104 = arith.constant 17 : index
    %c1_105 = arith.constant 1 : index
    %c0_106 = arith.constant 0 : index
    %165 = vector.load %arg8[%c17_104, %c1_105, %c0_106] : memref<20x2x100xf32, #tpu.memory_space<vmem>>, vector<1x1x100xf32>
    %166 = vector.shape_cast %165 : vector<1x1x100xf32> to vector<1x100xf32>
    %167 = vector.shape_cast %164 : vector<1x100xf32> to vector<1x1x100xf32>
    tpu.vector_store %arg8[%c17_104, %c1_105, %c0_106], %167 {strides = array<i32>} : memref<20x2x100xf32, #tpu.memory_space<vmem>>, vector<1x1x100xf32>,
    %168 = vector.extract_strided_slice %95 {offsets = [18, 0], sizes = [1, 100], strides = [1, 1]} : vector<20x100xf32> to vector<1x100xf32>
    %c18_107 = arith.constant 18 : index
    %c1_108 = arith.constant 1 : index
    %c0_109 = arith.constant 0 : index
    %169 = vector.load %arg8[%c18_107, %c1_108, %c0_109] : memref<20x2x100xf32, #tpu.memory_space<vmem>>, vector<1x1x100xf32>
    %170 = vector.shape_cast %169 : vector<1x1x100xf32> to vector<1x100xf32>
    %171 = vector.shape_cast %168 : vector<1x100xf32> to vector<1x1x100xf32>
    tpu.vector_store %arg8[%c18_107, %c1_108, %c0_109], %171 {strides = array<i32>} : memref<20x2x100xf32, #tpu.memory_space<vmem>>, vector<1x1x100xf32>,
    %172 = vector.extract_strided_slice %95 {offsets = [19, 0], sizes = [1, 100], strides = [1, 1]} : vector<20x100xf32> to vector<1x100xf32>
    %c19_110 = arith.constant 19 : index
    %c1_111 = arith.constant 1 : index
    %c0_112 = arith.constant 0 : index
    %173 = vector.load %arg8[%c19_110, %c1_111, %c0_112] : memref<20x2x100xf32, #tpu.memory_space<vmem>>, vector<1x1x100xf32>
    %174 = vector.shape_cast %173 : vector<1x1x100xf32> to vector<1x100xf32>
    %175 = vector.shape_cast %172 : vector<1x100xf32> to vector<1x1x100xf32>
    tpu.vector_store %arg8[%c19_110, %c1_111, %c0_112], %175 {strides = array<i32>} : memref<20x2x100xf32, #tpu.memory_space<vmem>>, vector<1x1x100xf32>,
    %cst_113 = arith.constant 0.000000e+00 : f32
    %176 = vector.broadcast %cst_113 : f32 to vector<2x512xf32>
    %c0_114 = arith.constant 0 : index
    %c0_115 = arith.constant 0 : index
    %c0_116 = arith.constant 0 : index
    %177 = vector.load %arg8[%c0_114, %c0_115, %c0_116] : memref<20x2x100xf32, #tpu.memory_space<vmem>>, vector<1x2x100xf32>
    %178 = vector.shape_cast %177 : vector<1x2x100xf32> to vector<2x100xf32>
    %179 = arith.truncf %178 : vector<2x100xf32> to vector<2x100xbf16>
    %c0_117 = arith.constant 0 : index
    %c0_118 = arith.constant 0 : index
    %c0_119 = arith.constant 0 : index
    %180 = vector.load %arg3[%c0_117, %c0_118, %c0_119] : memref<20x100x512xbf16, #tpu.memory_space<vmem>>, vector<1x100x512xbf16>
    %181 = vector.shape_cast %180 : vector<1x100x512xbf16> to vector<100x512xbf16>
    %cst_120 = arith.constant dense<0.000000e+00> : vector<2x512xf32>
    %182 = tpu.matmul %179, %181, %cst_120 {dimension_numbers = #tpu.dot_dimension_numbers<[1], [0], [0], [1], [0, 0, 1, 1], [], []>} : vector<2x100xbf16>, vector<100x512xbf16>, vector<2x512xf32> -> vector<2x512xf32>
    %183 = arith.addf %176, %182 : vector<2x512xf32>
    %c1_121 = arith.constant 1 : index
    %c0_122 = arith.constant 0 : index
    %c0_123 = arith.constant 0 : index
    %184 = vector.load %arg8[%c1_121, %c0_122, %c0_123] : memref<20x2x100xf32, #tpu.memory_space<vmem>>, vector<1x2x100xf32>
    %185 = vector.shape_cast %184 : vector<1x2x100xf32> to vector<2x100xf32>
    %186 = arith.truncf %185 : vector<2x100xf32> to vector<2x100xbf16>
    %c1_124 = arith.constant 1 : index
    %c0_125 = arith.constant 0 : index
    %c0_126 = arith.constant 0 : index
    %187 = vector.load %arg3[%c1_124, %c0_125, %c0_126] : memref<20x100x512xbf16, #tpu.memory_space<vmem>>, vector<1x100x512xbf16>
    %188 = vector.shape_cast %187 : vector<1x100x512xbf16> to vector<100x512xbf16>
    %cst_127 = arith.constant dense<0.000000e+00> : vector<2x512xf32>
    %189 = tpu.matmul %186, %188, %cst_127 {dimension_numbers = #tpu.dot_dimension_numbers<[1], [0], [0], [1], [0, 0, 1, 1], [], []>} : vector<2x100xbf16>, vector<100x512xbf16>, vector<2x512xf32> -> vector<2x512xf32>
    %190 = arith.addf %183, %189 : vector<2x512xf32>
    %c2_128 = arith.constant 2 : index
    %c0_129 = arith.constant 0 : index
    %c0_130 = arith.constant 0 : index
    %191 = vector.load %arg8[%c2_128, %c0_129, %c0_130] : memref<20x2x100xf32, #tpu.memory_space<vmem>>, vector<1x2x100xf32>
    %192 = vector.shape_cast %191 : vector<1x2x100xf32> to vector<2x100xf32>
    %193 = arith.truncf %192 : vector<2x100xf32> to vector<2x100xbf16>
    %c2_131 = arith.constant 2 : index
    %c0_132 = arith.constant 0 : index
    %c0_133 = arith.constant 0 : index
    %194 = vector.load %arg3[%c2_131, %c0_132, %c0_133] : memref<20x100x512xbf16, #tpu.memory_space<vmem>>, vector<1x100x512xbf16>
    %195 = vector.shape_cast %194 : vector<1x100x512xbf16> to vector<100x512xbf16>
    %cst_134 = arith.constant dense<0.000000e+00> : vector<2x512xf32>
    %196 = tpu.matmul %193, %195, %cst_134 {dimension_numbers = #tpu.dot_dimension_numbers<[1], [0], [0], [1], [0, 0, 1, 1], [], []>} : vector<2x100xbf16>, vector<100x512xbf16>, vector<2x512xf32> -> vector<2x512xf32>
    %197 = arith.addf %190, %196 : vector<2x512xf32>
    %c3_135 = arith.constant 3 : index
    %c0_136 = arith.constant 0 : index
    %c0_137 = arith.constant 0 : index
    %198 = vector.load %arg8[%c3_135, %c0_136, %c0_137] : memref<20x2x100xf32, #tpu.memory_space<vmem>>, vector<1x2x100xf32>
    %199 = vector.shape_cast %198 : vector<1x2x100xf32> to vector<2x100xf32>
    %200 = arith.truncf %199 : vector<2x100xf32> to vector<2x100xbf16>
    %c3_138 = arith.constant 3 : index
    %c0_139 = arith.constant 0 : index
    %c0_140 = arith.constant 0 : index
    %201 = vector.load %arg3[%c3_138, %c0_139, %c0_140] : memref<20x100x512xbf16, #tpu.memory_space<vmem>>, vector<1x100x512xbf16>
    %202 = vector.shape_cast %201 : vector<1x100x512xbf16> to vector<100x512xbf16>
    %cst_141 = arith.constant dense<0.000000e+00> : vector<2x512xf32>
    %203 = tpu.matmul %200, %202, %cst_141 {dimension_numbers = #tpu.dot_dimension_numbers<[1], [0], [0], [1], [0, 0, 1, 1], [], []>} : vector<2x100xbf16>, vector<100x512xbf16>, vector<2x512xf32> -> vector<2x512xf32>
    %204 = arith.addf %197, %203 : vector<2x512xf32>
    %c4_142 = arith.constant 4 : index
    %c0_143 = arith.constant 0 : index
    %c0_144 = arith.constant 0 : index
    %205 = vector.load %arg8[%c4_142, %c0_143, %c0_144] : memref<20x2x100xf32, #tpu.memory_space<vmem>>, vector<1x2x100xf32>
    %206 = vector.shape_cast %205 : vector<1x2x100xf32> to vector<2x100xf32>
    %207 = arith.truncf %206 : vector<2x100xf32> to vector<2x100xbf16>
    %c4_145 = arith.constant 4 : index
    %c0_146 = arith.constant 0 : index
    %c0_147 = arith.constant 0 : index
    %208 = vector.load %arg3[%c4_145, %c0_146, %c0_147] : memref<20x100x512xbf16, #tpu.memory_space<vmem>>, vector<1x100x512xbf16>
    %209 = vector.shape_cast %208 : vector<1x100x512xbf16> to vector<100x512xbf16>
    %cst_148 = arith.constant dense<0.000000e+00> : vector<2x512xf32>
    %210 = tpu.matmul %207, %209, %cst_148 {dimension_numbers = #tpu.dot_dimension_numbers<[1], [0], [0], [1], [0, 0, 1, 1], [], []>} : vector<2x100xbf16>, vector<100x512xbf16>, vector<2x512xf32> -> vector<2x512xf32>
    %211 = arith.addf %204, %210 : vector<2x512xf32>
    %c5_149 = arith.constant 5 : index
    %c0_150 = arith.constant 0 : index
    %c0_151 = arith.constant 0 : index
    %212 = vector.load %arg8[%c5_149, %c0_150, %c0_151] : memref<20x2x100xf32, #tpu.memory_space<vmem>>, vector<1x2x100xf32>
    %213 = vector.shape_cast %212 : vector<1x2x100xf32> to vector<2x100xf32>
    %214 = arith.truncf %213 : vector<2x100xf32> to vector<2x100xbf16>
    %c5_152 = arith.constant 5 : index
    %c0_153 = arith.constant 0 : index
    %c0_154 = arith.constant 0 : index
    %215 = vector.load %arg3[%c5_152, %c0_153, %c0_154] : memref<20x100x512xbf16, #tpu.memory_space<vmem>>, vector<1x100x512xbf16>
    %216 = vector.shape_cast %215 : vector<1x100x512xbf16> to vector<100x512xbf16>
    %cst_155 = arith.constant dense<0.000000e+00> : vector<2x512xf32>
    %217 = tpu.matmul %214, %216, %cst_155 {dimension_numbers = #tpu.dot_dimension_numbers<[1], [0], [0], [1], [0, 0, 1, 1], [], []>} : vector<2x100xbf16>, vector<100x512xbf16>, vector<2x512xf32> -> vector<2x512xf32>
    %218 = arith.addf %211, %217 : vector<2x512xf32>
    %c6_156 = arith.constant 6 : index
    %c0_157 = arith.constant 0 : index
    %c0_158 = arith.constant 0 : index
    %219 = vector.load %arg8[%c6_156, %c0_157, %c0_158] : memref<20x2x100xf32, #tpu.memory_space<vmem>>, vector<1x2x100xf32>
    %220 = vector.shape_cast %219 : vector<1x2x100xf32> to vector<2x100xf32>
    %221 = arith.truncf %220 : vector<2x100xf32> to vector<2x100xbf16>
    %c6_159 = arith.constant 6 : index
    %c0_160 = arith.constant 0 : index
    %c0_161 = arith.constant 0 : index
    %222 = vector.load %arg3[%c6_159, %c0_160, %c0_161] : memref<20x100x512xbf16, #tpu.memory_space<vmem>>, vector<1x100x512xbf16>
    %223 = vector.shape_cast %222 : vector<1x100x512xbf16> to vector<100x512xbf16>
    %cst_162 = arith.constant dense<0.000000e+00> : vector<2x512xf32>
    %224 = tpu.matmul %221, %223, %cst_162 {dimension_numbers = #tpu.dot_dimension_numbers<[1], [0], [0], [1], [0, 0, 1, 1], [], []>} : vector<2x100xbf16>, vector<100x512xbf16>, vector<2x512xf32> -> vector<2x512xf32>
    %225 = arith.addf %218, %224 : vector<2x512xf32>
    %c7_163 = arith.constant 7 : index
    %c0_164 = arith.constant 0 : index
    %c0_165 = arith.constant 0 : index
    %226 = vector.load %arg8[%c7_163, %c0_164, %c0_165] : memref<20x2x100xf32, #tpu.memory_space<vmem>>, vector<1x2x100xf32>
    %227 = vector.shape_cast %226 : vector<1x2x100xf32> to vector<2x100xf32>
    %228 = arith.truncf %227 : vector<2x100xf32> to vector<2x100xbf16>
    %c7_166 = arith.constant 7 : index
    %c0_167 = arith.constant 0 : index
    %c0_168 = arith.constant 0 : index
    %229 = vector.load %arg3[%c7_166, %c0_167, %c0_168] : memref<20x100x512xbf16, #tpu.memory_space<vmem>>, vector<1x100x512xbf16>
    %230 = vector.shape_cast %229 : vector<1x100x512xbf16> to vector<100x512xbf16>
    %cst_169 = arith.constant dense<0.000000e+00> : vector<2x512xf32>
    %231 = tpu.matmul %228, %230, %cst_169 {dimension_numbers = #tpu.dot_dimension_numbers<[1], [0], [0], [1], [0, 0, 1, 1], [], []>} : vector<2x100xbf16>, vector<100x512xbf16>, vector<2x512xf32> -> vector<2x512xf32>
    %232 = arith.addf %225, %231 : vector<2x512xf32>
    %c8_170 = arith.constant 8 : index
    %c0_171 = arith.constant 0 : index
    %c0_172 = arith.constant 0 : index
    %233 = vector.load %arg8[%c8_170, %c0_171, %c0_172] : memref<20x2x100xf32, #tpu.memory_space<vmem>>, vector<1x2x100xf32>
    %234 = vector.shape_cast %233 : vector<1x2x100xf32> to vector<2x100xf32>
    %235 = arith.truncf %234 : vector<2x100xf32> to vector<2x100xbf16>
    %c8_173 = arith.constant 8 : index
    %c0_174 = arith.constant 0 : index
    %c0_175 = arith.constant 0 : index
    %236 = vector.load %arg3[%c8_173, %c0_174, %c0_175] : memref<20x100x512xbf16, #tpu.memory_space<vmem>>, vector<1x100x512xbf16>
    %237 = vector.shape_cast %236 : vector<1x100x512xbf16> to vector<100x512xbf16>
    %cst_176 = arith.constant dense<0.000000e+00> : vector<2x512xf32>
    %238 = tpu.matmul %235, %237, %cst_176 {dimension_numbers = #tpu.dot_dimension_numbers<[1], [0], [0], [1], [0, 0, 1, 1], [], []>} : vector<2x100xbf16>, vector<100x512xbf16>, vector<2x512xf32> -> vector<2x512xf32>
    %239 = arith.addf %232, %238 : vector<2x512xf32>
    %c9_177 = arith.constant 9 : index
    %c0_178 = arith.constant 0 : index
    %c0_179 = arith.constant 0 : index
    %240 = vector.load %arg8[%c9_177, %c0_178, %c0_179] : memref<20x2x100xf32, #tpu.memory_space<vmem>>, vector<1x2x100xf32>
    %241 = vector.shape_cast %240 : vector<1x2x100xf32> to vector<2x100xf32>
    %242 = arith.truncf %241 : vector<2x100xf32> to vector<2x100xbf16>
    %c9_180 = arith.constant 9 : index
    %c0_181 = arith.constant 0 : index
    %c0_182 = arith.constant 0 : index
    %243 = vector.load %arg3[%c9_180, %c0_181, %c0_182] : memref<20x100x512xbf16, #tpu.memory_space<vmem>>, vector<1x100x512xbf16>
    %244 = vector.shape_cast %243 : vector<1x100x512xbf16> to vector<100x512xbf16>
    %cst_183 = arith.constant dense<0.000000e+00> : vector<2x512xf32>
    %245 = tpu.matmul %242, %244, %cst_183 {dimension_numbers = #tpu.dot_dimension_numbers<[1], [0], [0], [1], [0, 0, 1, 1], [], []>} : vector<2x100xbf16>, vector<100x512xbf16>, vector<2x512xf32> -> vector<2x512xf32>
    %246 = arith.addf %239, %245 : vector<2x512xf32>
    %c10_184 = arith.constant 10 : index
    %c0_185 = arith.constant 0 : index
    %c0_186 = arith.constant 0 : index
    %247 = vector.load %arg8[%c10_184, %c0_185, %c0_186] : memref<20x2x100xf32, #tpu.memory_space<vmem>>, vector<1x2x100xf32>
    %248 = vector.shape_cast %247 : vector<1x2x100xf32> to vector<2x100xf32>
    %249 = arith.truncf %248 : vector<2x100xf32> to vector<2x100xbf16>
    %c10_187 = arith.constant 10 : index
    %c0_188 = arith.constant 0 : index
    %c0_189 = arith.constant 0 : index
    %250 = vector.load %arg3[%c10_187, %c0_188, %c0_189] : memref<20x100x512xbf16, #tpu.memory_space<vmem>>, vector<1x100x512xbf16>
    %251 = vector.shape_cast %250 : vector<1x100x512xbf16> to vector<100x512xbf16>
    %cst_190 = arith.constant dense<0.000000e+00> : vector<2x512xf32>
    %252 = tpu.matmul %249, %251, %cst_190 {dimension_numbers = #tpu.dot_dimension_numbers<[1], [0], [0], [1], [0, 0, 1, 1], [], []>} : vector<2x100xbf16>, vector<100x512xbf16>, vector<2x512xf32> -> vector<2x512xf32>
    %253 = arith.addf %246, %252 : vector<2x512xf32>
    %c11_191 = arith.constant 11 : index
    %c0_192 = arith.constant 0 : index
    %c0_193 = arith.constant 0 : index
    %254 = vector.load %arg8[%c11_191, %c0_192, %c0_193] : memref<20x2x100xf32, #tpu.memory_space<vmem>>, vector<1x2x100xf32>
    %255 = vector.shape_cast %254 : vector<1x2x100xf32> to vector<2x100xf32>
    %256 = arith.truncf %255 : vector<2x100xf32> to vector<2x100xbf16>
    %c11_194 = arith.constant 11 : index
    %c0_195 = arith.constant 0 : index
    %c0_196 = arith.constant 0 : index
    %257 = vector.load %arg3[%c11_194, %c0_195, %c0_196] : memref<20x100x512xbf16, #tpu.memory_space<vmem>>, vector<1x100x512xbf16>
    %258 = vector.shape_cast %257 : vector<1x100x512xbf16> to vector<100x512xbf16>
    %cst_197 = arith.constant dense<0.000000e+00> : vector<2x512xf32>
    %259 = tpu.matmul %256, %258, %cst_197 {dimension_numbers = #tpu.dot_dimension_numbers<[1], [0], [0], [1], [0, 0, 1, 1], [], []>} : vector<2x100xbf16>, vector<100x512xbf16>, vector<2x512xf32> -> vector<2x512xf32>
    %260 = arith.addf %253, %259 : vector<2x512xf32>
    %c12_198 = arith.constant 12 : index
    %c0_199 = arith.constant 0 : index
    %c0_200 = arith.constant 0 : index
    %261 = vector.load %arg8[%c12_198, %c0_199, %c0_200] : memref<20x2x100xf32, #tpu.memory_space<vmem>>, vector<1x2x100xf32>
    %262 = vector.shape_cast %261 : vector<1x2x100xf32> to vector<2x100xf32>
    %263 = arith.truncf %262 : vector<2x100xf32> to vector<2x100xbf16>
    %c12_201 = arith.constant 12 : index
    %c0_202 = arith.constant 0 : index
    %c0_203 = arith.constant 0 : index
    %264 = vector.load %arg3[%c12_201, %c0_202, %c0_203] : memref<20x100x512xbf16, #tpu.memory_space<vmem>>, vector<1x100x512xbf16>
    %265 = vector.shape_cast %264 : vector<1x100x512xbf16> to vector<100x512xbf16>
    %cst_204 = arith.constant dense<0.000000e+00> : vector<2x512xf32>
    %266 = tpu.matmul %263, %265, %cst_204 {dimension_numbers = #tpu.dot_dimension_numbers<[1], [0], [0], [1], [0, 0, 1, 1], [], []>} : vector<2x100xbf16>, vector<100x512xbf16>, vector<2x512xf32> -> vector<2x512xf32>
    %267 = arith.addf %260, %266 : vector<2x512xf32>
    %c13_205 = arith.constant 13 : index
    %c0_206 = arith.constant 0 : index
    %c0_207 = arith.constant 0 : index
    %268 = vector.load %arg8[%c13_205, %c0_206, %c0_207] : memref<20x2x100xf32, #tpu.memory_space<vmem>>, vector<1x2x100xf32>
    %269 = vector.shape_cast %268 : vector<1x2x100xf32> to vector<2x100xf32>
    %270 = arith.truncf %269 : vector<2x100xf32> to vector<2x100xbf16>
    %c13_208 = arith.constant 13 : index
    %c0_209 = arith.constant 0 : index
    %c0_210 = arith.constant 0 : index
    %271 = vector.load %arg3[%c13_208, %c0_209, %c0_210] : memref<20x100x512xbf16, #tpu.memory_space<vmem>>, vector<1x100x512xbf16>
    %272 = vector.shape_cast %271 : vector<1x100x512xbf16> to vector<100x512xbf16>
    %cst_211 = arith.constant dense<0.000000e+00> : vector<2x512xf32>
    %273 = tpu.matmul %270, %272, %cst_211 {dimension_numbers = #tpu.dot_dimension_numbers<[1], [0], [0], [1], [0, 0, 1, 1], [], []>} : vector<2x100xbf16>, vector<100x512xbf16>, vector<2x512xf32> -> vector<2x512xf32>
    %274 = arith.addf %267, %273 : vector<2x512xf32>
    %c14_212 = arith.constant 14 : index
    %c0_213 = arith.constant 0 : index
    %c0_214 = arith.constant 0 : index
    %275 = vector.load %arg8[%c14_212, %c0_213, %c0_214] : memref<20x2x100xf32, #tpu.memory_space<vmem>>, vector<1x2x100xf32>
    %276 = vector.shape_cast %275 : vector<1x2x100xf32> to vector<2x100xf32>
    %277 = arith.truncf %276 : vector<2x100xf32> to vector<2x100xbf16>
    %c14_215 = arith.constant 14 : index
    %c0_216 = arith.constant 0 : index
    %c0_217 = arith.constant 0 : index
    %278 = vector.load %arg3[%c14_215, %c0_216, %c0_217] : memref<20x100x512xbf16, #tpu.memory_space<vmem>>, vector<1x100x512xbf16>
    %279 = vector.shape_cast %278 : vector<1x100x512xbf16> to vector<100x512xbf16>
    %cst_218 = arith.constant dense<0.000000e+00> : vector<2x512xf32>
    %280 = tpu.matmul %277, %279, %cst_218 {dimension_numbers = #tpu.dot_dimension_numbers<[1], [0], [0], [1], [0, 0, 1, 1], [], []>} : vector<2x100xbf16>, vector<100x512xbf16>, vector<2x512xf32> -> vector<2x512xf32>
    %281 = arith.addf %274, %280 : vector<2x512xf32>
    %c15_219 = arith.constant 15 : index
    %c0_220 = arith.constant 0 : index
    %c0_221 = arith.constant 0 : index
    %282 = vector.load %arg8[%c15_219, %c0_220, %c0_221] : memref<20x2x100xf32, #tpu.memory_space<vmem>>, vector<1x2x100xf32>
    %283 = vector.shape_cast %282 : vector<1x2x100xf32> to vector<2x100xf32>
    %284 = arith.truncf %283 : vector<2x100xf32> to vector<2x100xbf16>
    %c15_222 = arith.constant 15 : index
    %c0_223 = arith.constant 0 : index
    %c0_224 = arith.constant 0 : index
    %285 = vector.load %arg3[%c15_222, %c0_223, %c0_224] : memref<20x100x512xbf16, #tpu.memory_space<vmem>>, vector<1x100x512xbf16>
    %286 = vector.shape_cast %285 : vector<1x100x512xbf16> to vector<100x512xbf16>
    %cst_225 = arith.constant dense<0.000000e+00> : vector<2x512xf32>
    %287 = tpu.matmul %284, %286, %cst_225 {dimension_numbers = #tpu.dot_dimension_numbers<[1], [0], [0], [1], [0, 0, 1, 1], [], []>} : vector<2x100xbf16>, vector<100x512xbf16>, vector<2x512xf32> -> vector<2x512xf32>
    %288 = arith.addf %281, %287 : vector<2x512xf32>
    %c16_226 = arith.constant 16 : index
    %c0_227 = arith.constant 0 : index
    %c0_228 = arith.constant 0 : index
    %289 = vector.load %arg8[%c16_226, %c0_227, %c0_228] : memref<20x2x100xf32, #tpu.memory_space<vmem>>, vector<1x2x100xf32>
    %290 = vector.shape_cast %289 : vector<1x2x100xf32> to vector<2x100xf32>
    %291 = arith.truncf %290 : vector<2x100xf32> to vector<2x100xbf16>
    %c16_229 = arith.constant 16 : index
    %c0_230 = arith.constant 0 : index
    %c0_231 = arith.constant 0 : index
    %292 = vector.load %arg3[%c16_229, %c0_230, %c0_231] : memref<20x100x512xbf16, #tpu.memory_space<vmem>>, vector<1x100x512xbf16>
    %293 = vector.shape_cast %292 : vector<1x100x512xbf16> to vector<100x512xbf16>
    %cst_232 = arith.constant dense<0.000000e+00> : vector<2x512xf32>
    %294 = tpu.matmul %291, %293, %cst_232 {dimension_numbers = #tpu.dot_dimension_numbers<[1], [0], [0], [1], [0, 0, 1, 1], [], []>} : vector<2x100xbf16>, vector<100x512xbf16>, vector<2x512xf32> -> vector<2x512xf32>
    %295 = arith.addf %288, %294 : vector<2x512xf32>
    %c17_233 = arith.constant 17 : index
    %c0_234 = arith.constant 0 : index
    %c0_235 = arith.constant 0 : index
    %296 = vector.load %arg8[%c17_233, %c0_234, %c0_235] : memref<20x2x100xf32, #tpu.memory_space<vmem>>, vector<1x2x100xf32>
    %297 = vector.shape_cast %296 : vector<1x2x100xf32> to vector<2x100xf32>
    %298 = arith.truncf %297 : vector<2x100xf32> to vector<2x100xbf16>
    %c17_236 = arith.constant 17 : index
    %c0_237 = arith.constant 0 : index
    %c0_238 = arith.constant 0 : index
    %299 = vector.load %arg3[%c17_236, %c0_237, %c0_238] : memref<20x100x512xbf16, #tpu.memory_space<vmem>>, vector<1x100x512xbf16>
    %300 = vector.shape_cast %299 : vector<1x100x512xbf16> to vector<100x512xbf16>
    %cst_239 = arith.constant dense<0.000000e+00> : vector<2x512xf32>
    %301 = tpu.matmul %298, %300, %cst_239 {dimension_numbers = #tpu.dot_dimension_numbers<[1], [0], [0], [1], [0, 0, 1, 1], [], []>} : vector<2x100xbf16>, vector<100x512xbf16>, vector<2x512xf32> -> vector<2x512xf32>
    %302 = arith.addf %295, %301 : vector<2x512xf32>
    %c18_240 = arith.constant 18 : index
    %c0_241 = arith.constant 0 : index
    %c0_242 = arith.constant 0 : index
    %303 = vector.load %arg8[%c18_240, %c0_241, %c0_242] : memref<20x2x100xf32, #tpu.memory_space<vmem>>, vector<1x2x100xf32>
    %304 = vector.shape_cast %303 : vector<1x2x100xf32> to vector<2x100xf32>
    %305 = arith.truncf %304 : vector<2x100xf32> to vector<2x100xbf16>
    %c18_243 = arith.constant 18 : index
    %c0_244 = arith.constant 0 : index
    %c0_245 = arith.constant 0 : index
    %306 = vector.load %arg3[%c18_243, %c0_244, %c0_245] : memref<20x100x512xbf16, #tpu.memory_space<vmem>>, vector<1x100x512xbf16>
    %307 = vector.shape_cast %306 : vector<1x100x512xbf16> to vector<100x512xbf16>
    %cst_246 = arith.constant dense<0.000000e+00> : vector<2x512xf32>
    %308 = tpu.matmul %305, %307, %cst_246 {dimension_numbers = #tpu.dot_dimension_numbers<[1], [0], [0], [1], [0, 0, 1, 1], [], []>} : vector<2x100xbf16>, vector<100x512xbf16>, vector<2x512xf32> -> vector<2x512xf32>
    %309 = arith.addf %302, %308 : vector<2x512xf32>
    %c19_247 = arith.constant 19 : index
    %c0_248 = arith.constant 0 : index
    %c0_249 = arith.constant 0 : index
    %310 = vector.load %arg8[%c19_247, %c0_248, %c0_249] : memref<20x2x100xf32, #tpu.memory_space<vmem>>, vector<1x2x100xf32>
    %311 = vector.shape_cast %310 : vector<1x2x100xf32> to vector<2x100xf32>
    %312 = arith.truncf %311 : vector<2x100xf32> to vector<2x100xbf16>
    %c19_250 = arith.constant 19 : index
    %c0_251 = arith.constant 0 : index
    %c0_252 = arith.constant 0 : index
    %313 = vector.load %arg3[%c19_250, %c0_251, %c0_252] : memref<20x100x512xbf16, #tpu.memory_space<vmem>>, vector<1x100x512xbf16>
    %314 = vector.shape_cast %313 : vector<1x100x512xbf16> to vector<100x512xbf16>
    %cst_253 = arith.constant dense<0.000000e+00> : vector<2x512xf32>
    %315 = tpu.matmul %312, %314, %cst_253 {dimension_numbers = #tpu.dot_dimension_numbers<[1], [0], [0], [1], [0, 0, 1, 1], [], []>} : vector<2x100xbf16>, vector<100x512xbf16>, vector<2x512xf32> -> vector<2x512xf32>
    %316 = arith.addf %309, %315 : vector<2x512xf32>
    %c0_254 = arith.constant 0 : index
    %c0_255 = arith.constant 0 : index
    %317 = vector.load %arg4[%c0_254, %c0_255] : memref<1x512xf32, #tpu.memory_space<vmem>>, vector<1x512xf32>
    %318 = vector.broadcast %317 : vector<1x512xf32> to vector<2x512xf32>
    %319 = arith.addf %316, %318 : vector<2x512xf32>
    %cst_256 = arith.constant 0.000000e+00 : f32
    %320 = vector.broadcast %cst_256 : f32 to vector<2x512xf32>
    %321 = arith.maximumf %319, %320 : vector<2x512xf32>
    %322 = arith.truncf %321 : vector<2x512xf32> to vector<2x512xbf16>
    %c0_257 = arith.constant 0 : index
    %c0_258 = arith.constant 0 : index
    %323 = vector.load %arg5[%c0_257, %c0_258] : memref<512x10xbf16, #tpu.memory_space<vmem>>, vector<512x10xbf16>
    %cst_259 = arith.constant dense<0.000000e+00> : vector<2x10xf32>
    %324 = tpu.matmul %322, %323, %cst_259 {dimension_numbers = #tpu.dot_dimension_numbers<[1], [0], [0], [1], [0, 0, 1, 1], [], []>} : vector<2x512xbf16>, vector<512x10xbf16>, vector<2x10xf32> -> vector<2x10xf32>
    %c0_260 = arith.constant 0 : index
    %c0_261 = arith.constant 0 : index
    %325 = vector.load %arg6[%c0_260, %c0_261] : memref<1x10xf32, #tpu.memory_space<vmem>>, vector<1x10xf32>
    %326 = vector.broadcast %325 : vector<1x10xf32> to vector<2x10xf32>
    %327 = arith.addf %324, %326 : vector<2x10xf32>
    %cst_262 = arith.constant dense<0xFF800000> : vector<2xf32>
    %328 = vector.multi_reduction <maximumf>, %327, %cst_262 [1] : vector<2x10xf32> to vector<2xf32>
    %329 = vector.shape_cast %328 : vector<2xf32> to vector<2x1xf32>
    %330 = vector.broadcast %329 : vector<2x1xf32> to vector<2x10xf32>
    %331 = arith.subf %327, %330 : vector<2x10xf32>
    %332 = math.exp %331 : vector<2x10xf32>
    %cst_263 = arith.constant dense<0.000000e+00> : vector<2xf32>
    %333 = vector.multi_reduction <add>, %332, %cst_263 [1] : vector<2x10xf32> to vector<2xf32>
    %334 = vector.shape_cast %333 : vector<2xf32> to vector<2x1xf32>
    %335 = math.log %334 : vector<2x1xf32>
    %336 = arith.addf %329, %335 : vector<2x1xf32>
    %337 = vector.broadcast %336 : vector<2x1xf32> to vector<2x10xf32>
    %338 = arith.subf %327, %337 : vector<2x10xf32>
    %c0_264 = arith.constant 0 : index
    %c0_265 = arith.constant 0 : index
    %339 = vector.load %arg7[%c0_264, %c0_265] : memref<2x10xf32, #tpu.memory_space<vmem>>, vector<2x10xf32>
    tpu.vector_store %arg7[%c0_264, %c0_265], %338 {strides = array<i32>} : memref<2x10xf32, #tpu.memory_space<vmem>>, vector<2x10xf32>,
    return
  }
}

</mosaic_0001>

<bundles_post_ra>
// kernel: simple_net_forward.2
= control target key start
LH: loop header
LB: loop body
LE: loop exit
PB: predicated region body
PF: predicated region fallthrough
CT: control target
= control target key end

     0   :  { %vm35_vm0 = vcmask 1040384   ;;  %v989_v3 = vmov 0.0   ;;  %v990_v8 = vmov 0   ;;  %vm991_vm1 = vmmov 1   ;;  %s1267_s0 = inlined_call_operand.vmem [shape: f32[4,25,288], index: 0, kind: input, shape index: {}]   ;;  %s1268_s1 = inlined_call_operand.vmem [shape: f32[10,25], index: 1, kind: input, shape index: {}]   ;;  %s1269_s2 = inlined_call_operand.vmem [shape: f32[10,1], index: 2, kind: input, shape index: {}]   ;;  %s1270_s3 = inlined_call_operand.vmem [shape: f32[10,288], index: 3, kind: output, shape index: {}]  }
   0x1   :  { %v17_v0 = vld [vmem:[%s1267_s0 + $0x8] sm:$0xff]  ;;  %v20_v1 = vld [vmem:[%s1267_s0 + $0x20] sm:$0xff]  ;;  %v18_v2 = vld [vmem:[%s1267_s0 + $0x10] sm:$0xff]  ;;  %109 = vmatprep.mubr.f32.mxu0 %v989_v3  ;;  %988 = vset.pattern.permute.xlu0 %v990_v8  ;;  %vm28_vm3 = vcmask 203776   ;;  %vm767_vm4 = vcmask 254976   ;;  %vm763_vm5 = vcmask 261120  }
   0x2   :  { %v905_v4 = vpack.c.bf16 %v20_v1, %v17_v0  ;;  %v21_v5 = vld [vmem:[%s1267_s0 + $0x28] sm:$0xff]  ;;  %v16_v6 = vld [vmem:[%s1267_s0] sm:$0xff]  ;;  %v19_v7 = vld [vmem:[%s1267_s0 + $0x18] sm:$0xff] }
   0x3   :  { %v915_v9 = vpack.c.bf16 %v21_v5, %v18_v2  ;;  %v907_v10 = vpack.c.bf16 %v19_v7, %v16_v6  ;;  %v23_v11 = vld [vmem:[%s1267_s0 + $0x38] sm:$0xff]  ;;  %v26_v12 = vld [vmem:[%s1267_s0 + $0x50] sm:$0x1]  ;;  %vm1038_vm2 = vmpackc.low %vm35_vm0, %vm991_vm1 }
   0x4   :  { %906 = vmatprep.subr.bf16.mxu0 %v905_v4  ;;  %v909_v14 = vpack.c.bf16 %v26_v12, %v23_v11  ;;  %v24_v15 = vld [vmem:[%s1267_s0 + $0x40] sm:$0xff]  ;;  %v27_v16 = vld [vmem:[%s1267_s0 + $0x58] sm:$0x1]  ;;  %v22_v17 = vld [vmem:[%s1267_s0 + $0x30] sm:$0xff] }
   0x5   :  { %916 = vmatprep.subr.bf16.mxu1 %v915_v9  ;;  %908 = vmatpush1.bf16.msra.mxu0 %v907_v10  ;;  %v919_v18 = vpack.c.bf16 %v27_v16, %v24_v15  ;;  %v25_v19 = vld [vmem:[%s1267_s0 + $0x48] sm:$0x1]  ;;  %v1057_v20 = vld [vmem:[%s1268_s1] sm:$0xff]  ;;  %v782_v24 = vld [vmem:[%s1267_s0 + $0x70] sm:$0xff] }
   0x6   :  { %v781_v21 = vld [vmem:[%s1267_s0 + $0x68] sm:$0xff]  ;;  %918 = vmatpush3.bf16.msra.mxu1 %v915_v9  ;;  %911 = vmatprep.subr.msk.bf16.mxu0 %vm1038_vm2, %v909_v14  ;;  %v912_v22 = vpack.c.bf16 %v25_v19, %v22_v17  ;;  %v784_v23 = vld [vmem:[%s1267_s0 + $0x80] sm:$0xff]  ;;  %v783_v29 = vld [vmem:[%s1267_s0 + $0x78] sm:$0xff] }
   0x7   :  { %v785_v25 = vld [vmem:[%s1267_s0 + $0x88] sm:$0xff]  ;;  %921 = vmatprep.subr.msk.bf16.mxu1 %vm1038_vm2, %v919_v18  ;;  %869 = vmatprep.mubr.msk.f32.mxu1 %vm28_vm3, %v1057_v20  ;;  %v925_v26 = vpack.c.bf16 %v784_v23, %v781_v21  ;;  %v780_v28 = vld [vmem:[%s1267_s0 + $0x60] sm:$0xff]  ;;  %v787_v30 = vld [vmem:[%s1267_s0 + $0x98] sm:$0xff] }
   0x8   :  { %v935_v27 = vpack.c.bf16 %v785_v25, %v782_v24  ;;  %v790_v31 = vld [vmem:[%s1267_s0 + $0xb0] sm:$0x1]  ;;  %v788_v32 = vld [vmem:[%s1267_s0 + $0xa0] sm:$0xff]  ;;  %v927_v33 = vpack.c.bf16 %v783_v29, %v780_v28  ;;  %v791_v34 = vld [vmem:[%s1267_s0 + $0xb8] sm:$0x1] }
   0x9   :  { %914 = vmatpush1.bf16.msk.msra.mxu0 %vm1038_vm2, %v912_v22  ;;  %v1102_v35 = vld [vmem:[%s1268_s1 + $0x8] sm:$0x3]  ;;  %v786_v36 = vld [vmem:[%s1267_s0 + $0x90] sm:$0xff]  ;;  %v929_v38 = vpack.c.bf16 %v790_v31, %v787_v30  ;;  %v939_v39 = vpack.c.bf16 %v791_v34, %v788_v32  ;;  %v803_v41 = vld [vmem:[%s1267_s0 + $0xe0] sm:$0xff] }
   0xa   :  { %924 = vmatpush3.bf16.msk.msra.mxu1 %vm1038_vm2, %v919_v18  ;;  %926 = vmatprep.subr.bf16.mxu0 %v925_v26  ;;  %v789_v37 = vld [vmem:[%s1267_s0 + $0xa8] sm:$0x1]  ;;  %v801_v42 = vld [vmem:[%s1267_s0 + $0xd0] sm:$0xff]  ;;  %v799_v46 = vld [vmem:[%s1267_s0 + $0xc0] sm:$0xff] }
   0xb   :  { %936 = vmatprep.subr.bf16.mxu1 %v935_v27  ;;  %v800_v40 = vld [vmem:[%s1267_s0 + $0xc8] sm:$0xff]  ;;  %v932_v44 = vpack.c.bf16 %v789_v37, %v786_v36  ;;  %v802_v47 = vld [vmem:[%s1267_s0 + $0xd8] sm:$0xff]  ;;  %v809_v50 = vld [vmem:[%s1267_s0 + $0x110] sm:$0x1] }
   0xc   :  { %775 = vmatmul.mubr.msk.f32.vlgmr.msra.gmra.mrb[0].mxu0 %vm28_vm3, %v1057_v20  ;;  %v804_v43 = vld [vmem:[%s1267_s0 + $0xe8] sm:$0xff]  ;;  %v945_v45 = vpack.c.bf16 %v803_v41, %v800_v40  ;;  %v806_v49 = vld [vmem:[%s1267_s0 + $0xf8] sm:$0xff]  ;;  %v807_v51 = vld [vmem:[%s1267_s0 + $0x100] sm:$0xff]  ;;  %v947_v53 = vpack.c.bf16 %v802_v47, %v799_v46 }
   0xd   :  { %870 = vmatmul.mubr.msk.f32.vlgmr.msra.gmra.mrb[0].mxu1 %vm28_vm3, %v1102_v35  ;;  %928 = vmatpush1.bf16.msra.mxu0 %v927_v33  ;;  %v955_v48 = vpack.c.bf16 %v804_v43, %v801_v42  ;;  %v810_v52 = vld [vmem:[%s1267_s0 + $0x118] sm:$0x1]  ;;  %v805_v54 = vld [vmem:[%s1267_s0 + $0xf0] sm:$0xff]  ;;  %v808_v55 = vld [vmem:[%s1267_s0 + $0x108] sm:$0x1]  ;;  %v949_v57 = vpack.c.bf16 %v809_v50, %v806_v49 }
   0xe   :  { %938 = vmatpush3.bf16.msra.mxu1 %v935_v27  ;;  %115 = vmatprep.mubr.f32.mxu0 %v989_v3  ;;  %v737_v56 = vld [vmem:[%s1269_s2] sm:$0xff]  ;;  %v959_v58 = vpack.c.bf16 %v810_v52, %v807_v51  ;;  %v819_v59 = vld [vmem:[%s1267_s0 + $0x128] sm:$0xff]  ;;  %v820_v61 = vld [vmem:[%s1267_s0 + $0x130] sm:$0xff]  ;;  %v952_v63 = vpack.c.bf16 %v808_v55, %v805_v54 }
   0xf   :  { %931 = vmatprep.subr.msk.bf16.mxu0 %vm1038_vm2, %v929_v38  ;;  %941 = vmatprep.subr.msk.bf16.mxu1 %vm1038_vm2, %v939_v39  ;;  %v822_v60 = vld [vmem:[%s1267_s0 + $0x140] sm:$0xff]  ;;  %v823_v62 = vld [vmem:[%s1267_s0 + $0x148] sm:$0xff]  ;;  %v821_v2 = vld [vmem:[%s1267_s0 + $0x138] sm:$0xff] }
  0x10   :  { %776 = vmatmul.mubr.msk.f32.gmra.mrb[2].mxu0 %vm28_vm3, %v1102_v35  ;;  %880 = vmatprep.mubr.msk.f32.mxu1 %vm28_vm3, %v1057_v20  ;;  %v965_v0 = vpack.c.bf16 %v822_v60, %v819_v59  ;;  %v818_v1 = vld [vmem:[%s1267_s0 + $0x120] sm:$0xff]  ;;  %v975_v4 = vpack.c.bf16 %v823_v62, %v820_v61  ;;  %v825_v5 = vld [vmem:[%s1267_s0 + $0x158] sm:$0xff]  ;;  %v828_v6 = vld [vmem:[%s1267_s0 + $0x170] sm:$0x1] }
  0x11   :  { %934 = vmatpush1.bf16.msk.msra.mxu0 %vm1038_vm2, %v932_v44  ;;  %283 = vmatprep.mubr.f32.mxu0 %v989_v3  ;;  %v826_v7 = vld [vmem:[%s1267_s0 + $0x160] sm:$0xff]  ;;  %v829_v8 = vld [vmem:[%s1267_s0 + $0x178] sm:$0x1]  ;;  %v738_v9 = vld [vmem:[%s1269_s2 + $0x8] sm:$0x3]  ;;  %v967_v10 = vpack.c.bf16 %v821_v2, %v818_v1  ;;  %v969_v14 = vpack.c.bf16 %v828_v6, %v825_v5 }
  0x12   :  { %944 = vmatpush3.bf16.msk.msra.mxu1 %vm1038_vm2, %v939_v39  ;;  %946 = vmatprep.subr.bf16.mxu0 %v945_v45  ;;  %v824_v11 = vld [vmem:[%s1267_s0 + $0x150] sm:$0xff]  ;;  %v827_v12 = vld [vmem:[%s1267_s0 + $0x168] sm:$0x1]  ;;  %v979_v15 = vpack.c.bf16 %v829_v8, %v826_v7 }
  0x13   :  { %956 = vmatprep.subr.bf16.mxu1 %v955_v48  ;;  %741 = vperm.xlu0 %988, %v737_v56   ;;  %v972_v16 = vpack.c.bf16 %v827_v12, %v824_v11 }
  0x14   :  { %794 = vmatmul.mubr.msk.f32.vlgmr.msra.gmra.mrb[4].mxu0 %vm28_vm3, %v1057_v20 }
  0x15   :  { %881 = vmatmul.mubr.msk.f32.vlgmr.msra.gmra.mrb[2].mxu1 %vm28_vm3, %v1102_v35  ;;  %948 = vmatpush1.bf16.msra.mxu0 %v947_v53 }
  0x16   :  { %958 = vmatpush3.bf16.msra.mxu1 %v955_v48  ;;  %289 = vmatprep.mubr.f32.mxu0 %v989_v3 }
  0x17   :  { %951 = vmatprep.subr.msk.bf16.mxu0 %vm1038_vm2, %v949_v57  ;;  %961 = vmatprep.subr.msk.bf16.mxu1 %vm1038_vm2, %v959_v58 }
  0x18   :  { %795 = vmatmul.mubr.msk.f32.gmra.mrb[6].mxu0 %vm28_vm3, %v1102_v35  ;;  %891 = vmatprep.mubr.msk.f32.mxu1 %vm28_vm3, %v1057_v20 }
  0x19   :  { %954 = vmatpush1.bf16.msk.msra.mxu0 %vm1038_vm2, %v952_v63  ;;  %463 = vmatprep.mubr.f32.mxu0 %v989_v3 }
  0x1a   :  { %964 = vmatpush3.bf16.msk.msra.mxu1 %vm1038_vm2, %v959_v58  ;;  %966 = vmatprep.subr.bf16.mxu0 %v965_v0 }
  0x1b   :  { %976 = vmatprep.subr.bf16.mxu1 %v975_v4  ;;  %746 = vperm.xlu0 %988, %v738_v9  }
  0x1c   :  { %813 = vmatmul.mubr.msk.f32.vlgmr.msra.gmra.mrb[8].mxu0 %vm28_vm3, %v1057_v20 }
  0x1d   :  { %892 = vmatmul.mubr.msk.f32.vlgmr.msra.gmra.mrb[4].mxu1 %vm28_vm3, %v1102_v35  ;;  %968 = vmatpush1.bf16.msra.mxu0 %v967_v10 }
  0x1e   :  { %978 = vmatpush3.bf16.msra.mxu1 %v975_v4  ;;  %469 = vmatprep.mubr.f32.mxu0 %v989_v3 }
  0x1f   :  { %971 = vmatprep.subr.msk.bf16.mxu0 %vm1038_vm2, %v969_v14  ;;  %981 = vmatprep.subr.msk.bf16.mxu1 %vm1038_vm2, %v979_v15 }
  0x20   :  { %814 = vmatmul.mubr.msk.f32.gmra.mrb[10].mxu0 %vm28_vm3, %v1102_v35  ;;  %902 = vmatprep.mubr.msk.f32.mxu1 %vm28_vm3, %v1057_v20 }
  0x21   :  { %974 = vmatpush1.bf16.msk.msra.mxu0 %vm1038_vm2, %v972_v16  ;;  %643 = vmatprep.mubr.f32.mxu0 %v989_v3 }
  0x22   :  { %984 = vmatpush3.bf16.msk.msra.mxu1 %vm1038_vm2, %v979_v15 }
  0x24   :  { %832 = vmatmul.mubr.msk.f32.vlgmr.msra.gmra.mrb[12].mxu0 %vm28_vm3, %v1057_v20 }
  0x25   :  { %903 = vmatmul.mubr.msk.f32.vlgmr.msra.gmra.mrb[6].mxu1 %vm28_vm3, %v1102_v35  ;;  %649 = vmatprep.mubr.f32.mxu0 %v989_v3 }
  0x28   :  { %833 = vmatmul.mubr.msk.f32.gmra.mrb[14].mxu0 %vm28_vm3, %v1102_v35 }
  0x92   :  { %v742_v40 = vpop.permute.xlu0 %741 }
  0x9a   :  { %v747_v47 = vpop.permute.xlu0 %746 }
  0xdf   :  { %v111_v17 = vpop.f32.mrb[0].mxu0 }
  0xe0   :  { %v113_v18 = vpop.f32.mrb[1].mxu0  ;;  %v871_v19 = vpop.f32.mrb[0].mxu1 }
  0xe1   :  { %v188_v21 = vpop.f32.mrb[1].mxu1 }
  0xe3   :  { %v117_v22 = vpop.f32.mrb[2].mxu0 }
  0xe4   :  { %v119_v23 = vpop.f32.mrb[3].mxu0 }
  0xe7   :  { %v285_v24 = vpop.f32.mrb[4].mxu0 }
  0xe8   :  { %v371_v13 = vmax.f32 %v111_v17, %v285_v24  ;;  %v882_v25 = vpop.f32.mrb[2].mxu1  ;;  %v287_v26 = vpop.f32.mrb[5].mxu0 }
  0xe9   :  { %v376_v27 = vmax.f32 %v871_v19, %v882_v25  ;;  %v372_v20 = vmax.f32 %v113_v18, %v287_v26  ;;  %v362_v28 = vpop.f32.mrb[3].mxu1 }
  0xea   :  { %v373_v29 = vmax.f32 %v188_v21, %v362_v28 }
  0xeb   :  { %v291_v30 = vpop.f32.mrb[6].mxu0 }
  0xec   :  { %v374_v31 = vmax.f32 %v117_v22, %v291_v30  ;;  %v293_v3 = vpop.f32.mrb[7].mxu0 }
  0xed   :  { %v375_v32 = vmax.f32 %v119_v23, %v293_v3 }
  0xef   :  { %v465_v33 = vpop.f32.mrb[8].mxu0 }
  0xf0   :  { %v551_v34 = vmax.f32 %v371_v13, %v465_v33  ;;  %v893_v35 = vpop.f32.mrb[4].mxu1  ;;  %v467_v36 = vpop.f32.mrb[9].mxu0 }
  0xf1   :  { %v556_v37 = vmax.f32 %v376_v27, %v893_v35  ;;  %v552_v38 = vmax.f32 %v372_v20, %v467_v36  ;;  %v542_v39 = vpop.f32.mrb[5].mxu1 }
  0xf2   :  { %v553_v41 = vmax.f32 %v373_v29, %v542_v39 }
  0xf3   :  { %v471_v42 = vpop.f32.mrb[10].mxu0 }
  0xf4   :  { %v554_v43 = vmax.f32 %v374_v31, %v471_v42  ;;  %v473_v44 = vpop.f32.mrb[11].mxu0 }
  0xf5   :  { %v555_v45 = vmax.f32 %v375_v32, %v473_v44 }
  0xf7   :  { %v645_v46 = vpop.f32.mrb[12].mxu0 }
  0xf8   :  { %v731_v48 = vmax.f32 %v551_v34, %v645_v46  ;;  %v904_v49 = vpop.f32.mrb[6].mxu1  ;;  %v647_v50 = vpop.f32.mrb[13].mxu0 }
  0xf9   :  { %v736_v51 = vmax.f32 %v556_v37, %v904_v49  ;;  %v732_v52 = vmax.f32 %v552_v38, %v647_v50  ;;  %v722_v53 = vpop.f32.mrb[7].mxu1 }
  0xfa   :  { %v749_v54 = vadd.f32 %v742_v40, %v731_v48  ;;  %v733_v55 = vmax.f32 %v553_v41, %v722_v53 }
  0xfb   :  { %v750_v56 = vadd.f32 %v742_v40, %v732_v52  ;;  %v754_v57 = vadd.f32 %v747_v47, %v736_v51  ;;  %v651_v58 = vpop.f32.mrb[14].mxu0 }
  0xfc   :  { %v755_v59 = vmax.f32 %v749_v54, 0.0  ;;  %v751_v60 = vadd.f32 %v742_v40, %v733_v55  ;;  %v734_v61 = vmax.f32 %v554_v43, %v651_v58  ;;  %v653_v62 = vpop.f32.mrb[15].mxu0 }
  0xfd   :  { %v756_v63 = vmax.f32 %v750_v56, 0.0  ;;  %v760_v0 = vmax.f32 %v754_v57, 0.0  ;;  %v735_v1 = vmax.f32 %v555_v45, %v653_v62 }
  0xfe   :  { %761 = vst [vmem:[%s1270_s3] sm:$0xff] %v755_v59  ;;  %v757_v2 = vmax.f32 %v751_v60, 0.0  ;;  %v752_v4 = vadd.f32 %v747_v47, %v734_v61 }
  0xff   :  { %762 = vst [vmem:[%s1270_s3 + $0x8] sm:$0xff] %v756_v63  ;;  %768 = vst.msk [vmem:[%s1270_s3 + $0x28] sm:$0x3] %vm767_vm4, %v760_v0  ;;  %v753_v5 = vadd.f32 %v747_v47, %v735_v1 }
 0x100   :  { %764 = vst.msk [vmem:[%s1270_s3 + $0x10] sm:$0xff] %vm763_vm5, %v757_v2  ;;  %v758_v6 = vmax.f32 %v752_v4, 0.0 }
 0x101   :  { %v759_v7 = vmax.f32 %v753_v5, 0.0 }
 0x102   :  { %765 = vst [vmem:[%s1270_s3 + $0x18] sm:$0x3] %v758_v6 }
 0x103   :  { %766 = vst [vmem:[%s1270_s3 + $0x20] sm:$0x3] %v759_v7 }

// kernel: simple_net_forward.3
= control target key start
LH: loop header
LB: loop body
LE: loop exit
PB: predicated region body
PF: predicated region fallthrough
CT: control target
= control target key end

     0   :  { %v8155_v3 = vmov 0.0|0.0   ;;  %vm8156_vm0 = vmmov 0   ;;  %v8157_v11 = vmov 0.0   ;;  %v8158_v13 = vmov 0   ;;  %s10333_s0 = inlined_call_operand.vmem [shape: f32[2,90,100], index: 0, kind: input, shape index: {}]   ;;  %s10334_s1 = inlined_call_operand.vmem [shape: f32[20,90], index: 1, kind: input, shape index: {}]   ;;  %s10335_s2 = inlined_call_operand.vmem [shape: f32[20,1], index: 2, kind: input, shape index: {}]   ;;  %s10336_s3 = inlined_call_operand.vmem [shape: bf16[20,100,512], index: 3, kind: input, shape index: {}]   ;;  %s10337_s4 = inlined_call_operand.vmem [shape: f32[1,512], index: 4, kind: input, shape index: {}]   ;;  %s10338_s5 = inlined_call_operand.vmem [shape: bf16[512,10], index: 5, kind: input, shape index: {}]   ;;  %s10339_s6 = inlined_call_operand.vmem [shape: f32[1,10], index: 6, kind: input, shape index: {}]   ;;  %s10340_s7 = inlined_call_operand.hbm [shape: f32[2,10], index: 7, kind: output, shape index: {}]  }
   0x1   :  { %v34_v0 = vld [vmem:[%s10333_s0] sm:$0xff]  ;;  %v35_v1 = vld [vmem:[%s10333_s0 + $0x8] sm:$0xff]  ;;  %7249 = vmatprep.subr.bf16.mxu0 %v8155_v3  ;;  %7268 = vmatprep.subr.bf16.mxu1 %v8155_v3  ;;  %v36_v6 = vld [vmem:[%s10333_s0 + $0x10] sm:$0xff]  ;;  %vm71_vm1 = vcmask 1041408   ;;  %vm8159_vm2 = vmmov 1   ;;  %vm61_vm4 = vcmask 736256  }
   0x2   :  { %v5926_v2 = vld [vmem:[%s10333_s0 + $0x60] sm:$0xff]  ;;  %v7250_v4 = vpack.c.bf16 %v35_v1, %v34_v0  ;;  %v5927_v5 = vld [vmem:[%s10333_s0 + $0x68] sm:$0xff]  ;;  %v37_v7 = vld [vmem:[%s10333_s0 + $0x18] sm:$0xff]  ;;  %7207 = vmatprep.mubr.msk.f32.mxu0 %vm8156_vm0, %v8157_v11  ;;  %7240 = vmatprep.mubr.msk.f32.mxu1 %vm8156_vm0, %v8157_v11  ;;  %vm158_vm5 = vcmask 811008   ;;  %vm161_vm6 = vcmask 812033   ;;  %vm164_vm7 = vcmask 813058  }
   0x3   :  { %v7269_v8 = vpack.c.bf16 %v5927_v5, %v5926_v2  ;;  %v5928_v9 = vld [vmem:[%s10333_s0 + $0x70] sm:$0xff]  ;;  %v5929_v10 = vld [vmem:[%s10333_s0 + $0x78] sm:$0xff]  ;;  %v7253_v12 = vpack.c.bf16 %v37_v7, %v36_v6  ;;  %7293 = vset.pattern.permute.xlu0 %v8158_v13  ;;  %v38_v15 = vld [vmem:[%s10333_s0 + $0x20] sm:$0xff]  ;;  %7294 = vset.pattern.permute.xlu1 %v8158_v13  ;;  %vm167_vm8 = vcmask 814083   ;;  %vm170_vm9 = vcmask 815108  }
   0x4   :  { %7251 = vmatpush3.bf16.msra.mxu0 %v7250_v4  ;;  %v7272_v14 = vpack.c.bf16 %v5929_v10, %v5928_v9  ;;  %v39_v16 = vld [vmem:[%s10333_s0 + $0x28] sm:$0xff]  ;;  %v5930_v17 = vld [vmem:[%s10333_s0 + $0x80] sm:$0xff]  ;;  %v40_v21 = vld [vmem:[%s10333_s0 + $0x30] sm:$0xff]  ;;  %vm173_vm10 = vcmask 816133   ;;  %vm176_vm11 = vcmask 817158   ;;  %vm179_vm12 = vcmask 818183  }
   0x5   :  { %7270 = vmatpush3.bf16.msra.mxu1 %v7269_v8  ;;  %7252 = vmatprep.subr.bf16.mxu0 %v8155_v3  ;;  %v5931_v18 = vld [vmem:[%s10333_s0 + $0x88] sm:$0xff]  ;;  %v7256_v19 = vpack.c.bf16 %v39_v16, %v38_v15  ;;  %v41_v22 = vld [vmem:[%s10333_s0 + $0x38] sm:$0xff]  ;;  %v5932_v23 = vld [vmem:[%s10333_s0 + $0x90] sm:$0xff] }
   0x6   :  { %7271 = vmatprep.subr.bf16.mxu1 %v8155_v3  ;;  %v7275_v20 = vpack.c.bf16 %v5931_v18, %v5930_v17  ;;  %v5933_v24 = vld [vmem:[%s10333_s0 + $0x98] sm:$0xff]  ;;  %v31_v25 = vld [vmem:[%s10335_s2] sm:$0xff]  ;;  %v7259_v27 = vpack.c.bf16 %v41_v22, %v40_v21  ;;  %v32_v28 = vld [vmem:[%s10335_s2 + $0x8] sm:$0xff] }
   0x7   :  { %v42_v26 = vld [vmem:[%s10333_s0 + $0x40] sm:$0xff]  ;;  %48 = vperm.xlu0 %7293, %v31_v25   ;;  %v7278_v29 = vpack.c.bf16 %v5933_v24, %v5932_v23  ;;  %v43_v30 = vld [vmem:[%s10333_s0 + $0x48] sm:$0xff]  ;;  %v44_v34 = vld [vmem:[%s10333_s0 + $0x50] sm:$0xff] }
   0x8   :  { %7254 = vmatpush3.bf16.msra.mxu0 %v7253_v12  ;;  %v5934_v31 = vld [vmem:[%s10333_s0 + $0xa0] sm:$0xff]  ;;  %v5935_v32 = vld [vmem:[%s10333_s0 + $0xa8] sm:$0xff]  ;;  %v7262_v33 = vpack.c.bf16 %v43_v30, %v42_v26  ;;  %v45_v36 = vld [vmem:[%s10333_s0 + $0x58] sm:$0x3] }
   0x9   :  { %7273 = vmatpush3.bf16.msra.mxu1 %v7272_v14  ;;  %7255 = vmatprep.subr.bf16.mxu0 %v8155_v3  ;;  %v7281_v35 = vpack.c.bf16 %v5935_v32, %v5934_v31  ;;  %v5936_v37 = vld [vmem:[%s10333_s0 + $0xb0] sm:$0xff]  ;;  %v5937_v38 = vld [vmem:[%s10333_s0 + $0xb8] sm:$0x3]  ;;  %vm7266_vm3 = vmpackc.low %vm71_vm1, %vm8159_vm2  ;;  %v7265_v39 = vpack.c.bf16 %v45_v36, %v44_v34 }
   0xa   :  { %7274 = vmatprep.subr.bf16.mxu1 %v8155_v3  ;;  %v7297_v40 = vld [vmem:[%s10336_s3 + $0xd4] ss:$16 sps:$4 sm:$0xff]   ;;  %v7284_v41 = vpack.c.bf16 %v5937_v38, %v5936_v37  ;;  %v7300_v42 = vld [vmem:[%s10336_s3 + $0xdc] ss:$16 sps:$4 sm:$0xff]   ;;  %v7295_v44 = vld [vmem:[%s10336_s3 + $0xd0] ss:$16 sps:$4 sm:$0xff]  }
   0xb   :  { %53 = vperm.xlu0 %7293, %v32_v28   ;;  %v28_v43 = vld [vmem:[%s10334_s1] sm:$0xff]  ;;  %v7298_v45 = vld [vmem:[%s10336_s3 + $0xd8] ss:$16 sps:$4 sm:$0xff]   ;;  %v7306_v47 = vld [vmem:[%s10336_s3 + $0xfc] ss:$16 sps:$4 sm:$0xff]  }
   0xc   :  { %7257 = vmatpush3.bf16.msra.mxu0 %v7256_v19  ;;  %v7303_v46 = vld [vmem:[%s10336_s3 + $0xf4] ss:$16 sps:$4 sm:$0xff]   ;;  %v29_v48 = vld [vmem:[%s10334_s1 + $0x8] sm:$0xff]  ;;  %v7301_v49 = vld [vmem:[%s10336_s3 + $0xf0] ss:$16 sps:$4 sm:$0xff]  }
   0xd   :  { %7276 = vmatpush3.bf16.msra.mxu1 %v7275_v20  ;;  %7258 = vmatprep.subr.bf16.mxu0 %v8155_v3  ;;  %v7304_v50 = vld [vmem:[%s10336_s3 + $0xf8] ss:$16 sps:$4 sm:$0xff]   ;;  %v7309_v51 = vld [vmem:[%s10336_s3 + $0x114] ss:$16 sps:$4 sm:$0xff]   ;;  %v7312_v52 = vld [vmem:[%s10336_s3 + $0x11c] ss:$16 sps:$4 sm:$0xff]  }
   0xe   :  { %7277 = vmatprep.subr.bf16.mxu1 %v8155_v3  ;;  %v7307_v53 = vld [vmem:[%s10336_s3 + $0x110] ss:$16 sps:$4 sm:$0xff]   ;;  %v7310_v54 = vld [vmem:[%s10336_s3 + $0x118] ss:$16 sps:$4 sm:$0xff]   ;;  %v7315_v55 = vld [vmem:[%s10336_s3 + $0x134] ss:$16 sps:$4 sm:$0xff]  }
   0xf   :  { %v7318_v56 = vld [vmem:[%s10336_s3 + $0x13c] ss:$16 sps:$4 sm:$0xff]   ;;  %v7313_v57 = vld [vmem:[%s10336_s3 + $0x130] ss:$16 sps:$4 sm:$0xff]   ;;  %v7316_v58 = vld [vmem:[%s10336_s3 + $0x138] ss:$16 sps:$4 sm:$0xff]  }
  0x10   :  { %7260 = vmatpush3.bf16.msra.mxu0 %v7259_v27  ;;  %v7321_v59 = vld [vmem:[%s10336_s3 + $0x154] ss:$16 sps:$4 sm:$0xff]   ;;  %v7324_v60 = vld [vmem:[%s10336_s3 + $0x15c] ss:$16 sps:$4 sm:$0xff]   ;;  %v7319_v61 = vld [vmem:[%s10336_s3 + $0x150] ss:$16 sps:$4 sm:$0xff]  }
  0x11   :  { %7279 = vmatpush3.bf16.msra.mxu1 %v7278_v29  ;;  %7261 = vmatprep.subr.bf16.mxu0 %v8155_v3  ;;  %v7322_v62 = vld [vmem:[%s10336_s3 + $0x158] ss:$16 sps:$4 sm:$0xff]   ;;  %v7327_v63 = vld [vmem:[%s10336_s3 + $0x174] ss:$16 sps:$4 sm:$0xff]   ;;  %v7325_v0 = vld [vmem:[%s10336_s3 + $0x170] ss:$16 sps:$4 sm:$0xff]  }
  0x12   :  { %7280 = vmatprep.subr.bf16.mxu1 %v8155_v3  ;;  %v7328_v1 = vld [vmem:[%s10336_s3 + $0x178] ss:$16 sps:$4 sm:$0xff]   ;;  %v7330_v2 = vld [vmem:[%s10336_s3 + $0x17c] ss:$16 sps:$4 sm:$0xff]   ;;  %v30_v9 = vld [vmem:[%s10334_s1 + $0x10] sm:$0xf] }
  0x13   :  { %v5967_v4 = vld [vmem:[%s10336_s3 + $0x198] sm:$0x33]  ;;  %v7337_v12 = vld [vmem:[%s10336_s3 + $0x4] ss:$16 sps:$4 sm:$0xff]   ;;  %v33_v15 = vld [vmem:[%s10335_s2 + $0x10] sm:$0xf] }
  0x14   :  { %7263 = vmatpush3.bf16.msra.mxu0 %v7262_v33  ;;  %v5995_v6 = vcombine.high %v5967_v4, %v5967_v4  ;;  %v5994_v8 = vcombine.low %v5967_v4, %v5967_v4  ;;  %v7340_v14 = vld [vmem:[%s10336_s3 + $0xc] ss:$16 sps:$4 sm:$0xff]   ;;  %58 = vperm.xlu1 %7294, %v33_v15  }
  0x15   :  { %7282 = vmatpush3.bf16.msra.mxu1 %v7281_v35  ;;  %7264 = vmatprep.subr.bf16.mxu0 %v8155_v3 }
  0x16   :  { %7283 = vmatprep.subr.bf16.mxu1 %v8155_v3  ;;  %v5966_v3 = vld [vmem:[%s10336_s3 + $0x190] sm:$0x33] }
  0x17   :  { %v5993_v5 = vcombine.high %v5966_v3, %v5966_v3  ;;  %v5992_v7 = vcombine.low %v5966_v3, %v5966_v3 }
  0x18   :  { %7267 = vmatpush3.bf16.msk.msra.mxu0 %vm7266_vm3, %v7265_v39 }
  0x19   :  { %7286 = vmatpush3.bf16.msk.msra.mxu1 %vm7266_vm3, %v7284_v41  ;;  %527 = vmatprep.subr.bf16.mxu0 %v7297_v40  ;;  %v516_v10 = vsel %vm71_vm1, %v5992_v7, 0 }
  0x1a   :  { %568 = vmatprep.subr.bf16.mxu1 %v7300_v42 }
  0x1b   :  { %7208 = vmatmul.mubr.msk.f32.vlgmr.msra.gmra.mrb[0].mxu0 %vm61_vm4, %v28_v43 }
  0x1c   :  { %7241 = vmatmul.mubr.msk.f32.vlgmr.msra.gmra.mrb[0].mxu1 %vm61_vm4, %v28_v43  ;;  %7210 = vmatprep.mubr.msk.f32.mxu0 %vm8156_vm0, %v8157_v11 }
  0x1d   :  { %7243 = vmatprep.mubr.msk.f32.mxu1 %vm8156_vm0, %v8157_v11  ;;  %528 = vmatpush1.bf16.msra.mxu0 %v7295_v44 }
  0x1e   :  { %569 = vmatpush1.bf16.msra.mxu1 %v7298_v45  ;;  %529 = vmatprep.subr.bf16.mxu0 %v7303_v46 }
  0x1f   :  { %7211 = vmatmul.mubr.msk.f32.gmra.mrb[2].mxu0 %vm61_vm4, %v29_v48  ;;  %570 = vmatprep.subr.bf16.mxu1 %v7306_v47 }
  0x20   :  { %7244 = vmatmul.mubr.msk.f32.gmra.mrb[2].mxu1 %vm61_vm4, %v29_v48  ;;  %7213 = vmatprep.mubr.msk.f32.mxu0 %vm8156_vm0, %v8157_v11 }
  0x21   :  { %530 = vmatpush1.bf16.msra.mxu0 %v7301_v49  ;;  %7246 = vmatprep.mubr.msk.f32.mxu1 %vm8156_vm0, %v8157_v11  ;;  %v522_v11 = vsel %vm71_vm1, %v5994_v8, 0 }
  0x22   :  { %571 = vmatpush1.bf16.msra.mxu1 %v7304_v50  ;;  %531 = vmatprep.subr.bf16.mxu0 %v7309_v51 }
  0x23   :  { %572 = vmatprep.subr.bf16.mxu1 %v7312_v52  ;;  %7214 = vmatmul.mubr.msk.f32.gmra.mrb[4].mxu0 %vm61_vm4, %v30_v9 }
  0x24   :  { %7247 = vmatmul.mubr.msk.f32.gmra.mrb[4].mxu1 %vm61_vm4, %v30_v9  ;;  %559 = vmatprep.mubr.bf16.mxu0 %v8158_v13 }
  0x25   :  { %532 = vmatpush1.bf16.msra.mxu0 %v7307_v53  ;;  %600 = vmatprep.mubr.bf16.mxu1 %v8158_v13 }
  0x26   :  { %573 = vmatpush1.bf16.msra.mxu1 %v7310_v54  ;;  %533 = vmatprep.subr.bf16.mxu0 %v7315_v55 }
  0x27   :  { %574 = vmatprep.subr.bf16.mxu1 %v7318_v56 }
  0x29   :  { %534 = vmatpush1.bf16.msra.mxu0 %v7313_v57 }
  0x2a   :  { %575 = vmatpush1.bf16.msra.mxu1 %v7316_v58  ;;  %535 = vmatprep.subr.bf16.mxu0 %v7321_v59 }
  0x2b   :  { %576 = vmatprep.subr.bf16.mxu1 %v7324_v60 }
  0x2d   :  { %536 = vmatpush1.bf16.msra.mxu0 %v7319_v61 }
  0x2e   :  { %577 = vmatpush1.bf16.msra.mxu1 %v7322_v62  ;;  %537 = vmatprep.subr.bf16.mxu0 %v7327_v63 }
  0x2f   :  { %578 = vmatprep.subr.bf16.mxu1 %v7330_v2 }
  0x31   :  { %538 = vmatpush1.bf16.msra.mxu0 %v7325_v0 }
  0x32   :  { %579 = vmatpush1.bf16.msra.mxu1 %v7328_v1  ;;  %5996 = vmatprep.subr.msk.bf16.mxu0 %vm71_vm1, %v5993_v5 }
  0x33   :  { %5998 = vmatprep.subr.msk.bf16.mxu1 %vm71_vm1, %v5995_v6 }
  0x35   :  { %540 = vmatpush1.bf16.msra.mxu0 %v516_v10 }
  0x36   :  { %581 = vmatpush1.bf16.msra.mxu1 %v522_v11  ;;  %754 = vmatprep.subr.bf16.mxu0 %v7337_v12 }
  0x37   :  { %795 = vmatprep.subr.bf16.mxu1 %v7340_v14 }
  0x86   :  { %v49_v16 = vpop.permute.xlu0 %48 }
  0xee   :  { %v141_v17 = vpop.f32.mrb[0].mxu0 }
  0xef   :  { %v142_v18 = vadd.f32 %v141_v17, %v49_v16  ;;  %v287_v19 = vpop.f32.mrb[0].mxu1  ;;  %v7209_v20 = vpop.f32.mrb[1].mxu0 }
  0xf0   :  { %v288_v21 = vadd.f32 %v287_v19, %v49_v16  ;;  %v7242_v22 = vpop.f32.mrb[1].mxu1 }
  0xf1   :  { %v155_v23 = vmax.f32 %v142_v18, 0.0 }
  0xf2   :  { %12 = vsyncpa [#allocation4], 0  ;;  %v54_v24 = vpop.permute.xlu0 %53  ;;  %v301_v25 = vmax.f32 %v288_v21, 0.0  ;;  %v146_v26 = vpop.f32.mrb[2].mxu0  ;;  %v7335_v34 = vld [vmem:[%s10336_s3] ss:$16 sps:$4 sm:$0xff]  }
  0xf3   :  { %159 = vst.msk [vmem:[#allocation2] sm:$0x1] %vm158_vm5, %v155_v23  ;;  %v147_v27 = vadd.f32 %v146_v26, %v54_v24  ;;  %v292_v28 = vpop.f32.mrb[2].mxu1  ;;  %v7212_v29 = vpop.f32.mrb[3].mxu0  ;;  %v7338_v35 = vld [vmem:[%s10336_s3 + $0x8] ss:$16 sps:$4 sm:$0xff]  }
  0xf4   :  { %162 = vst.msk [vmem:[#allocation2 + $0x1] sm:$0x2] %vm161_vm6, %v155_v23  ;;  %305 = vst.msk [vmem:[#allocation2 + $0x2] sm:$0x2] %vm161_vm6, %v301_v25  ;;  %v293_v30 = vadd.f32 %v292_v28, %v54_v24  ;;  %v7245_v31 = vpop.f32.mrb[3].mxu1  ;;  %vm511_vm13 = vcmask 818176  }
  0xf5   :  { %165 = vst.msk [vmem:[#allocation2 + $0x2] sm:$0x4] %vm164_vm7, %v155_v23  ;;  %306 = vst.msk [vmem:[#allocation2 + $0x3] sm:$0x4] %vm164_vm7, %v301_v25  ;;  %v156_v32 = vmax.f32 %v147_v27, 0.0  ;;  %vm5893_vm14 = vcmask 74752  }
  0xf6   :  { %168 = vst.msk [vmem:[#allocation2 + $0x3] sm:$0x8] %vm167_vm8, %v155_v23  ;;  %307 = vst.msk [vmem:[#allocation2 + $0x4] sm:$0x8] %vm167_vm8, %v301_v25  ;;  %v302_v33 = vmax.f32 %v293_v30, 0.0 }
  0xf7   :  { %171 = vst.msk [vmem:[#allocation2 + $0x4] sm:$0x10] %vm170_vm9, %v155_v23  ;;  %308 = vst.msk [vmem:[#allocation2 + $0x5] sm:$0x10] %vm170_vm9, %v301_v25  ;;  %v7343_v38 = vld [vmem:[%s10336_s3 + $0x24] ss:$16 sps:$4 sm:$0xff]  }
  0xf8   :  { %174 = vst.msk [vmem:[#allocation2 + $0x5] sm:$0x20] %vm173_vm10, %v155_v23  ;;  %309 = vst.msk [vmem:[#allocation2 + $0x6] sm:$0x20] %vm173_vm10, %v301_v25  ;;  %v7346_v39 = vld [vmem:[%s10336_s3 + $0x2c] ss:$16 sps:$4 sm:$0xff]  }
  0xf9   :  { %177 = vst.msk [vmem:[#allocation2 + $0x6] sm:$0x40] %vm176_vm11, %v155_v23  ;;  %310 = vst.msk [vmem:[#allocation2 + $0x7] sm:$0x40] %vm176_vm11, %v301_v25  ;;  %v7341_v40 = vld [vmem:[%s10336_s3 + $0x20] ss:$16 sps:$4 sm:$0xff]  }
  0xfa   :  { %180 = vst.msk [vmem:[#allocation2 + $0x7] sm:$0x80] %vm179_vm12, %v155_v23  ;;  %311 = vst.msk [vmem:[#allocation2 + $0x8] sm:$0x80] %vm179_vm12, %v301_v25  ;;  %v7344_v41 = vld [vmem:[%s10336_s3 + $0x28] ss:$16 sps:$4 sm:$0xff]  }
  0xfb   :  { %304 = vst.msk [vmem:[#allocation2 + $0x1] sm:$0x1] %vm158_vm5, %v301_v25  ;;  %182 = vst.msk [vmem:[#allocation2 + $0x10] sm:$0x1] %vm158_vm5, %v156_v32  ;;  %v352_v36 = vld [vmem:[#allocation2 + $0x2] sm:$0x3] }
  0xfc   :  { %184 = vst.msk [vmem:[#allocation2 + $0x11] sm:$0x2] %vm161_vm6, %v156_v32  ;;  %313 = vst.msk [vmem:[#allocation2 + $0x12] sm:$0x2] %vm161_vm6, %v302_v33  ;;  %v353_v37 = vpack.c.bf16 %v352_v36, %v352_v36  ;;  %v7349_v42 = vld [vmem:[%s10336_s3 + $0x44] ss:$16 sps:$4 sm:$0xff]  }
  0xfd   :  { %186 = vst.msk [vmem:[#allocation2 + $0x12] sm:$0x4] %vm164_vm7, %v156_v32  ;;  %314 = vst.msk [vmem:[#allocation2 + $0x13] sm:$0x4] %vm164_vm7, %v302_v33  ;;  %v7352_v43 = vld [vmem:[%s10336_s3 + $0x4c] ss:$16 sps:$4 sm:$0xff]  }
  0xfe   :  { %188 = vst.msk [vmem:[#allocation2 + $0x13] sm:$0x8] %vm167_vm8, %v156_v32  ;;  %315 = vst.msk [vmem:[#allocation2 + $0x14] sm:$0x8] %vm167_vm8, %v302_v33  ;;  %5997 = vmatmul.mubr.msk.bf16.vlgmr.msra.gmra.mrb[8].mxu0 %vm511_vm13, %v353_v37  ;;  %5999 = vmatmul.mubr.msk.bf16.vlgmr.msra.gmra.mrb[8].mxu1 %vm511_vm13, %v353_v37  ;;  %v7347_v44 = vld [vmem:[%s10336_s3 + $0x40] ss:$16 sps:$4 sm:$0xff]  }
  0xff   :  { %190 = vst.msk [vmem:[#allocation2 + $0x14] sm:$0x10] %vm170_vm9, %v156_v32  ;;  %316 = vst.msk [vmem:[#allocation2 + $0x15] sm:$0x10] %vm170_vm9, %v302_v33  ;;  %755 = vmatpush1.bf16.msra.mxu0 %v7335_v34  ;;  %796 = vmatpush1.bf16.msra.mxu1 %v7338_v35  ;;  %v7350_v45 = vld [vmem:[%s10336_s3 + $0x48] ss:$16 sps:$4 sm:$0xff]  }
 0x100   :  { %192 = vst.msk [vmem:[#allocation2 + $0x15] sm:$0x20] %vm173_vm10, %v156_v32  ;;  %317 = vst.msk [vmem:[#allocation2 + $0x16] sm:$0x20] %vm173_vm10, %v302_v33  ;;  %756 = vmatprep.subr.bf16.mxu0 %v7343_v38  ;;  %797 = vmatprep.subr.bf16.mxu1 %v7346_v39  ;;  %v7355_v46 = vld [vmem:[%s10336_s3 + $0x64] ss:$16 sps:$4 sm:$0xff]  }
 0x101   :  { %194 = vst.msk [vmem:[#allocation2 + $0x16] sm:$0x40] %vm176_vm11, %v156_v32  ;;  %318 = vst.msk [vmem:[#allocation2 + $0x17] sm:$0x40] %vm176_vm11, %v302_v33  ;;  %786 = vmatprep.mubr.bf16.mxu0 %v8158_v13  ;;  %827 = vmatprep.mubr.bf16.mxu1 %v8158_v13  ;;  %v7358_v47 = vld [vmem:[%s10336_s3 + $0x6c] ss:$16 sps:$4 sm:$0xff]  }
 0x102   :  { %196 = vst.msk [vmem:[#allocation2 + $0x17] sm:$0x80] %vm179_vm12, %v156_v32  ;;  %319 = vst.msk [vmem:[#allocation2 + $0x18] sm:$0x80] %vm179_vm12, %v302_v33  ;;  %v7353_v48 = vld [vmem:[%s10336_s3 + $0x60] ss:$16 sps:$4 sm:$0xff]  }
 0x103   :  { %312 = vst.msk [vmem:[#allocation2 + $0x11] sm:$0x1] %vm158_vm5, %v302_v33  ;;  %757 = vmatpush1.bf16.msra.mxu0 %v7341_v40  ;;  %798 = vmatpush1.bf16.msra.mxu1 %v7344_v41  ;;  %v7356_v49 = vld [vmem:[%s10336_s3 + $0x68] ss:$16 sps:$4 sm:$0xff]   ;;  %v7361_v50 = vld [vmem:[%s10336_s3 + $0x84] ss:$16 sps:$4 sm:$0xff]  }
 0x104   :  { %758 = vmatprep.subr.bf16.mxu0 %v7349_v42  ;;  %799 = vmatprep.subr.bf16.mxu1 %v7352_v43  ;;  %v7364_v51 = vld [vmem:[%s10336_s3 + $0x8c] ss:$16 sps:$4 sm:$0xff]   ;;  %v7359_v52 = vld [vmem:[%s10336_s3 + $0x80] ss:$16 sps:$4 sm:$0xff]   ;;  %v7362_v53 = vld [vmem:[%s10336_s3 + $0x88] ss:$16 sps:$4 sm:$0xff]  }
 0x105   :  { %v7367_v54 = vld [vmem:[%s10336_s3 + $0xa4] ss:$16 sps:$4 sm:$0xff]   ;;  %v7370_v55 = vld [vmem:[%s10336_s3 + $0xac] ss:$16 sps:$4 sm:$0xff]   ;;  %v7365_v58 = vld [vmem:[%s10336_s3 + $0xa0] ss:$16 sps:$4 sm:$0xff]  }
 0x106   :  { %v350_v56 = vld [vmem:[%s10336_s3 + $0xc0] sm:$0x33]  ;;  %v351_v57 = vld [vmem:[%s10336_s3 + $0xc8] sm:$0x33] }
 0x107   :  { %759 = vmatpush1.bf16.msra.mxu0 %v7347_v44  ;;  %800 = vmatpush1.bf16.msra.mxu1 %v7350_v45  ;;  %v7368_v59 = vld [vmem:[%s10336_s3 + $0xa8] ss:$16 sps:$4 sm:$0xff]   ;;  %v6025_v60 = vcombine.high %v350_v56, %v350_v56  ;;  %v6027_v61 = vcombine.high %v351_v57, %v351_v57  ;;  %v6024_v62 = vcombine.low %v350_v56, %v350_v56  ;;  %v7377_v2 = vld [vmem:[%s10336_s3 + $0x1a4] ss:$16 sps:$4 sm:$0xff]   ;;  %v7380_v3 = vld [vmem:[%s10336_s3 + $0x1ac] ss:$16 sps:$4 sm:$0xff]  }
 0x108   :  { %760 = vmatprep.subr.bf16.mxu0 %v7355_v46  ;;  %801 = vmatprep.subr.bf16.mxu1 %v7358_v47  ;;  %v6026_v63 = vcombine.low %v351_v57, %v351_v57  ;;  %v324_v4 = vld [vmem:[#allocation2] sm:$0x3]  ;;  %v7378_v6 = vld [vmem:[%s10336_s3 + $0x1a8] ss:$16 sps:$4 sm:$0xff]   ;;  %v7383_v8 = vld [vmem:[%s10336_s3 + $0x1c4] ss:$16 sps:$4 sm:$0xff]  }
 0x109   :  { %v743_v0 = vsel %vm71_vm1, %v6024_v62, 0  ;;  %v7375_v5 = vld [vmem:[%s10336_s3 + $0x1a0] ss:$16 sps:$4 sm:$0xff]   ;;  %v325_v7 = vpack.c.bf16 %v324_v4, %v324_v4  ;;  %v7386_v9 = vld [vmem:[%s10336_s3 + $0x1cc] ss:$16 sps:$4 sm:$0xff]  }
 0x10a   :  { %v749_v1 = vsel %vm71_vm1, %v6026_v63, 0  ;;  %v7381_v10 = vld [vmem:[%s10336_s3 + $0x1c0] ss:$16 sps:$4 sm:$0xff]   ;;  %v7384_v11 = vld [vmem:[%s10336_s3 + $0x1c8] ss:$16 sps:$4 sm:$0xff]  }
 0x10b   :  { %761 = vmatpush1.bf16.msra.mxu0 %v7353_v48  ;;  %802 = vmatpush1.bf16.msra.mxu1 %v7356_v49  ;;  %v7389_v12 = vld [vmem:[%s10336_s3 + $0x1e4] ss:$16 sps:$4 sm:$0xff]   ;;  %v7392_v14 = vld [vmem:[%s10336_s3 + $0x1ec] ss:$16 sps:$4 sm:$0xff]   ;;  %v7387_v15 = vld [vmem:[%s10336_s3 + $0x1e0] ss:$16 sps:$4 sm:$0xff]  }
 0x10c   :  { %762 = vmatprep.subr.bf16.mxu0 %v7361_v50  ;;  %803 = vmatprep.subr.bf16.mxu1 %v7364_v51  ;;  %v7390_v16 = vld [vmem:[%s10336_s3 + $0x1e8] ss:$16 sps:$4 sm:$0xff]   ;;  %v7395_v17 = vld [vmem:[%s10336_s3 + $0x204] ss:$16 sps:$4 sm:$0xff]   ;;  %v7398_v18 = vld [vmem:[%s10336_s3 + $0x20c] ss:$16 sps:$4 sm:$0xff]  }
 0x10d   :  { %v7393_v19 = vld [vmem:[%s10336_s3 + $0x200] ss:$16 sps:$4 sm:$0xff]   ;;  %v7396_v20 = vld [vmem:[%s10336_s3 + $0x208] ss:$16 sps:$4 sm:$0xff]   ;;  %v7401_v21 = vld [vmem:[%s10336_s3 + $0x224] ss:$16 sps:$4 sm:$0xff]  }
 0x10e   :  { %v7404_v22 = vld [vmem:[%s10336_s3 + $0x22c] ss:$16 sps:$4 sm:$0xff]   ;;  %v7399_v23 = vld [vmem:[%s10336_s3 + $0x220] ss:$16 sps:$4 sm:$0xff]   ;;  %v7402_v24 = vld [vmem:[%s10336_s3 + $0x228] ss:$16 sps:$4 sm:$0xff]  }
 0x10f   :  { %763 = vmatpush1.bf16.msra.mxu0 %v7359_v52  ;;  %804 = vmatpush1.bf16.msra.mxu1 %v7362_v53  ;;  %v7407_v25 = vld [vmem:[%s10336_s3 + $0x244] ss:$16 sps:$4 sm:$0xff]   ;;  %v7410_v26 = vld [vmem:[%s10336_s3 + $0x24c] ss:$16 sps:$4 sm:$0xff]   ;;  %v7405_v29 = vld [vmem:[%s10336_s3 + $0x240] ss:$16 sps:$4 sm:$0xff]  }
 0x110   :  { %764 = vmatprep.subr.bf16.mxu0 %v7367_v54  ;;  %805 = vmatprep.subr.bf16.mxu1 %v7370_v55  ;;  %v6056_v27 = vld [vmem:[%s10336_s3 + $0x260] sm:$0x33]  ;;  %v6057_v28 = vld [vmem:[%s10336_s3 + $0x268] sm:$0x33]  ;;  %v6115_v62 = vld [vmem:[%s10336_s3 + $0x338] sm:$0x33] }
 0x111   :  { %v7408_v30 = vld [vmem:[%s10336_s3 + $0x248] ss:$16 sps:$4 sm:$0xff]   ;;  %v6083_v31 = vcombine.high %v6056_v27, %v6056_v27  ;;  %v6085_v32 = vcombine.high %v6057_v28, %v6057_v28  ;;  %v6082_v33 = vcombine.low %v6056_v27, %v6056_v27  ;;  %v6084_v34 = vcombine.low %v6057_v28, %v6057_v28  ;;  %v7417_v37 = vld [vmem:[%s10336_s3 + $0x274] ss:$16 sps:$4 sm:$0xff]   ;;  %v7420_v38 = vld [vmem:[%s10336_s3 + $0x27c] ss:$16 sps:$4 sm:$0xff]  }
 0x112   :  { %v836_v39 = vld [vmem:[#allocation2 + $0x4] sm:$0x3]  ;;  %v7415_v40 = vld [vmem:[%s10336_s3 + $0x270] ss:$16 sps:$4 sm:$0xff]   ;;  %v7418_v41 = vld [vmem:[%s10336_s3 + $0x278] ss:$16 sps:$4 sm:$0xff]   ;;  %v6142_v4 = vcombine.low %v6115_v62, %v6115_v62 }
 0x113   :  { %765 = vmatpush1.bf16.msra.mxu0 %v7365_v58  ;;  %806 = vmatpush1.bf16.msra.mxu1 %v7368_v59  ;;  %v999_v35 = vsel %vm71_vm1, %v6082_v33, 0  ;;  %v1005_v36 = vsel %vm71_vm1, %v6084_v34, 0  ;;  %v837_v42 = vpack.c.bf16 %v836_v39, %v836_v39  ;;  %v7423_v43 = vld [vmem:[%s10336_s3 + $0x294] ss:$16 sps:$4 sm:$0xff]   ;;  %v7426_v44 = vld [vmem:[%s10336_s3 + $0x29c] ss:$16 sps:$4 sm:$0xff]  }
 0x114   :  { %6028 = vmatprep.subr.msk.bf16.mxu0 %vm71_vm1, %v6025_v60  ;;  %6030 = vmatprep.subr.msk.bf16.mxu1 %vm71_vm1, %v6027_v61  ;;  %v7421_v45 = vld [vmem:[%s10336_s3 + $0x290] ss:$16 sps:$4 sm:$0xff]   ;;  %v7424_v46 = vld [vmem:[%s10336_s3 + $0x298] ss:$16 sps:$4 sm:$0xff]   ;;  %v7429_v47 = vld [vmem:[%s10336_s3 + $0x2b4] ss:$16 sps:$4 sm:$0xff]  }
 0x115   :  { %v7432_v48 = vld [vmem:[%s10336_s3 + $0x2bc] ss:$16 sps:$4 sm:$0xff]   ;;  %v7427_v49 = vld [vmem:[%s10336_s3 + $0x2b0] ss:$16 sps:$4 sm:$0xff]   ;;  %v7430_v50 = vld [vmem:[%s10336_s3 + $0x2b8] ss:$16 sps:$4 sm:$0xff]  }
 0x116   :  { %v7435_v51 = vld [vmem:[%s10336_s3 + $0x2d4] ss:$16 sps:$4 sm:$0xff]   ;;  %v7438_v52 = vld [vmem:[%s10336_s3 + $0x2dc] ss:$16 sps:$4 sm:$0xff]   ;;  %v7433_v53 = vld [vmem:[%s10336_s3 + $0x2d0] ss:$16 sps:$4 sm:$0xff]  }
 0x117   :  { %767 = vmatpush1.bf16.msra.mxu0 %v743_v0  ;;  %808 = vmatpush1.bf16.msra.mxu1 %v749_v1  ;;  %v7436_v54 = vld [vmem:[%s10336_s3 + $0x2d8] ss:$16 sps:$4 sm:$0xff]   ;;  %v7441_v55 = vld [vmem:[%s10336_s3 + $0x2f4] ss:$16 sps:$4 sm:$0xff]   ;;  %v7444_v56 = vld [vmem:[%s10336_s3 + $0x2fc] ss:$16 sps:$4 sm:$0xff]  }
 0x118   :  { %1010 = vmatprep.subr.bf16.mxu0 %v7377_v2  ;;  %1051 = vmatprep.subr.bf16.mxu1 %v7380_v3  ;;  %v7439_v57 = vld [vmem:[%s10336_s3 + $0x2f0] ss:$16 sps:$4 sm:$0xff]   ;;  %v7442_v58 = vld [vmem:[%s10336_s3 + $0x2f8] ss:$16 sps:$4 sm:$0xff]   ;;  %v7447_v59 = vld [vmem:[%s10336_s3 + $0x314] ss:$16 sps:$4 sm:$0xff]   ;;  %v6143_v3 = vcombine.high %v6115_v62, %v6115_v62 }
 0x119   :  { %v7450_v60 = vld [vmem:[%s10336_s3 + $0x31c] ss:$16 sps:$4 sm:$0xff]   ;;  %v6114_v61 = vld [vmem:[%s10336_s3 + $0x330] sm:$0x33]  ;;  %v7448_v0 = vld [vmem:[%s10336_s3 + $0x318] ss:$16 sps:$4 sm:$0xff]  }
 0x11a   :  { %6029 = vmatmul.mubr.msk.bf16.vlgmr.msra.gmra.mrb[12].mxu0 %vm511_vm13, %v325_v7  ;;  %6031 = vmatmul.mubr.msk.bf16.vlgmr.msra.gmra.mrb[12].mxu1 %vm511_vm13, %v325_v7  ;;  %v7445_v63 = vld [vmem:[%s10336_s3 + $0x310] ss:$16 sps:$4 sm:$0xff]   ;;  %v6140_v1 = vcombine.low %v6114_v61, %v6114_v61  ;;  %v6141_v2 = vcombine.high %v6114_v61, %v6114_v61  ;;  %v7457_v7 = vld [vmem:[%s10336_s3 + $0x344] ss:$16 sps:$4 sm:$0xff]   ;;  %v7472_v28 = vld [vmem:[%s10336_s3 + $0x38c] ss:$16 sps:$4 sm:$0xff]  }
 0x11b   :  { %1011 = vmatpush1.bf16.msra.mxu0 %v7375_v5  ;;  %1052 = vmatpush1.bf16.msra.mxu1 %v7378_v6  ;;  %v1265_v6 = vsel %vm71_vm1, %v6142_v4, 0  ;;  %v7469_v27 = vld [vmem:[%s10336_s3 + $0x384] ss:$16 sps:$4 sm:$0xff]   ;;  %v7473_v33 = vld [vmem:[%s10336_s3 + $0x3a0] ss:$16 sps:$4 sm:$0xff]  }
 0x11c   :  { %1012 = vmatprep.subr.bf16.mxu0 %v7383_v8  ;;  %1053 = vmatprep.subr.bf16.mxu1 %v7386_v9  ;;  %v1259_v5 = vsel %vm71_vm1, %v6140_v1, 0  ;;  %v7460_v8 = vld [vmem:[%s10336_s3 + $0x34c] ss:$16 sps:$4 sm:$0xff]   ;;  %v151_v9 = vpop.f32.mrb[4].mxu0  ;;  %v7476_v34 = vld [vmem:[%s10336_s3 + $0x3a8] ss:$16 sps:$4 sm:$0xff]  }
 0x11d   :  { %1042 = vmatprep.mubr.bf16.mxu0 %v8158_v13  ;;  %1083 = vmatprep.mubr.bf16.mxu1 %v8158_v13  ;;  %v7487_v39 = vld [vmem:[%s10336_s3 + $0x3e4] ss:$16 sps:$4 sm:$0xff]   ;;  %v7512_v62 = vld [vmem:[%s10336_s3 + $0x45c] ss:$16 sps:$4 sm:$0xff]   ;;  %v7516_v4 = vld [vmem:[%s10336_s3 + $0x478] ss:$16 sps:$4 sm:$0xff]  }
 0x11e   :  { %v7509_v61 = vld [vmem:[%s10336_s3 + $0x454] ss:$16 sps:$4 sm:$0xff]  }
 0x11f   :  { %1013 = vmatpush1.bf16.msra.mxu0 %v7381_v10  ;;  %1054 = vmatpush1.bf16.msra.mxu1 %v7384_v11  ;;  %v59_v10 = vpop.permute.xlu1 %58  ;;  %v1096_v11 = vld [vmem:[#allocation2 + $0x6] sm:$0x3] }
 0x120   :  { %1014 = vmatprep.subr.bf16.mxu0 %v7389_v12  ;;  %1055 = vmatprep.subr.bf16.mxu1 %v7392_v14  ;;  %v152_v12 = vadd.f32 %v151_v9, %v59_v10  ;;  %v7215_v14 = vpop.f32.mrb[5].mxu0  ;;  %v7515_v1 = vld [vmem:[%s10336_s3 + $0x474] ss:$16 sps:$4 sm:$0xff]  }
 0x121   :  { %v7527_v9 = vld [vmem:[%s10336_s3 + $0x4b4] ss:$16 sps:$4 sm:$0xff]   ;;  %v7525_v14 = vld [vmem:[%s10336_s3 + $0x4b0] ss:$16 sps:$4 sm:$0xff]  }
 0x123   :  { %1015 = vmatpush1.bf16.msra.mxu0 %v7387_v15  ;;  %1056 = vmatpush1.bf16.msra.mxu1 %v7390_v16  ;;  %v297_v15 = vpop.f32.mrb[4].mxu1 }
 0x124   :  { %1016 = vmatprep.subr.bf16.mxu0 %v7395_v17  ;;  %1057 = vmatprep.subr.bf16.mxu1 %v7398_v18  ;;  %v298_v16 = vadd.f32 %v297_v15, %v59_v10  ;;  %v7248_v17 = vpop.f32.mrb[5].mxu1  ;;  %v7455_v18 = vld [vmem:[%s10336_s3 + $0x340] ss:$16 sps:$4 sm:$0xff]   ;;  %v7530_v10 = vld [vmem:[%s10336_s3 + $0x4bc] ss:$16 sps:$4 sm:$0xff]  }
 0x125   :  { %v7528_v15 = vld [vmem:[%s10336_s3 + $0x4b8] ss:$16 sps:$4 sm:$0xff]  }
 0x127   :  { %1017 = vmatpush1.bf16.msra.mxu0 %v7393_v19  ;;  %1058 = vmatpush1.bf16.msra.mxu1 %v7396_v20  ;;  %v7458_v19 = vld [vmem:[%s10336_s3 + $0x348] ss:$16 sps:$4 sm:$0xff]   ;;  %v157_v20 = vmax.f32 %v152_v12, 0.0 }
 0x128   :  { %1018 = vmatprep.subr.bf16.mxu0 %v7401_v21  ;;  %1059 = vmatprep.subr.bf16.mxu1 %v7404_v22  ;;  %v1097_v21 = vpack.c.bf16 %v1096_v11, %v1096_v11  ;;  %v7463_v22 = vld [vmem:[%s10336_s3 + $0x364] ss:$16 sps:$4 sm:$0xff]   ;;  %v6231_v12 = vld [vmem:[%s10336_s3 + $0x4d8] sm:$0x33] }
 0x129   :  { %198 = vst.msk [vmem:[#allocation2 + $0x20] sm:$0x1] %vm158_vm5, %v157_v20  ;;  %v6230_v11 = vld [vmem:[%s10336_s3 + $0x4d0] sm:$0x33]  ;;  %v6259_v17 = vcombine.high %v6231_v12, %v6231_v12 }
 0x12a   :  { %200 = vst.msk [vmem:[#allocation2 + $0x21] sm:$0x2] %vm161_vm6, %v157_v20 }
 0x12b   :  { %1019 = vmatpush1.bf16.msra.mxu0 %v7399_v23  ;;  %1060 = vmatpush1.bf16.msra.mxu1 %v7402_v24  ;;  %v7466_v23 = vld [vmem:[%s10336_s3 + $0x36c] ss:$16 sps:$4 sm:$0xff]   ;;  %v303_v24 = vmax.f32 %v298_v16, 0.0  ;;  %202 = vst.msk [vmem:[#allocation2 + $0x22] sm:$0x4] %vm164_vm7, %v157_v20  ;;  %v6257_v16 = vcombine.high %v6230_v11, %v6230_v11 }
 0x12c   :  { %1020 = vmatprep.subr.bf16.mxu0 %v7407_v25  ;;  %1061 = vmatprep.subr.bf16.mxu1 %v7410_v26  ;;  %204 = vst.msk [vmem:[#allocation2 + $0x23] sm:$0x8] %vm167_vm8, %v157_v20  ;;  %v7461_v25 = vld [vmem:[%s10336_s3 + $0x360] ss:$16 sps:$4 sm:$0xff]   ;;  %v7464_v26 = vld [vmem:[%s10336_s3 + $0x368] ss:$16 sps:$4 sm:$0xff]  }
 0x12d   :  { %320 = vst.msk [vmem:[#allocation2 + $0x21] sm:$0x1] %vm158_vm5, %v303_v24 }
 0x12e   :  { %321 = vst.msk [vmem:[#allocation2 + $0x22] sm:$0x2] %vm161_vm6, %v303_v24 }
 0x12f   :  { %1021 = vmatpush1.bf16.msra.mxu0 %v7405_v29  ;;  %1062 = vmatpush1.bf16.msra.mxu1 %v7408_v30  ;;  %322 = vst.msk [vmem:[#allocation2 + $0x23] sm:$0x4] %vm164_vm7, %v303_v24  ;;  %v7467_v29 = vld [vmem:[%s10336_s3 + $0x380] ss:$16 sps:$4 sm:$0xff]   ;;  %v7470_v30 = vld [vmem:[%s10336_s3 + $0x388] ss:$16 sps:$4 sm:$0xff]  }
 0x130   :  { %6086 = vmatprep.subr.msk.bf16.mxu0 %vm71_vm1, %v6083_v31  ;;  %6088 = vmatprep.subr.msk.bf16.mxu1 %vm71_vm1, %v6085_v32  ;;  %323 = vst.msk [vmem:[#allocation2 + $0x24] sm:$0x8] %vm167_vm8, %v303_v24  ;;  %v7475_v31 = vld [vmem:[%s10336_s3 + $0x3a4] ss:$16 sps:$4 sm:$0xff]   ;;  %v7478_v32 = vld [vmem:[%s10336_s3 + $0x3ac] ss:$16 sps:$4 sm:$0xff]  }
 0x131   :  { %v1616_v24 = vld [vmem:[#allocation2 + $0xa] sm:$0x3] }
 0x133   :  { %1023 = vmatpush1.bf16.msra.mxu0 %v999_v35  ;;  %1064 = vmatpush1.bf16.msra.mxu1 %v1005_v36  ;;  %v7481_v35 = vld [vmem:[%s10336_s3 + $0x3c4] ss:$16 sps:$4 sm:$0xff]   ;;  %v7484_v36 = vld [vmem:[%s10336_s3 + $0x3cc] ss:$16 sps:$4 sm:$0xff]  }
 0x134   :  { %1270 = vmatprep.subr.bf16.mxu0 %v7417_v37  ;;  %1311 = vmatprep.subr.bf16.mxu1 %v7420_v38  ;;  %v7479_v37 = vld [vmem:[%s10336_s3 + $0x3c0] ss:$16 sps:$4 sm:$0xff]   ;;  %v7482_v38 = vld [vmem:[%s10336_s3 + $0x3c8] ss:$16 sps:$4 sm:$0xff]  }
 0x136   :  { %6087 = vmatmul.mubr.msk.bf16.vlgmr.msra.gmra.mrb[16].mxu0 %vm511_vm13, %v837_v42  ;;  %6089 = vmatmul.mubr.msk.bf16.vlgmr.msra.gmra.mrb[16].mxu1 %vm511_vm13, %v837_v42  ;;  %v6173_v42 = vld [vmem:[%s10336_s3 + $0x408] sm:$0x33] }
 0x137   :  { %1271 = vmatpush1.bf16.msra.mxu0 %v7415_v40  ;;  %1312 = vmatpush1.bf16.msra.mxu1 %v7418_v41  ;;  %v7490_v40 = vld [vmem:[%s10336_s3 + $0x3ec] ss:$16 sps:$4 sm:$0xff]   ;;  %v6172_v41 = vld [vmem:[%s10336_s3 + $0x400] sm:$0x33] }
 0x138   :  { %1272 = vmatprep.subr.bf16.mxu0 %v7423_v43  ;;  %1313 = vmatprep.subr.bf16.mxu1 %v7426_v44  ;;  %v7485_v43 = vld [vmem:[%s10336_s3 + $0x3e0] ss:$16 sps:$4 sm:$0xff]   ;;  %v7488_v44 = vld [vmem:[%s10336_s3 + $0x3e8] ss:$16 sps:$4 sm:$0xff]  }
 0x139   :  { %1302 = vmatprep.mubr.bf16.mxu0 %v8158_v13  ;;  %1343 = vmatprep.mubr.bf16.mxu1 %v8158_v13 }
 0x13b   :  { %1273 = vmatpush1.bf16.msra.mxu0 %v7421_v45  ;;  %1314 = vmatpush1.bf16.msra.mxu1 %v7424_v46  ;;  %v6199_v45 = vcombine.high %v6172_v41, %v6172_v41  ;;  %v6201_v46 = vcombine.high %v6173_v42, %v6173_v42 }
 0x13c   :  { %1274 = vmatprep.subr.bf16.mxu0 %v7429_v47  ;;  %1315 = vmatprep.subr.bf16.mxu1 %v7432_v48  ;;  %v6198_v47 = vcombine.low %v6172_v41, %v6172_v41  ;;  %v6200_v48 = vcombine.low %v6173_v42, %v6173_v42  ;;  %v7564_v41 = vld [vmem:[%s10336_s3 + $0x56c] ss:$16 sps:$4 sm:$0xff]   ;;  %v7559_v42 = vld [vmem:[%s10336_s3 + $0x560] ss:$16 sps:$4 sm:$0xff]  }
 0x13f   :  { %1275 = vmatpush1.bf16.msra.mxu0 %v7427_v49  ;;  %1316 = vmatpush1.bf16.msra.mxu1 %v7430_v50  ;;  %v1519_v49 = vsel %vm71_vm1, %v6198_v47, 0  ;;  %v1525_v50 = vsel %vm71_vm1, %v6200_v48, 0  ;;  %v6289_v47 = vld [vmem:[%s10336_s3 + $0x5a8] sm:$0x33]  ;;  %v7565_v48 = vld [vmem:[%s10336_s3 + $0x580] ss:$16 sps:$4 sm:$0xff]  }
 0x140   :  { %1276 = vmatprep.subr.bf16.mxu0 %v7435_v51  ;;  %1317 = vmatprep.subr.bf16.mxu1 %v7438_v52  ;;  %v7497_v51 = vld [vmem:[%s10336_s3 + $0x414] ss:$16 sps:$4 sm:$0xff]   ;;  %v7500_v52 = vld [vmem:[%s10336_s3 + $0x41c] ss:$16 sps:$4 sm:$0xff]  }
 0x143   :  { %1277 = vmatpush1.bf16.msra.mxu0 %v7433_v53  ;;  %1318 = vmatpush1.bf16.msra.mxu1 %v7436_v54  ;;  %v1356_v53 = vld [vmem:[#allocation2 + $0x8] sm:$0x3]  ;;  %v7495_v54 = vld [vmem:[%s10336_s3 + $0x410] ss:$16 sps:$4 sm:$0xff]  }
 0x144   :  { %1278 = vmatprep.subr.bf16.mxu0 %v7441_v55  ;;  %1319 = vmatprep.subr.bf16.mxu1 %v7444_v56  ;;  %v7498_v55 = vld [vmem:[%s10336_s3 + $0x418] ss:$16 sps:$4 sm:$0xff]   ;;  %v1357_v56 = vpack.c.bf16 %v1356_v53, %v1356_v53  ;;  %v6316_v53 = vcombine.low %v6289_v47, %v6289_v47 }
 0x147   :  { %1279 = vmatpush1.bf16.msra.mxu0 %v7439_v57  ;;  %1320 = vmatpush1.bf16.msra.mxu1 %v7442_v58  ;;  %v7503_v57 = vld [vmem:[%s10336_s3 + $0x434] ss:$16 sps:$4 sm:$0xff]   ;;  %v7506_v58 = vld [vmem:[%s10336_s3 + $0x43c] ss:$16 sps:$4 sm:$0xff]  }
 0x148   :  { %1280 = vmatprep.subr.bf16.mxu0 %v7447_v59  ;;  %1321 = vmatprep.subr.bf16.mxu1 %v7450_v60  ;;  %v7501_v59 = vld [vmem:[%s10336_s3 + $0x430] ss:$16 sps:$4 sm:$0xff]   ;;  %v7504_v60 = vld [vmem:[%s10336_s3 + $0x438] ss:$16 sps:$4 sm:$0xff]  }
 0x14b   :  { %1281 = vmatpush1.bf16.msra.mxu0 %v7445_v63  ;;  %1322 = vmatpush1.bf16.msra.mxu1 %v7448_v0  ;;  %v7507_v63 = vld [vmem:[%s10336_s3 + $0x450] ss:$16 sps:$4 sm:$0xff]   ;;  %v7510_v0 = vld [vmem:[%s10336_s3 + $0x458] ss:$16 sps:$4 sm:$0xff]  }
 0x14c   :  { %6144 = vmatprep.subr.msk.bf16.mxu0 %vm71_vm1, %v6141_v2  ;;  %6146 = vmatprep.subr.msk.bf16.mxu1 %vm71_vm1, %v6143_v3  ;;  %v7518_v2 = vld [vmem:[%s10336_s3 + $0x47c] ss:$16 sps:$4 sm:$0xff]   ;;  %v7513_v3 = vld [vmem:[%s10336_s3 + $0x470] ss:$16 sps:$4 sm:$0xff]  }
 0x14f   :  { %1283 = vmatpush1.bf16.msra.mxu0 %v1259_v5  ;;  %1324 = vmatpush1.bf16.msra.mxu1 %v1265_v6  ;;  %v7521_v5 = vld [vmem:[%s10336_s3 + $0x494] ss:$16 sps:$4 sm:$0xff]   ;;  %v7524_v6 = vld [vmem:[%s10336_s3 + $0x49c] ss:$16 sps:$4 sm:$0xff]  }
 0x150   :  { %1530 = vmatprep.subr.bf16.mxu0 %v7457_v7  ;;  %1571 = vmatprep.subr.bf16.mxu1 %v7460_v8  ;;  %v7519_v7 = vld [vmem:[%s10336_s3 + $0x490] ss:$16 sps:$4 sm:$0xff]   ;;  %v7522_v8 = vld [vmem:[%s10336_s3 + $0x498] ss:$16 sps:$4 sm:$0xff]  }
 0x152   :  { %6145 = vmatmul.mubr.msk.bf16.vlgmr.msra.gmra.mrb[20].mxu0 %vm511_vm13, %v1097_v21  ;;  %6147 = vmatmul.mubr.msk.bf16.vlgmr.msra.gmra.mrb[20].mxu1 %vm511_vm13, %v1097_v21 }
 0x153   :  { %1531 = vmatpush1.bf16.msra.mxu0 %v7455_v18  ;;  %1572 = vmatpush1.bf16.msra.mxu1 %v7458_v19  ;;  %v6256_v18 = vcombine.low %v6230_v11, %v6230_v11  ;;  %v6258_v19 = vcombine.low %v6231_v12, %v6231_v12  ;;  %v7604_v11 = vld [vmem:[%s10336_s3 + $0x63c] ss:$16 sps:$4 sm:$0xff]   ;;  %v7599_v12 = vld [vmem:[%s10336_s3 + $0x630] ss:$16 sps:$4 sm:$0xff]  }
 0x154   :  { %1532 = vmatprep.subr.bf16.mxu0 %v7463_v22  ;;  %1573 = vmatprep.subr.bf16.mxu1 %v7466_v23  ;;  %v7537_v22 = vld [vmem:[%s10336_s3 + $0x4e4] ss:$16 sps:$4 sm:$0xff]   ;;  %v7540_v23 = vld [vmem:[%s10336_s3 + $0x4ec] ss:$16 sps:$4 sm:$0xff]  }
 0x155   :  { %1562 = vmatprep.mubr.bf16.mxu0 %v8158_v13  ;;  %1603 = vmatprep.mubr.bf16.mxu1 %v8158_v13  ;;  %v1779_v20 = vsel %vm71_vm1, %v6256_v18, 0  ;;  %v1785_v21 = vsel %vm71_vm1, %v6258_v19, 0  ;;  %v6347_v18 = vld [vmem:[%s10336_s3 + $0x678] sm:$0x33]  ;;  %v7605_v19 = vld [vmem:[%s10336_s3 + $0x650] ss:$16 sps:$4 sm:$0xff]  }
 0x157   :  { %1533 = vmatpush1.bf16.msra.mxu0 %v7461_v25  ;;  %1574 = vmatpush1.bf16.msra.mxu1 %v7464_v26  ;;  %v7535_v25 = vld [vmem:[%s10336_s3 + $0x4e0] ss:$16 sps:$4 sm:$0xff]   ;;  %v7538_v26 = vld [vmem:[%s10336_s3 + $0x4e8] ss:$16 sps:$4 sm:$0xff]  }
 0x158   :  { %1534 = vmatprep.subr.bf16.mxu0 %v7469_v27  ;;  %1575 = vmatprep.subr.bf16.mxu1 %v7472_v28  ;;  %v1617_v27 = vpack.c.bf16 %v1616_v24, %v1616_v24  ;;  %v7543_v28 = vld [vmem:[%s10336_s3 + $0x504] ss:$16 sps:$4 sm:$0xff]   ;;  %v6374_v24 = vcombine.low %v6347_v18, %v6347_v18 }
 0x15b   :  { %1535 = vmatpush1.bf16.msra.mxu0 %v7467_v29  ;;  %1576 = vmatpush1.bf16.msra.mxu1 %v7470_v30  ;;  %v7546_v29 = vld [vmem:[%s10336_s3 + $0x50c] ss:$16 sps:$4 sm:$0xff]   ;;  %v7541_v30 = vld [vmem:[%s10336_s3 + $0x500] ss:$16 sps:$4 sm:$0xff]  }
 0x15c   :  { %1536 = vmatprep.subr.bf16.mxu0 %v7475_v31  ;;  %1577 = vmatprep.subr.bf16.mxu1 %v7478_v32  ;;  %v7544_v31 = vld [vmem:[%s10336_s3 + $0x508] ss:$16 sps:$4 sm:$0xff]   ;;  %v7549_v32 = vld [vmem:[%s10336_s3 + $0x524] ss:$16 sps:$4 sm:$0xff]  }
 0x15f   :  { %1537 = vmatpush1.bf16.msra.mxu0 %v7473_v33  ;;  %1578 = vmatpush1.bf16.msra.mxu1 %v7476_v34  ;;  %v7552_v33 = vld [vmem:[%s10336_s3 + $0x52c] ss:$16 sps:$4 sm:$0xff]   ;;  %v7547_v34 = vld [vmem:[%s10336_s3 + $0x520] ss:$16 sps:$4 sm:$0xff]  }
 0x160   :  { %1538 = vmatprep.subr.bf16.mxu0 %v7481_v35  ;;  %1579 = vmatprep.subr.bf16.mxu1 %v7484_v36  ;;  %v7550_v35 = vld [vmem:[%s10336_s3 + $0x528] ss:$16 sps:$4 sm:$0xff]   ;;  %v7555_v36 = vld [vmem:[%s10336_s3 + $0x544] ss:$16 sps:$4 sm:$0xff]  }
 0x163   :  { %1539 = vmatpush1.bf16.msra.mxu0 %v7479_v37  ;;  %1580 = vmatpush1.bf16.msra.mxu1 %v7482_v38  ;;  %v7558_v37 = vld [vmem:[%s10336_s3 + $0x54c] ss:$16 sps:$4 sm:$0xff]   ;;  %v7553_v38 = vld [vmem:[%s10336_s3 + $0x540] ss:$16 sps:$4 sm:$0xff]  }
 0x164   :  { %1540 = vmatprep.subr.bf16.mxu0 %v7487_v39  ;;  %1581 = vmatprep.subr.bf16.mxu1 %v7490_v40  ;;  %v7556_v39 = vld [vmem:[%s10336_s3 + $0x548] ss:$16 sps:$4 sm:$0xff]   ;;  %v7561_v40 = vld [vmem:[%s10336_s3 + $0x564] ss:$16 sps:$4 sm:$0xff]  }
 0x167   :  { %1541 = vmatpush1.bf16.msra.mxu0 %v7485_v43  ;;  %1582 = vmatpush1.bf16.msra.mxu1 %v7488_v44  ;;  %v7562_v43 = vld [vmem:[%s10336_s3 + $0x568] ss:$16 sps:$4 sm:$0xff]   ;;  %v7567_v44 = vld [vmem:[%s10336_s3 + $0x584] ss:$16 sps:$4 sm:$0xff]  }
 0x168   :  { %6202 = vmatprep.subr.msk.bf16.mxu0 %vm71_vm1, %v6199_v45  ;;  %6204 = vmatprep.subr.msk.bf16.mxu1 %vm71_vm1, %v6201_v46  ;;  %v7570_v45 = vld [vmem:[%s10336_s3 + $0x58c] ss:$16 sps:$4 sm:$0xff]   ;;  %v6288_v46 = vld [vmem:[%s10336_s3 + $0x5a0] sm:$0x33] }
 0x16b   :  { %1543 = vmatpush1.bf16.msra.mxu0 %v1519_v49  ;;  %1584 = vmatpush1.bf16.msra.mxu1 %v1525_v50  ;;  %v7568_v49 = vld [vmem:[%s10336_s3 + $0x588] ss:$16 sps:$4 sm:$0xff]   ;;  %v6315_v50 = vcombine.high %v6288_v46, %v6288_v46 }
 0x16c   :  { %1790 = vmatprep.subr.bf16.mxu0 %v7497_v51  ;;  %1831 = vmatprep.subr.bf16.mxu1 %v7500_v52  ;;  %v6317_v51 = vcombine.high %v6289_v47, %v6289_v47  ;;  %v6314_v52 = vcombine.low %v6288_v46, %v6288_v46  ;;  %v7644_v46 = vld [vmem:[%s10336_s3 + $0x70c] ss:$16 sps:$4 sm:$0xff]   ;;  %v7639_v47 = vld [vmem:[%s10336_s3 + $0x700] ss:$16 sps:$4 sm:$0xff]  }
 0x16e   :  { %6203 = vmatmul.mubr.msk.bf16.vlgmr.msra.gmra.mrb[24].mxu0 %vm511_vm13, %v1357_v56  ;;  %6205 = vmatmul.mubr.msk.bf16.vlgmr.msra.gmra.mrb[24].mxu1 %vm511_vm13, %v1357_v56  ;;  %v7577_v56 = vld [vmem:[%s10336_s3 + $0x5b4] ss:$16 sps:$4 sm:$0xff]  }
 0x16f   :  { %1791 = vmatpush1.bf16.msra.mxu0 %v7495_v54  ;;  %1832 = vmatpush1.bf16.msra.mxu1 %v7498_v55  ;;  %v2039_v54 = vsel %vm71_vm1, %v6314_v52, 0  ;;  %v2045_v55 = vsel %vm71_vm1, %v6316_v53, 0 }
 0x170   :  { %1792 = vmatprep.subr.bf16.mxu0 %v7503_v57  ;;  %1833 = vmatprep.subr.bf16.mxu1 %v7506_v58  ;;  %v7580_v57 = vld [vmem:[%s10336_s3 + $0x5bc] ss:$16 sps:$4 sm:$0xff]  }
 0x171   :  { %1822 = vmatprep.mubr.bf16.mxu0 %v8158_v13  ;;  %1863 = vmatprep.mubr.bf16.mxu1 %v8158_v13  ;;  %v1876_v58 = vld [vmem:[#allocation2 + $0xc] sm:$0x3] }
 0x173   :  { %1793 = vmatpush1.bf16.msra.mxu0 %v7501_v59  ;;  %1834 = vmatpush1.bf16.msra.mxu1 %v7504_v60  ;;  %v7575_v59 = vld [vmem:[%s10336_s3 + $0x5b0] ss:$16 sps:$4 sm:$0xff]   ;;  %v7578_v60 = vld [vmem:[%s10336_s3 + $0x5b8] ss:$16 sps:$4 sm:$0xff]  }
 0x174   :  { %1794 = vmatprep.subr.bf16.mxu0 %v7509_v61  ;;  %1835 = vmatprep.subr.bf16.mxu1 %v7512_v62  ;;  %v1877_v61 = vpack.c.bf16 %v1876_v58, %v1876_v58  ;;  %v7583_v62 = vld [vmem:[%s10336_s3 + $0x5d4] ss:$16 sps:$4 sm:$0xff]  }
 0x177   :  { %1795 = vmatpush1.bf16.msra.mxu0 %v7507_v63  ;;  %1836 = vmatpush1.bf16.msra.mxu1 %v7510_v0  ;;  %v7586_v63 = vld [vmem:[%s10336_s3 + $0x5dc] ss:$16 sps:$4 sm:$0xff]   ;;  %v7581_v0 = vld [vmem:[%s10336_s3 + $0x5d0] ss:$16 sps:$4 sm:$0xff]  }
 0x178   :  { %1796 = vmatprep.subr.bf16.mxu0 %v7515_v1  ;;  %1837 = vmatprep.subr.bf16.mxu1 %v7518_v2  ;;  %v7584_v1 = vld [vmem:[%s10336_s3 + $0x5d8] ss:$16 sps:$4 sm:$0xff]   ;;  %v7589_v2 = vld [vmem:[%s10336_s3 + $0x5f4] ss:$16 sps:$4 sm:$0xff]  }
 0x17b   :  { %1797 = vmatpush1.bf16.msra.mxu0 %v7513_v3  ;;  %1838 = vmatpush1.bf16.msra.mxu1 %v7516_v4  ;;  %v7592_v3 = vld [vmem:[%s10336_s3 + $0x5fc] ss:$16 sps:$4 sm:$0xff]   ;;  %v7587_v4 = vld [vmem:[%s10336_s3 + $0x5f0] ss:$16 sps:$4 sm:$0xff]  }
 0x17c   :  { %1798 = vmatprep.subr.bf16.mxu0 %v7521_v5  ;;  %1839 = vmatprep.subr.bf16.mxu1 %v7524_v6  ;;  %v7590_v5 = vld [vmem:[%s10336_s3 + $0x5f8] ss:$16 sps:$4 sm:$0xff]   ;;  %v7595_v6 = vld [vmem:[%s10336_s3 + $0x614] ss:$16 sps:$4 sm:$0xff]  }
 0x17f   :  { %1799 = vmatpush1.bf16.msra.mxu0 %v7519_v7  ;;  %1840 = vmatpush1.bf16.msra.mxu1 %v7522_v8  ;;  %v7598_v7 = vld [vmem:[%s10336_s3 + $0x61c] ss:$16 sps:$4 sm:$0xff]   ;;  %v7593_v8 = vld [vmem:[%s10336_s3 + $0x610] ss:$16 sps:$4 sm:$0xff]  }
 0x180   :  { %1800 = vmatprep.subr.bf16.mxu0 %v7527_v9  ;;  %1841 = vmatprep.subr.bf16.mxu1 %v7530_v10  ;;  %v7596_v9 = vld [vmem:[%s10336_s3 + $0x618] ss:$16 sps:$4 sm:$0xff]   ;;  %v7601_v10 = vld [vmem:[%s10336_s3 + $0x634] ss:$16 sps:$4 sm:$0xff]  }
 0x183   :  { %1801 = vmatpush1.bf16.msra.mxu0 %v7525_v14  ;;  %1842 = vmatpush1.bf16.msra.mxu1 %v7528_v15  ;;  %v7602_v14 = vld [vmem:[%s10336_s3 + $0x638] ss:$16 sps:$4 sm:$0xff]   ;;  %v7607_v15 = vld [vmem:[%s10336_s3 + $0x654] ss:$16 sps:$4 sm:$0xff]  }
 0x184   :  { %6260 = vmatprep.subr.msk.bf16.mxu0 %vm71_vm1, %v6257_v16  ;;  %6262 = vmatprep.subr.msk.bf16.mxu1 %vm71_vm1, %v6259_v17  ;;  %v7610_v16 = vld [vmem:[%s10336_s3 + $0x65c] ss:$16 sps:$4 sm:$0xff]   ;;  %v6346_v17 = vld [vmem:[%s10336_s3 + $0x670] sm:$0x33] }
 0x187   :  { %1803 = vmatpush1.bf16.msra.mxu0 %v1779_v20  ;;  %1844 = vmatpush1.bf16.msra.mxu1 %v1785_v21  ;;  %v7608_v20 = vld [vmem:[%s10336_s3 + $0x658] ss:$16 sps:$4 sm:$0xff]   ;;  %v6373_v21 = vcombine.high %v6346_v17, %v6346_v17 }
 0x188   :  { %2050 = vmatprep.subr.bf16.mxu0 %v7537_v22  ;;  %2091 = vmatprep.subr.bf16.mxu1 %v7540_v23  ;;  %v6375_v22 = vcombine.high %v6347_v18, %v6347_v18  ;;  %v6372_v23 = vcombine.low %v6346_v17, %v6346_v17  ;;  %v7672_v17 = vld [vmem:[%s10336_s3 + $0x79c] ss:$16 sps:$4 sm:$0xff]   ;;  %v7667_v18 = vld [vmem:[%s10336_s3 + $0x790] ss:$16 sps:$4 sm:$0xff]  }
 0x18a   :  { %6261 = vmatmul.mubr.msk.bf16.vlgmr.msra.gmra.mrb[28].mxu0 %vm511_vm13, %v1617_v27  ;;  %6263 = vmatmul.mubr.msk.bf16.vlgmr.msra.gmra.mrb[28].mxu1 %vm511_vm13, %v1617_v27  ;;  %v7617_v27 = vld [vmem:[%s10336_s3 + $0x684] ss:$16 sps:$4 sm:$0xff]  }
 0x18b   :  { %2051 = vmatpush1.bf16.msra.mxu0 %v7535_v25  ;;  %2092 = vmatpush1.bf16.msra.mxu1 %v7538_v26  ;;  %v2299_v25 = vsel %vm71_vm1, %v6372_v23, 0  ;;  %v2305_v26 = vsel %vm71_vm1, %v6374_v24, 0  ;;  %v7676_v23 = vld [vmem:[%s10336_s3 + $0x7b8] ss:$16 sps:$4 sm:$0xff]   ;;  %v7681_v24 = vld [vmem:[%s10336_s3 + $0x7d4] ss:$16 sps:$4 sm:$0xff]  }
 0x18c   :  { %2052 = vmatprep.subr.bf16.mxu0 %v7543_v28  ;;  %2093 = vmatprep.subr.bf16.mxu1 %v7546_v29  ;;  %v7620_v28 = vld [vmem:[%s10336_s3 + $0x68c] ss:$16 sps:$4 sm:$0xff]  }
 0x18d   :  { %2082 = vmatprep.mubr.bf16.mxu0 %v8158_v13  ;;  %2123 = vmatprep.mubr.bf16.mxu1 %v8158_v13  ;;  %v2136_v29 = vld [vmem:[#allocation2 + $0xe] sm:$0x3] }
 0x18f   :  { %2053 = vmatpush1.bf16.msra.mxu0 %v7541_v30  ;;  %2094 = vmatpush1.bf16.msra.mxu1 %v7544_v31  ;;  %v7615_v30 = vld [vmem:[%s10336_s3 + $0x680] ss:$16 sps:$4 sm:$0xff]   ;;  %v7618_v31 = vld [vmem:[%s10336_s3 + $0x688] ss:$16 sps:$4 sm:$0xff]  }
 0x190   :  { %2054 = vmatprep.subr.bf16.mxu0 %v7549_v32  ;;  %2095 = vmatprep.subr.bf16.mxu1 %v7552_v33  ;;  %v2137_v32 = vpack.c.bf16 %v2136_v29, %v2136_v29  ;;  %v7623_v33 = vld [vmem:[%s10336_s3 + $0x6a4] ss:$16 sps:$4 sm:$0xff]   ;;  %v7690_v29 = vld [vmem:[%s10336_s3 + $0x7fc] ss:$16 sps:$4 sm:$0xff]  }
 0x193   :  { %2055 = vmatpush1.bf16.msra.mxu0 %v7547_v34  ;;  %2096 = vmatpush1.bf16.msra.mxu1 %v7550_v35  ;;  %v7626_v34 = vld [vmem:[%s10336_s3 + $0x6ac] ss:$16 sps:$4 sm:$0xff]   ;;  %v7621_v35 = vld [vmem:[%s10336_s3 + $0x6a0] ss:$16 sps:$4 sm:$0xff]  }
 0x194   :  { %2056 = vmatprep.subr.bf16.mxu0 %v7555_v36  ;;  %2097 = vmatprep.subr.bf16.mxu1 %v7558_v37  ;;  %v7624_v36 = vld [vmem:[%s10336_s3 + $0x6a8] ss:$16 sps:$4 sm:$0xff]   ;;  %v7629_v37 = vld [vmem:[%s10336_s3 + $0x6c4] ss:$16 sps:$4 sm:$0xff]  }
 0x197   :  { %2057 = vmatpush1.bf16.msra.mxu0 %v7553_v38  ;;  %2098 = vmatpush1.bf16.msra.mxu1 %v7556_v39  ;;  %v7632_v38 = vld [vmem:[%s10336_s3 + $0x6cc] ss:$16 sps:$4 sm:$0xff]   ;;  %v7627_v39 = vld [vmem:[%s10336_s3 + $0x6c0] ss:$16 sps:$4 sm:$0xff]  }
 0x198   :  { %2058 = vmatprep.subr.bf16.mxu0 %v7561_v40  ;;  %2099 = vmatprep.subr.bf16.mxu1 %v7564_v41  ;;  %v7630_v40 = vld [vmem:[%s10336_s3 + $0x6c8] ss:$16 sps:$4 sm:$0xff]   ;;  %v7635_v41 = vld [vmem:[%s10336_s3 + $0x6e4] ss:$16 sps:$4 sm:$0xff]  }
 0x19b   :  { %2059 = vmatpush1.bf16.msra.mxu0 %v7559_v42  ;;  %2100 = vmatpush1.bf16.msra.mxu1 %v7562_v43  ;;  %v7638_v42 = vld [vmem:[%s10336_s3 + $0x6ec] ss:$16 sps:$4 sm:$0xff]   ;;  %v7633_v43 = vld [vmem:[%s10336_s3 + $0x6e0] ss:$16 sps:$4 sm:$0xff]  }
 0x19c   :  { %2060 = vmatprep.subr.bf16.mxu0 %v7567_v44  ;;  %2101 = vmatprep.subr.bf16.mxu1 %v7570_v45  ;;  %v7636_v44 = vld [vmem:[%s10336_s3 + $0x6e8] ss:$16 sps:$4 sm:$0xff]   ;;  %v7641_v45 = vld [vmem:[%s10336_s3 + $0x704] ss:$16 sps:$4 sm:$0xff]  }
 0x19f   :  { %2061 = vmatpush1.bf16.msra.mxu0 %v7565_v48  ;;  %2102 = vmatpush1.bf16.msra.mxu1 %v7568_v49  ;;  %v7642_v48 = vld [vmem:[%s10336_s3 + $0x708] ss:$16 sps:$4 sm:$0xff]   ;;  %v7647_v49 = vld [vmem:[%s10336_s3 + $0x724] ss:$16 sps:$4 sm:$0xff]  }
 0x1a0   :  { %6318 = vmatprep.subr.msk.bf16.mxu0 %vm71_vm1, %v6315_v50  ;;  %6320 = vmatprep.subr.msk.bf16.mxu1 %vm71_vm1, %v6317_v51  ;;  %v7650_v50 = vld [vmem:[%s10336_s3 + $0x72c] ss:$16 sps:$4 sm:$0xff]   ;;  %v6404_v51 = vld [vmem:[%s10336_s3 + $0x740] sm:$0x33] }
 0x1a3   :  { %2063 = vmatpush1.bf16.msra.mxu0 %v2039_v54  ;;  %2104 = vmatpush1.bf16.msra.mxu1 %v2045_v55  ;;  %v6405_v54 = vld [vmem:[%s10336_s3 + $0x748] sm:$0x33] }
 0x1a4   :  { %2310 = vmatprep.subr.bf16.mxu0 %v7577_v56  ;;  %2351 = vmatprep.subr.bf16.mxu1 %v7580_v57 }
 0x1a6   :  { %6319 = vmatmul.mubr.msk.bf16.vlgmr.msra.gmra.mrb[32].mxu0 %vm511_vm13, %v1877_v61  ;;  %6321 = vmatmul.mubr.msk.bf16.vlgmr.msra.gmra.mrb[32].mxu1 %vm511_vm13, %v1877_v61  ;;  %v6431_v61 = vcombine.high %v6404_v51, %v6404_v51 }
 0x1a7   :  { %2311 = vmatpush1.bf16.msra.mxu0 %v7575_v59  ;;  %2352 = vmatpush1.bf16.msra.mxu1 %v7578_v60  ;;  %v7645_v59 = vld [vmem:[%s10336_s3 + $0x720] ss:$16 sps:$4 sm:$0xff]   ;;  %v7648_v60 = vld [vmem:[%s10336_s3 + $0x728] ss:$16 sps:$4 sm:$0xff]  }
 0x1a8   :  { %2312 = vmatprep.subr.bf16.mxu0 %v7583_v62  ;;  %2353 = vmatprep.subr.bf16.mxu1 %v7586_v63 }
 0x1a9   :  { %2342 = vmatprep.mubr.bf16.mxu0 %v8158_v13  ;;  %2383 = vmatprep.mubr.bf16.mxu1 %v8158_v13 }
 0x1ab   :  { %2313 = vmatpush1.bf16.msra.mxu0 %v7581_v0  ;;  %2354 = vmatpush1.bf16.msra.mxu1 %v7584_v1  ;;  %v6433_v0 = vcombine.high %v6405_v54, %v6405_v54  ;;  %v6430_v1 = vcombine.low %v6404_v51, %v6404_v51 }
 0x1ac   :  { %2314 = vmatprep.subr.bf16.mxu0 %v7589_v2  ;;  %2355 = vmatprep.subr.bf16.mxu1 %v7592_v3  ;;  %v6432_v2 = vcombine.low %v6405_v54, %v6405_v54  ;;  %v2656_v54 = vld [vmem:[#allocation2 + $0x12] sm:$0x3] }
 0x1ad   :  { %v2559_v3 = vsel %vm71_vm1, %v6430_v1, 0  ;;  %v7710_v1 = vld [vmem:[%s10336_s3 + $0x868] ss:$16 sps:$4 sm:$0xff]  }
 0x1af   :  { %2315 = vmatpush1.bf16.msra.mxu0 %v7587_v4  ;;  %2356 = vmatpush1.bf16.msra.mxu1 %v7590_v5  ;;  %v2565_v4 = vsel %vm71_vm1, %v6432_v2, 0  ;;  %v7657_v5 = vld [vmem:[%s10336_s3 + $0x754] ss:$16 sps:$4 sm:$0xff]  }
 0x1b0   :  { %2316 = vmatprep.subr.bf16.mxu0 %v7595_v6  ;;  %2357 = vmatprep.subr.bf16.mxu1 %v7598_v7  ;;  %v7660_v6 = vld [vmem:[%s10336_s3 + $0x75c] ss:$16 sps:$4 sm:$0xff]   ;;  %v2396_v7 = vld [vmem:[#allocation2 + $0x10] sm:$0x3]  ;;  %v7715_v2 = vld [vmem:[%s10336_s3 + $0x884] ss:$16 sps:$4 sm:$0xff]  }
 0x1b3   :  { %2317 = vmatpush1.bf16.msra.mxu0 %v7593_v8  ;;  %2358 = vmatpush1.bf16.msra.mxu1 %v7596_v9  ;;  %v7655_v8 = vld [vmem:[%s10336_s3 + $0x750] ss:$16 sps:$4 sm:$0xff]   ;;  %v7658_v9 = vld [vmem:[%s10336_s3 + $0x758] ss:$16 sps:$4 sm:$0xff]  }
 0x1b4   :  { %2318 = vmatprep.subr.bf16.mxu0 %v7601_v10  ;;  %2359 = vmatprep.subr.bf16.mxu1 %v7604_v11  ;;  %v2397_v10 = vpack.c.bf16 %v2396_v7, %v2396_v7  ;;  %v7663_v11 = vld [vmem:[%s10336_s3 + $0x774] ss:$16 sps:$4 sm:$0xff]   ;;  %v7724_v7 = vld [vmem:[%s10336_s3 + $0x8ac] ss:$16 sps:$4 sm:$0xff]  }
 0x1b7   :  { %2319 = vmatpush1.bf16.msra.mxu0 %v7599_v12  ;;  %2360 = vmatpush1.bf16.msra.mxu1 %v7602_v14  ;;  %v7666_v12 = vld [vmem:[%s10336_s3 + $0x77c] ss:$16 sps:$4 sm:$0xff]   ;;  %v7661_v14 = vld [vmem:[%s10336_s3 + $0x770] ss:$16 sps:$4 sm:$0xff]  }
 0x1b8   :  { %2320 = vmatprep.subr.bf16.mxu0 %v7607_v15  ;;  %2361 = vmatprep.subr.bf16.mxu1 %v7610_v16  ;;  %v7664_v15 = vld [vmem:[%s10336_s3 + $0x778] ss:$16 sps:$4 sm:$0xff]   ;;  %v7669_v16 = vld [vmem:[%s10336_s3 + $0x794] ss:$16 sps:$4 sm:$0xff]  }
 0x1bb   :  { %2321 = vmatpush1.bf16.msra.mxu0 %v7605_v19  ;;  %2362 = vmatpush1.bf16.msra.mxu1 %v7608_v20  ;;  %v7670_v19 = vld [vmem:[%s10336_s3 + $0x798] ss:$16 sps:$4 sm:$0xff]   ;;  %v7675_v20 = vld [vmem:[%s10336_s3 + $0x7b4] ss:$16 sps:$4 sm:$0xff]  }
 0x1bc   :  { %6376 = vmatprep.subr.msk.bf16.mxu0 %vm71_vm1, %v6373_v21  ;;  %6378 = vmatprep.subr.msk.bf16.mxu1 %vm71_vm1, %v6375_v22  ;;  %v7678_v21 = vld [vmem:[%s10336_s3 + $0x7bc] ss:$16 sps:$4 sm:$0xff]   ;;  %v7673_v22 = vld [vmem:[%s10336_s3 + $0x7b0] ss:$16 sps:$4 sm:$0xff]  }
 0x1bf   :  { %2323 = vmatpush1.bf16.msra.mxu0 %v2299_v25  ;;  %2364 = vmatpush1.bf16.msra.mxu1 %v2305_v26  ;;  %v7684_v25 = vld [vmem:[%s10336_s3 + $0x7dc] ss:$16 sps:$4 sm:$0xff]   ;;  %v7679_v26 = vld [vmem:[%s10336_s3 + $0x7d0] ss:$16 sps:$4 sm:$0xff]  }
 0x1c0   :  { %2570 = vmatprep.subr.bf16.mxu0 %v7617_v27  ;;  %2611 = vmatprep.subr.bf16.mxu1 %v7620_v28  ;;  %v7682_v27 = vld [vmem:[%s10336_s3 + $0x7d8] ss:$16 sps:$4 sm:$0xff]   ;;  %v7687_v28 = vld [vmem:[%s10336_s3 + $0x7f4] ss:$16 sps:$4 sm:$0xff]  }
 0x1c2   :  { %6377 = vmatmul.mubr.msk.bf16.vlgmr.msra.gmra.mrb[36].mxu0 %vm511_vm13, %v2137_v32  ;;  %6379 = vmatmul.mubr.msk.bf16.vlgmr.msra.gmra.mrb[36].mxu1 %vm511_vm13, %v2137_v32 }
 0x1c3   :  { %2571 = vmatpush1.bf16.msra.mxu0 %v7615_v30  ;;  %2612 = vmatpush1.bf16.msra.mxu1 %v7618_v31  ;;  %v6462_v30 = vld [vmem:[%s10336_s3 + $0x810] sm:$0x33] }
 0x1c4   :  { %2572 = vmatprep.subr.bf16.mxu0 %v7623_v33  ;;  %2613 = vmatprep.subr.bf16.mxu1 %v7626_v34  ;;  %v6463_v33 = vld [vmem:[%s10336_s3 + $0x818] sm:$0x33] }
 0x1c5   :  { %2602 = vmatprep.mubr.bf16.mxu0 %v8158_v13  ;;  %2643 = vmatprep.mubr.bf16.mxu1 %v8158_v13 }
 0x1c7   :  { %2573 = vmatpush1.bf16.msra.mxu0 %v7621_v35  ;;  %2614 = vmatpush1.bf16.msra.mxu1 %v7624_v36 }
 0x1c8   :  { %2574 = vmatprep.subr.bf16.mxu0 %v7629_v37  ;;  %2615 = vmatprep.subr.bf16.mxu1 %v7632_v38 }
 0x1cb   :  { %2575 = vmatpush1.bf16.msra.mxu0 %v7627_v39  ;;  %2616 = vmatpush1.bf16.msra.mxu1 %v7630_v40 }
 0x1cc   :  { %2576 = vmatprep.subr.bf16.mxu0 %v7635_v41  ;;  %2617 = vmatprep.subr.bf16.mxu1 %v7638_v42  ;;  %v7685_v42 = vld [vmem:[%s10336_s3 + $0x7f0] ss:$16 sps:$4 sm:$0xff]  }
 0x1cf   :  { %2577 = vmatpush1.bf16.msra.mxu0 %v7633_v43  ;;  %2618 = vmatpush1.bf16.msra.mxu1 %v7636_v44  ;;  %v7688_v43 = vld [vmem:[%s10336_s3 + $0x7f8] ss:$16 sps:$4 sm:$0xff]   ;;  %v6489_v44 = vcombine.high %v6462_v30, %v6462_v30 }
 0x1d0   :  { %2578 = vmatprep.subr.bf16.mxu0 %v7641_v45  ;;  %2619 = vmatprep.subr.bf16.mxu1 %v7644_v46 }
 0x1d1   :  { %v9123_v52 = vpop.f32.mrb[8].mxu0  ;;  %v9125_v53 = vpop.f32.mrb[8].mxu1 }
 0x1d2   :  { %v9130_v55 = vpop.f32.mrb[9].mxu0  ;;  %v9132_v56 = vpop.f32.mrb[9].mxu1 }
 0x1d3   :  { %2579 = vmatpush1.bf16.msra.mxu0 %v7639_v47  ;;  %2620 = vmatpush1.bf16.msra.mxu1 %v7642_v48  ;;  %v565_v57 = vpop.f32.mrb[10].mxu0  ;;  %v606_v58 = vpop.f32.mrb[10].mxu1  ;;  %v6491_v47 = vcombine.high %v6463_v33, %v6463_v33  ;;  %v6488_v48 = vcombine.low %v6462_v30, %v6462_v30 }
 0x1d4   :  { %v566_v62 = vpop.f32.mrb[11].mxu0  ;;  %v607_v63 = vpop.f32.mrb[11].mxu1  ;;  %2580 = vmatprep.subr.bf16.mxu0 %v7647_v49  ;;  %2621 = vmatprep.subr.bf16.mxu1 %v7650_v50  ;;  %v6490_v49 = vcombine.low %v6463_v33, %v6463_v33  ;;  %v2657_v57 = vpack.c.bf16 %v2656_v54, %v2656_v54  ;;  %v7703_v58 = vld [vmem:[%s10336_s3 + $0x844] ss:$16 sps:$4 sm:$0xff]   ;;  %v7764_v54 = vld [vmem:[%s10336_s3 + $0x97c] ss:$16 sps:$4 sm:$0xff]  }
 0x1d5   :  { %v2819_v50 = vsel %vm71_vm1, %v6488_v48, 0  ;;  %v7709_v62 = vld [vmem:[%s10336_s3 + $0x864] ss:$16 sps:$4 sm:$0xff]   ;;  %v7712_v63 = vld [vmem:[%s10336_s3 + $0x86c] ss:$16 sps:$4 sm:$0xff]  }
 0x1d6   :  { %v2825_v51 = vsel %vm71_vm1, %v6490_v49, 0  ;;  %v7750_v48 = vld [vmem:[%s10336_s3 + $0x938] ss:$16 sps:$4 sm:$0xff]   ;;  %v7755_v49 = vld [vmem:[%s10336_s3 + $0x954] ss:$16 sps:$4 sm:$0xff]  }
 0x1d7   :  { %2581 = vmatpush1.bf16.msra.mxu0 %v7645_v59  ;;  %2622 = vmatpush1.bf16.msra.mxu1 %v7648_v60  ;;  %v7706_v59 = vld [vmem:[%s10336_s3 + $0x84c] ss:$16 sps:$4 sm:$0xff]   ;;  %v7701_v60 = vld [vmem:[%s10336_s3 + $0x840] ss:$16 sps:$4 sm:$0xff]  }
 0x1d8   :  { %6434 = vmatprep.subr.msk.bf16.mxu0 %vm71_vm1, %v6431_v61  ;;  %6436 = vmatprep.subr.msk.bf16.mxu1 %vm71_vm1, %v6433_v0  ;;  %v7704_v61 = vld [vmem:[%s10336_s3 + $0x848] ss:$16 sps:$4 sm:$0xff]   ;;  %v7707_v0 = vld [vmem:[%s10336_s3 + $0x860] ss:$16 sps:$4 sm:$0xff]  }
 0x1db   :  { %2583 = vmatpush1.bf16.msra.mxu0 %v2559_v3  ;;  %2624 = vmatpush1.bf16.msra.mxu1 %v2565_v4  ;;  %v7718_v3 = vld [vmem:[%s10336_s3 + $0x88c] ss:$16 sps:$4 sm:$0xff]   ;;  %v7713_v4 = vld [vmem:[%s10336_s3 + $0x880] ss:$16 sps:$4 sm:$0xff]  }
 0x1dc   :  { %2830 = vmatprep.subr.bf16.mxu0 %v7657_v5  ;;  %2871 = vmatprep.subr.bf16.mxu1 %v7660_v6  ;;  %v7716_v5 = vld [vmem:[%s10336_s3 + $0x888] ss:$16 sps:$4 sm:$0xff]   ;;  %v7721_v6 = vld [vmem:[%s10336_s3 + $0x8a4] ss:$16 sps:$4 sm:$0xff]  }
 0x1de   :  { %6435 = vmatmul.mubr.msk.bf16.vlgmr.msra.gmra.mrb[40].mxu0 %vm511_vm13, %v2397_v10  ;;  %6437 = vmatmul.mubr.msk.bf16.vlgmr.msra.gmra.mrb[40].mxu1 %vm511_vm13, %v2397_v10  ;;  %v7727_v10 = vld [vmem:[%s10336_s3 + $0x8c4] ss:$16 sps:$4 sm:$0xff]  }
 0x1df   :  { %2831 = vmatpush1.bf16.msra.mxu0 %v7655_v8  ;;  %2872 = vmatpush1.bf16.msra.mxu1 %v7658_v9  ;;  %v7719_v8 = vld [vmem:[%s10336_s3 + $0x8a0] ss:$16 sps:$4 sm:$0xff]   ;;  %v7722_v9 = vld [vmem:[%s10336_s3 + $0x8a8] ss:$16 sps:$4 sm:$0xff]  }
 0x1e0   :  { %2832 = vmatprep.subr.bf16.mxu0 %v7663_v11  ;;  %2873 = vmatprep.subr.bf16.mxu1 %v7666_v12  ;;  %v7730_v11 = vld [vmem:[%s10336_s3 + $0x8cc] ss:$16 sps:$4 sm:$0xff]   ;;  %v6520_v12 = vld [vmem:[%s10336_s3 + $0x8e0] sm:$0x33] }
 0x1e1   :  { %2862 = vmatprep.mubr.bf16.mxu0 %v8158_v13  ;;  %2903 = vmatprep.mubr.bf16.mxu1 %v8158_v13 }
 0x1e3   :  { %2833 = vmatpush1.bf16.msra.mxu0 %v7661_v14  ;;  %2874 = vmatpush1.bf16.msra.mxu1 %v7664_v15 }
 0x1e4   :  { %2834 = vmatprep.subr.bf16.mxu0 %v7669_v16  ;;  %2875 = vmatprep.subr.bf16.mxu1 %v7672_v17  ;;  %v6521_v16 = vld [vmem:[%s10336_s3 + $0x8e8] sm:$0x33] }
 0x1e5   :  { %v6549_v30 = vcombine.high %v6521_v16, %v6521_v16 }
 0x1e7   :  { %2835 = vmatpush1.bf16.msra.mxu0 %v7667_v18  ;;  %2876 = vmatpush1.bf16.msra.mxu1 %v7670_v19 }
 0x1e8   :  { %2836 = vmatprep.subr.bf16.mxu0 %v7675_v20  ;;  %2877 = vmatprep.subr.bf16.mxu1 %v7678_v21 }
 0x1eb   :  { %2837 = vmatpush1.bf16.msra.mxu0 %v7673_v22  ;;  %2878 = vmatpush1.bf16.msra.mxu1 %v7676_v23 }
 0x1ec   :  { %2838 = vmatprep.subr.bf16.mxu0 %v7681_v24  ;;  %2879 = vmatprep.subr.bf16.mxu1 %v7684_v25  ;;  %v7725_v25 = vld [vmem:[%s10336_s3 + $0x8c0] ss:$16 sps:$4 sm:$0xff]  }
 0x1ed   :  { %v788_v31 = vpop.f32.mrb[12].mxu0  ;;  %v829_v32 = vpop.f32.mrb[12].mxu1 }
 0x1ee   :  { %v9221_v34 = vadd.f32 %v788_v31, %v9123_v52  ;;  %v9224_v35 = vadd.f32 %v829_v32, %v9125_v53  ;;  %v790_v36 = vpop.f32.mrb[13].mxu0  ;;  %v831_v37 = vpop.f32.mrb[13].mxu1  ;;  %v7697_v52 = vld [vmem:[%s10336_s3 + $0x824] ss:$16 sps:$4 sm:$0xff]   ;;  %v7700_v53 = vld [vmem:[%s10336_s3 + $0x82c] ss:$16 sps:$4 sm:$0xff]   ;;  %v6546_v31 = vcombine.low %v6520_v12, %v6520_v12  ;;  %v6548_v32 = vcombine.low %v6521_v16, %v6521_v16 }
 0x1ef   :  { %v9227_v38 = vadd.f32 %v790_v36, %v9130_v55  ;;  %v9230_v39 = vadd.f32 %v831_v37, %v9132_v56  ;;  %v792_v40 = vpop.f32.mrb[14].mxu0  ;;  %v833_v41 = vpop.f32.mrb[14].mxu1  ;;  %2839 = vmatpush1.bf16.msra.mxu0 %v7679_v26  ;;  %2880 = vmatpush1.bf16.msra.mxu1 %v7682_v27  ;;  %v7695_v55 = vld [vmem:[%s10336_s3 + $0x820] ss:$16 sps:$4 sm:$0xff]   ;;  %v7698_v56 = vld [vmem:[%s10336_s3 + $0x828] ss:$16 sps:$4 sm:$0xff]   ;;  %v6547_v27 = vcombine.high %v6520_v12, %v6520_v12 }
 0x1f0   :  { %v793_v45 = vpop.f32.mrb[15].mxu0  ;;  %v834_v46 = vpop.f32.mrb[15].mxu1  ;;  %2840 = vmatprep.subr.bf16.mxu0 %v7687_v28  ;;  %2881 = vmatprep.subr.bf16.mxu1 %v7690_v29  ;;  %v7728_v26 = vld [vmem:[%s10336_s3 + $0x8c8] ss:$16 sps:$4 sm:$0xff]   ;;  %v3079_v33 = vsel %vm71_vm1, %v6546_v31, 0 }
 0x1f1   :  { %v7740_v36 = vld [vmem:[%s10336_s3 + $0x8fc] ss:$16 sps:$4 sm:$0xff]   ;;  %v2916_v37 = vld [vmem:[#allocation2 + $0x14] sm:$0x3]  ;;  %v7790_v31 = vld [vmem:[%s10336_s3 + $0xa08] ss:$16 sps:$4 sm:$0xff]  }
 0x1f2   :  { %v2917_v40 = vpack.c.bf16 %v2916_v37, %v2916_v37  ;;  %v7743_v41 = vld [vmem:[%s10336_s3 + $0x914] ss:$16 sps:$4 sm:$0xff]   ;;  %v7752_v46 = vld [vmem:[%s10336_s3 + $0x93c] ss:$16 sps:$4 sm:$0xff]  }
 0x1f3   :  { %2841 = vmatpush1.bf16.msra.mxu0 %v7685_v42  ;;  %2882 = vmatpush1.bf16.msra.mxu1 %v7688_v43  ;;  %v7746_v42 = vld [vmem:[%s10336_s3 + $0x91c] ss:$16 sps:$4 sm:$0xff]   ;;  %v7741_v43 = vld [vmem:[%s10336_s3 + $0x910] ss:$16 sps:$4 sm:$0xff]   ;;  %v7749_v45 = vld [vmem:[%s10336_s3 + $0x934] ss:$16 sps:$4 sm:$0xff]  }
 0x1f4   :  { %6492 = vmatprep.subr.msk.bf16.mxu0 %vm71_vm1, %v6489_v44  ;;  %6494 = vmatprep.subr.msk.bf16.mxu1 %vm71_vm1, %v6491_v47  ;;  %v7744_v44 = vld [vmem:[%s10336_s3 + $0x918] ss:$16 sps:$4 sm:$0xff]   ;;  %v7747_v47 = vld [vmem:[%s10336_s3 + $0x930] ss:$16 sps:$4 sm:$0xff]   ;;  %v7804_v37 = vld [vmem:[%s10336_s3 + $0xa4c] ss:$16 sps:$4 sm:$0xff]  }
 0x1f7   :  { %2843 = vmatpush1.bf16.msra.mxu0 %v2819_v50  ;;  %2884 = vmatpush1.bf16.msra.mxu1 %v2825_v51  ;;  %v7758_v50 = vld [vmem:[%s10336_s3 + $0x95c] ss:$16 sps:$4 sm:$0xff]   ;;  %v7753_v51 = vld [vmem:[%s10336_s3 + $0x950] ss:$16 sps:$4 sm:$0xff]  }
 0x1f8   :  { %3090 = vmatprep.subr.bf16.mxu0 %v7697_v52  ;;  %3131 = vmatprep.subr.bf16.mxu1 %v7700_v53  ;;  %v7756_v52 = vld [vmem:[%s10336_s3 + $0x958] ss:$16 sps:$4 sm:$0xff]   ;;  %v7761_v53 = vld [vmem:[%s10336_s3 + $0x974] ss:$16 sps:$4 sm:$0xff]  }
 0x1fa   :  { %6493 = vmatmul.mubr.msk.bf16.vlgmr.msra.gmra.mrb[44].mxu0 %vm511_vm13, %v2657_v57  ;;  %6495 = vmatmul.mubr.msk.bf16.vlgmr.msra.gmra.mrb[44].mxu1 %vm511_vm13, %v2657_v57  ;;  %v7767_v57 = vld [vmem:[%s10336_s3 + $0x994] ss:$16 sps:$4 sm:$0xff]  }
 0x1fb   :  { %3091 = vmatpush1.bf16.msra.mxu0 %v7695_v55  ;;  %3132 = vmatpush1.bf16.msra.mxu1 %v7698_v56  ;;  %v7759_v55 = vld [vmem:[%s10336_s3 + $0x970] ss:$16 sps:$4 sm:$0xff]   ;;  %v7762_v56 = vld [vmem:[%s10336_s3 + $0x978] ss:$16 sps:$4 sm:$0xff]  }
 0x1fc   :  { %3092 = vmatprep.subr.bf16.mxu0 %v7703_v58  ;;  %3133 = vmatprep.subr.bf16.mxu1 %v7706_v59  ;;  %v7770_v58 = vld [vmem:[%s10336_s3 + $0x99c] ss:$16 sps:$4 sm:$0xff]   ;;  %v6578_v59 = vld [vmem:[%s10336_s3 + $0x9b0] sm:$0x33] }
 0x1fd   :  { %3122 = vmatprep.mubr.bf16.mxu0 %v8158_v13  ;;  %3163 = vmatprep.mubr.bf16.mxu1 %v8158_v13 }
 0x1ff   :  { %3093 = vmatpush1.bf16.msra.mxu0 %v7701_v60  ;;  %3134 = vmatpush1.bf16.msra.mxu1 %v7704_v61 }
 0x200   :  { %3094 = vmatprep.subr.bf16.mxu0 %v7709_v62  ;;  %3135 = vmatprep.subr.bf16.mxu1 %v7712_v63  ;;  %v6579_v62 = vld [vmem:[%s10336_s3 + $0x9b8] sm:$0x33] }
 0x201   :  { %v6607_v12 = vcombine.high %v6579_v62, %v6579_v62 }
 0x203   :  { %3095 = vmatpush1.bf16.msra.mxu0 %v7707_v0  ;;  %3136 = vmatpush1.bf16.msra.mxu1 %v7710_v1 }
 0x204   :  { %3096 = vmatprep.subr.bf16.mxu0 %v7715_v2  ;;  %3137 = vmatprep.subr.bf16.mxu1 %v7718_v3 }
 0x207   :  { %3097 = vmatpush1.bf16.msra.mxu0 %v7713_v4  ;;  %3138 = vmatpush1.bf16.msra.mxu1 %v7716_v5 }
 0x208   :  { %3098 = vmatprep.subr.bf16.mxu0 %v7721_v6  ;;  %3139 = vmatprep.subr.bf16.mxu1 %v7724_v7  ;;  %v7765_v7 = vld [vmem:[%s10336_s3 + $0x990] ss:$16 sps:$4 sm:$0xff]  }
 0x209   :  { %v1044_v14 = vpop.f32.mrb[16].mxu0  ;;  %v1085_v15 = vpop.f32.mrb[16].mxu1 }
 0x20a   :  { %v9319_v17 = vadd.f32 %v1044_v14, %v9221_v34  ;;  %v9322_v18 = vadd.f32 %v1085_v15, %v9224_v35  ;;  %v1046_v19 = vpop.f32.mrb[17].mxu0  ;;  %v1087_v20 = vpop.f32.mrb[17].mxu1  ;;  %v3085_v34 = vsel %vm71_vm1, %v6548_v32, 0  ;;  %v7737_v35 = vld [vmem:[%s10336_s3 + $0x8f4] ss:$16 sps:$4 sm:$0xff]   ;;  %v6604_v14 = vcombine.low %v6578_v59, %v6578_v59 }
 0x20b   :  { %v9325_v21 = vadd.f32 %v1046_v19, %v9227_v38  ;;  %v9328_v22 = vadd.f32 %v1087_v20, %v9230_v39  ;;  %v1048_v23 = vpop.f32.mrb[18].mxu0  ;;  %v1089_v24 = vpop.f32.mrb[18].mxu1  ;;  %3099 = vmatpush1.bf16.msra.mxu0 %v7719_v8  ;;  %3140 = vmatpush1.bf16.msra.mxu1 %v7722_v9  ;;  %v7735_v38 = vld [vmem:[%s10336_s3 + $0x8f0] ss:$16 sps:$4 sm:$0xff]   ;;  %v7738_v39 = vld [vmem:[%s10336_s3 + $0x8f8] ss:$16 sps:$4 sm:$0xff]   ;;  %v6605_v9 = vcombine.high %v6578_v59, %v6578_v59 }
 0x20c   :  { %v1049_v28 = vpop.f32.mrb[19].mxu0  ;;  %v1090_v29 = vpop.f32.mrb[19].mxu1  ;;  %3100 = vmatprep.subr.bf16.mxu0 %v7727_v10  ;;  %3141 = vmatprep.subr.bf16.mxu1 %v7730_v11  ;;  %v7768_v8 = vld [vmem:[%s10336_s3 + $0x998] ss:$16 sps:$4 sm:$0xff]   ;;  %v6606_v15 = vcombine.low %v6579_v62, %v6579_v62  ;;  %v3339_v16 = vsel %vm71_vm1, %v6604_v14, 0 }
 0x20d   :  { %v7780_v19 = vld [vmem:[%s10336_s3 + $0x9cc] ss:$16 sps:$4 sm:$0xff]   ;;  %v3176_v20 = vld [vmem:[#allocation2 + $0x16] sm:$0x3]  ;;  %v7830_v14 = vld [vmem:[%s10336_s3 + $0xad8] ss:$16 sps:$4 sm:$0xff]  }
 0x20e   :  { %v3177_v23 = vpack.c.bf16 %v3176_v20, %v3176_v20  ;;  %v7783_v24 = vld [vmem:[%s10336_s3 + $0x9e4] ss:$16 sps:$4 sm:$0xff]   ;;  %v7792_v29 = vld [vmem:[%s10336_s3 + $0xa0c] ss:$16 sps:$4 sm:$0xff]  }
 0x20f   :  { %3101 = vmatpush1.bf16.msra.mxu0 %v7725_v25  ;;  %3142 = vmatpush1.bf16.msra.mxu1 %v7728_v26  ;;  %v7786_v25 = vld [vmem:[%s10336_s3 + $0x9ec] ss:$16 sps:$4 sm:$0xff]   ;;  %v7781_v26 = vld [vmem:[%s10336_s3 + $0x9e0] ss:$16 sps:$4 sm:$0xff]   ;;  %v7789_v28 = vld [vmem:[%s10336_s3 + $0xa04] ss:$16 sps:$4 sm:$0xff]  }
 0x210   :  { %6550 = vmatprep.subr.msk.bf16.mxu0 %vm71_vm1, %v6547_v27  ;;  %6552 = vmatprep.subr.msk.bf16.mxu1 %vm71_vm1, %v6549_v30  ;;  %v7784_v27 = vld [vmem:[%s10336_s3 + $0x9e8] ss:$16 sps:$4 sm:$0xff]   ;;  %v7787_v30 = vld [vmem:[%s10336_s3 + $0xa00] ss:$16 sps:$4 sm:$0xff]   ;;  %v7795_v32 = vld [vmem:[%s10336_s3 + $0xa24] ss:$16 sps:$4 sm:$0xff]  }
 0x211   :  { %v7844_v20 = vld [vmem:[%s10336_s3 + $0xb1c] ss:$16 sps:$4 sm:$0xff]  }
 0x213   :  { %3103 = vmatpush1.bf16.msra.mxu0 %v3079_v33  ;;  %3144 = vmatpush1.bf16.msra.mxu1 %v3085_v34  ;;  %v7798_v33 = vld [vmem:[%s10336_s3 + $0xa2c] ss:$16 sps:$4 sm:$0xff]   ;;  %v7793_v34 = vld [vmem:[%s10336_s3 + $0xa20] ss:$16 sps:$4 sm:$0xff]  }
 0x214   :  { %3350 = vmatprep.subr.bf16.mxu0 %v7737_v35  ;;  %3391 = vmatprep.subr.bf16.mxu1 %v7740_v36  ;;  %v7796_v35 = vld [vmem:[%s10336_s3 + $0xa28] ss:$16 sps:$4 sm:$0xff]   ;;  %v7801_v36 = vld [vmem:[%s10336_s3 + $0xa44] ss:$16 sps:$4 sm:$0xff]  }
 0x216   :  { %6551 = vmatmul.mubr.msk.bf16.vlgmr.msra.gmra.mrb[48].mxu0 %vm511_vm13, %v2917_v40  ;;  %6553 = vmatmul.mubr.msk.bf16.vlgmr.msra.gmra.mrb[48].mxu1 %vm511_vm13, %v2917_v40  ;;  %v7807_v40 = vld [vmem:[%s10336_s3 + $0xa64] ss:$16 sps:$4 sm:$0xff]  }
 0x217   :  { %3351 = vmatpush1.bf16.msra.mxu0 %v7735_v38  ;;  %3392 = vmatpush1.bf16.msra.mxu1 %v7738_v39  ;;  %v7799_v38 = vld [vmem:[%s10336_s3 + $0xa40] ss:$16 sps:$4 sm:$0xff]   ;;  %v7802_v39 = vld [vmem:[%s10336_s3 + $0xa48] ss:$16 sps:$4 sm:$0xff]  }
 0x218   :  { %3352 = vmatprep.subr.bf16.mxu0 %v7743_v41  ;;  %3393 = vmatprep.subr.bf16.mxu1 %v7746_v42  ;;  %v7810_v41 = vld [vmem:[%s10336_s3 + $0xa6c] ss:$16 sps:$4 sm:$0xff]   ;;  %v6636_v42 = vld [vmem:[%s10336_s3 + $0xa80] sm:$0x33] }
 0x219   :  { %3382 = vmatprep.mubr.bf16.mxu0 %v8158_v13  ;;  %3423 = vmatprep.mubr.bf16.mxu1 %v8158_v13 }
 0x21b   :  { %3353 = vmatpush1.bf16.msra.mxu0 %v7741_v43  ;;  %3394 = vmatpush1.bf16.msra.mxu1 %v7744_v44 }
 0x21c   :  { %3354 = vmatprep.subr.bf16.mxu0 %v7749_v45  ;;  %3395 = vmatprep.subr.bf16.mxu1 %v7752_v46  ;;  %v6637_v45 = vld [vmem:[%s10336_s3 + $0xa88] sm:$0x33] }
 0x21d   :  { %v6665_v59 = vcombine.high %v6637_v45, %v6637_v45 }
 0x21f   :  { %3355 = vmatpush1.bf16.msra.mxu0 %v7747_v47  ;;  %3396 = vmatpush1.bf16.msra.mxu1 %v7750_v48 }
 0x220   :  { %3356 = vmatprep.subr.bf16.mxu0 %v7755_v49  ;;  %3397 = vmatprep.subr.bf16.mxu1 %v7758_v50 }
 0x223   :  { %3357 = vmatpush1.bf16.msra.mxu0 %v7753_v51  ;;  %3398 = vmatpush1.bf16.msra.mxu1 %v7756_v52 }
 0x224   :  { %3358 = vmatprep.subr.bf16.mxu0 %v7761_v53  ;;  %3399 = vmatprep.subr.bf16.mxu1 %v7764_v54  ;;  %v7805_v54 = vld [vmem:[%s10336_s3 + $0xa60] ss:$16 sps:$4 sm:$0xff]  }
 0x225   :  { %v1304_v60 = vpop.f32.mrb[20].mxu0  ;;  %v1345_v61 = vpop.f32.mrb[20].mxu1 }
 0x226   :  { %v9417_v63 = vadd.f32 %v1304_v60, %v9319_v17  ;;  %v9420_v0 = vadd.f32 %v1345_v61, %v9322_v18  ;;  %v1306_v1 = vpop.f32.mrb[21].mxu0  ;;  %v1347_v2 = vpop.f32.mrb[21].mxu1  ;;  %v3345_v17 = vsel %vm71_vm1, %v6606_v15, 0  ;;  %v7777_v18 = vld [vmem:[%s10336_s3 + $0x9c4] ss:$16 sps:$4 sm:$0xff]   ;;  %v6662_v60 = vcombine.low %v6636_v42, %v6636_v42 }
 0x227   :  { %v9423_v3 = vadd.f32 %v1306_v1, %v9325_v21  ;;  %v9426_v4 = vadd.f32 %v1347_v2, %v9328_v22  ;;  %v1308_v5 = vpop.f32.mrb[22].mxu0  ;;  %v1349_v6 = vpop.f32.mrb[22].mxu1  ;;  %3359 = vmatpush1.bf16.msra.mxu0 %v7759_v55  ;;  %3400 = vmatpush1.bf16.msra.mxu1 %v7762_v56  ;;  %v7775_v21 = vld [vmem:[%s10336_s3 + $0x9c0] ss:$16 sps:$4 sm:$0xff]   ;;  %v7778_v22 = vld [vmem:[%s10336_s3 + $0x9c8] ss:$16 sps:$4 sm:$0xff]   ;;  %v6663_v56 = vcombine.high %v6636_v42, %v6636_v42 }
 0x228   :  { %v1309_v10 = vpop.f32.mrb[23].mxu0  ;;  %v1350_v11 = vpop.f32.mrb[23].mxu1  ;;  %3360 = vmatprep.subr.bf16.mxu0 %v7767_v57  ;;  %3401 = vmatprep.subr.bf16.mxu1 %v7770_v58  ;;  %v7808_v55 = vld [vmem:[%s10336_s3 + $0xa68] ss:$16 sps:$4 sm:$0xff]   ;;  %v6664_v61 = vcombine.low %v6637_v45, %v6637_v45  ;;  %v3599_v62 = vsel %vm71_vm1, %v6662_v60, 0 }
 0x229   :  { %v7820_v1 = vld [vmem:[%s10336_s3 + $0xa9c] ss:$16 sps:$4 sm:$0xff]   ;;  %v3436_v2 = vld [vmem:[#allocation2 + $0x18] sm:$0x3]  ;;  %v7823_v6 = vld [vmem:[%s10336_s3 + $0xab4] ss:$16 sps:$4 sm:$0xff]  }
 0x22a   :  { %v3437_v5 = vpack.c.bf16 %v3436_v2, %v3436_v2  ;;  %v7829_v10 = vld [vmem:[%s10336_s3 + $0xad4] ss:$16 sps:$4 sm:$0xff]   ;;  %v7832_v11 = vld [vmem:[%s10336_s3 + $0xadc] ss:$16 sps:$4 sm:$0xff]   ;;  %v7870_v60 = vld [vmem:[%s10336_s3 + $0xba8] ss:$16 sps:$4 sm:$0xff]  }
 0x22b   :  { %3361 = vmatpush1.bf16.msra.mxu0 %v7765_v7  ;;  %3402 = vmatpush1.bf16.msra.mxu1 %v7768_v8  ;;  %v7826_v7 = vld [vmem:[%s10336_s3 + $0xabc] ss:$16 sps:$4 sm:$0xff]   ;;  %v7821_v8 = vld [vmem:[%s10336_s3 + $0xab0] ss:$16 sps:$4 sm:$0xff]   ;;  %v7835_v15 = vld [vmem:[%s10336_s3 + $0xaf4] ss:$16 sps:$4 sm:$0xff]  }
 0x22c   :  { %6608 = vmatprep.subr.msk.bf16.mxu0 %vm71_vm1, %v6605_v9  ;;  %6610 = vmatprep.subr.msk.bf16.mxu1 %vm71_vm1, %v6607_v12  ;;  %v7824_v9 = vld [vmem:[%s10336_s3 + $0xab8] ss:$16 sps:$4 sm:$0xff]   ;;  %v7827_v12 = vld [vmem:[%s10336_s3 + $0xad0] ss:$16 sps:$4 sm:$0xff]   ;;  %v7884_v2 = vld [vmem:[%s10336_s3 + $0xbec] ss:$16 sps:$4 sm:$0xff]  }
 0x22f   :  { %3363 = vmatpush1.bf16.msra.mxu0 %v3339_v16  ;;  %3404 = vmatpush1.bf16.msra.mxu1 %v3345_v17  ;;  %v7838_v16 = vld [vmem:[%s10336_s3 + $0xafc] ss:$16 sps:$4 sm:$0xff]   ;;  %v7833_v17 = vld [vmem:[%s10336_s3 + $0xaf0] ss:$16 sps:$4 sm:$0xff]  }
 0x230   :  { %3610 = vmatprep.subr.bf16.mxu0 %v7777_v18  ;;  %3651 = vmatprep.subr.bf16.mxu1 %v7780_v19  ;;  %v7836_v18 = vld [vmem:[%s10336_s3 + $0xaf8] ss:$16 sps:$4 sm:$0xff]   ;;  %v7841_v19 = vld [vmem:[%s10336_s3 + $0xb14] ss:$16 sps:$4 sm:$0xff]  }
 0x232   :  { %6609 = vmatmul.mubr.msk.bf16.vlgmr.msra.gmra.mrb[52].mxu0 %vm511_vm13, %v3177_v23  ;;  %6611 = vmatmul.mubr.msk.bf16.vlgmr.msra.gmra.mrb[52].mxu1 %vm511_vm13, %v3177_v23  ;;  %v7847_v23 = vld [vmem:[%s10336_s3 + $0xb34] ss:$16 sps:$4 sm:$0xff]  }
 0x233   :  { %3611 = vmatpush1.bf16.msra.mxu0 %v7775_v21  ;;  %3652 = vmatpush1.bf16.msra.mxu1 %v7778_v22  ;;  %v7839_v21 = vld [vmem:[%s10336_s3 + $0xb10] ss:$16 sps:$4 sm:$0xff]   ;;  %v7842_v22 = vld [vmem:[%s10336_s3 + $0xb18] ss:$16 sps:$4 sm:$0xff]  }
 0x234   :  { %3612 = vmatprep.subr.bf16.mxu0 %v7783_v24  ;;  %3653 = vmatprep.subr.bf16.mxu1 %v7786_v25  ;;  %v7850_v24 = vld [vmem:[%s10336_s3 + $0xb3c] ss:$16 sps:$4 sm:$0xff]   ;;  %v6694_v25 = vld [vmem:[%s10336_s3 + $0xb50] sm:$0x33] }
 0x235   :  { %3642 = vmatprep.mubr.bf16.mxu0 %v8158_v13  ;;  %3683 = vmatprep.mubr.bf16.mxu1 %v8158_v13 }
 0x237   :  { %3613 = vmatpush1.bf16.msra.mxu0 %v7781_v26  ;;  %3654 = vmatpush1.bf16.msra.mxu1 %v7784_v27 }
 0x238   :  { %3614 = vmatprep.subr.bf16.mxu0 %v7789_v28  ;;  %3655 = vmatprep.subr.bf16.mxu1 %v7792_v29  ;;  %v6695_v28 = vld [vmem:[%s10336_s3 + $0xb58] sm:$0x33] }
 0x239   :  { %v6723_v42 = vcombine.high %v6695_v28, %v6695_v28 }
 0x23b   :  { %3615 = vmatpush1.bf16.msra.mxu0 %v7787_v30  ;;  %3656 = vmatpush1.bf16.msra.mxu1 %v7790_v31 }
 0x23c   :  { %3616 = vmatprep.subr.bf16.mxu0 %v7795_v32  ;;  %3657 = vmatprep.subr.bf16.mxu1 %v7798_v33 }
 0x23f   :  { %3617 = vmatpush1.bf16.msra.mxu0 %v7793_v34  ;;  %3658 = vmatpush1.bf16.msra.mxu1 %v7796_v35 }
 0x240   :  { %3618 = vmatprep.subr.bf16.mxu0 %v7801_v36  ;;  %3659 = vmatprep.subr.bf16.mxu1 %v7804_v37  ;;  %v7845_v37 = vld [vmem:[%s10336_s3 + $0xb30] ss:$16 sps:$4 sm:$0xff]  }
 0x241   :  { %v1564_v43 = vpop.f32.mrb[24].mxu0  ;;  %v1605_v44 = vpop.f32.mrb[24].mxu1 }
 0x242   :  { %v9515_v46 = vadd.f32 %v1564_v43, %v9417_v63  ;;  %v9518_v47 = vadd.f32 %v1605_v44, %v9420_v0  ;;  %v1566_v48 = vpop.f32.mrb[25].mxu0  ;;  %v1607_v49 = vpop.f32.mrb[25].mxu1  ;;  %v3605_v63 = vsel %vm71_vm1, %v6664_v61, 0  ;;  %v7817_v0 = vld [vmem:[%s10336_s3 + $0xa94] ss:$16 sps:$4 sm:$0xff]   ;;  %v6720_v43 = vcombine.low %v6694_v25, %v6694_v25 }
 0x243   :  { %v9521_v50 = vadd.f32 %v1566_v48, %v9423_v3  ;;  %v9524_v51 = vadd.f32 %v1607_v49, %v9426_v4  ;;  %v1568_v52 = vpop.f32.mrb[26].mxu0  ;;  %v1609_v53 = vpop.f32.mrb[26].mxu1  ;;  %3619 = vmatpush1.bf16.msra.mxu0 %v7799_v38  ;;  %3660 = vmatpush1.bf16.msra.mxu1 %v7802_v39  ;;  %v7815_v3 = vld [vmem:[%s10336_s3 + $0xa90] ss:$16 sps:$4 sm:$0xff]   ;;  %v7818_v4 = vld [vmem:[%s10336_s3 + $0xa98] ss:$16 sps:$4 sm:$0xff]   ;;  %v6721_v39 = vcombine.high %v6694_v25, %v6694_v25 }
 0x244   :  { %v1569_v57 = vpop.f32.mrb[27].mxu0  ;;  %v1610_v58 = vpop.f32.mrb[27].mxu1  ;;  %3620 = vmatprep.subr.bf16.mxu0 %v7807_v40  ;;  %3661 = vmatprep.subr.bf16.mxu1 %v7810_v41  ;;  %v7848_v38 = vld [vmem:[%s10336_s3 + $0xb38] ss:$16 sps:$4 sm:$0xff]   ;;  %v6722_v44 = vcombine.low %v6695_v28, %v6695_v28  ;;  %v3859_v45 = vsel %vm71_vm1, %v6720_v43, 0 }
 0x245   :  { %v7860_v48 = vld [vmem:[%s10336_s3 + $0xb6c] ss:$16 sps:$4 sm:$0xff]   ;;  %v3696_v49 = vld [vmem:[#allocation2 + $0x1a] sm:$0x3]  ;;  %v7863_v53 = vld [vmem:[%s10336_s3 + $0xb84] ss:$16 sps:$4 sm:$0xff]  }
 0x246   :  { %v3697_v52 = vpack.c.bf16 %v3696_v49, %v3696_v49  ;;  %v7869_v57 = vld [vmem:[%s10336_s3 + $0xba4] ss:$16 sps:$4 sm:$0xff]   ;;  %v7872_v58 = vld [vmem:[%s10336_s3 + $0xbac] ss:$16 sps:$4 sm:$0xff]   ;;  %v7910_v43 = vld [vmem:[%s10336_s3 + $0xc78] ss:$16 sps:$4 sm:$0xff]  }
 0x247   :  { %3621 = vmatpush1.bf16.msra.mxu0 %v7805_v54  ;;  %3662 = vmatpush1.bf16.msra.mxu1 %v7808_v55  ;;  %v7866_v54 = vld [vmem:[%s10336_s3 + $0xb8c] ss:$16 sps:$4 sm:$0xff]   ;;  %v7861_v55 = vld [vmem:[%s10336_s3 + $0xb80] ss:$16 sps:$4 sm:$0xff]   ;;  %v7875_v61 = vld [vmem:[%s10336_s3 + $0xbc4] ss:$16 sps:$4 sm:$0xff]  }
 0x248   :  { %6666 = vmatprep.subr.msk.bf16.mxu0 %vm71_vm1, %v6663_v56  ;;  %6668 = vmatprep.subr.msk.bf16.mxu1 %vm71_vm1, %v6665_v59  ;;  %v7864_v56 = vld [vmem:[%s10336_s3 + $0xb88] ss:$16 sps:$4 sm:$0xff]   ;;  %v7867_v59 = vld [vmem:[%s10336_s3 + $0xba0] ss:$16 sps:$4 sm:$0xff]   ;;  %v7924_v49 = vld [vmem:[%s10336_s3 + $0xcbc] ss:$16 sps:$4 sm:$0xff]  }
 0x24b   :  { %3623 = vmatpush1.bf16.msra.mxu0 %v3599_v62  ;;  %3664 = vmatpush1.bf16.msra.mxu1 %v3605_v63  ;;  %v7878_v62 = vld [vmem:[%s10336_s3 + $0xbcc] ss:$16 sps:$4 sm:$0xff]   ;;  %v7873_v63 = vld [vmem:[%s10336_s3 + $0xbc0] ss:$16 sps:$4 sm:$0xff]  }
 0x24c   :  { %3870 = vmatprep.subr.bf16.mxu0 %v7817_v0  ;;  %3911 = vmatprep.subr.bf16.mxu1 %v7820_v1  ;;  %v7876_v0 = vld [vmem:[%s10336_s3 + $0xbc8] ss:$16 sps:$4 sm:$0xff]   ;;  %v7881_v1 = vld [vmem:[%s10336_s3 + $0xbe4] ss:$16 sps:$4 sm:$0xff]  }
 0x24e   :  { %6667 = vmatmul.mubr.msk.bf16.vlgmr.msra.gmra.mrb[56].mxu0 %vm511_vm13, %v3437_v5  ;;  %6669 = vmatmul.mubr.msk.bf16.vlgmr.msra.gmra.mrb[56].mxu1 %vm511_vm13, %v3437_v5  ;;  %v7887_v5 = vld [vmem:[%s10336_s3 + $0xc04] ss:$16 sps:$4 sm:$0xff]  }
 0x24f   :  { %3871 = vmatpush1.bf16.msra.mxu0 %v7815_v3  ;;  %3912 = vmatpush1.bf16.msra.mxu1 %v7818_v4  ;;  %v7879_v3 = vld [vmem:[%s10336_s3 + $0xbe0] ss:$16 sps:$4 sm:$0xff]   ;;  %v7882_v4 = vld [vmem:[%s10336_s3 + $0xbe8] ss:$16 sps:$4 sm:$0xff]  }
 0x250   :  { %3872 = vmatprep.subr.bf16.mxu0 %v7823_v6  ;;  %3913 = vmatprep.subr.bf16.mxu1 %v7826_v7  ;;  %v7890_v6 = vld [vmem:[%s10336_s3 + $0xc0c] ss:$16 sps:$4 sm:$0xff]   ;;  %v6752_v7 = vld [vmem:[%s10336_s3 + $0xc20] sm:$0x33] }
 0x251   :  { %3902 = vmatprep.mubr.bf16.mxu0 %v8158_v13  ;;  %3943 = vmatprep.mubr.bf16.mxu1 %v8158_v13 }
 0x253   :  { %3873 = vmatpush1.bf16.msra.mxu0 %v7821_v8  ;;  %3914 = vmatpush1.bf16.msra.mxu1 %v7824_v9 }
 0x254   :  { %3874 = vmatprep.subr.bf16.mxu0 %v7829_v10  ;;  %3915 = vmatprep.subr.bf16.mxu1 %v7832_v11  ;;  %v6753_v10 = vld [vmem:[%s10336_s3 + $0xc28] sm:$0x33] }
 0x255   :  { %v6781_v25 = vcombine.high %v6753_v10, %v6753_v10 }
 0x257   :  { %3875 = vmatpush1.bf16.msra.mxu0 %v7827_v12  ;;  %3916 = vmatpush1.bf16.msra.mxu1 %v7830_v14 }
 0x258   :  { %3876 = vmatprep.subr.bf16.mxu0 %v7835_v15  ;;  %3917 = vmatprep.subr.bf16.mxu1 %v7838_v16 }
 0x25b   :  { %3877 = vmatpush1.bf16.msra.mxu0 %v7833_v17  ;;  %3918 = vmatpush1.bf16.msra.mxu1 %v7836_v18 }
 0x25c   :  { %3878 = vmatprep.subr.bf16.mxu0 %v7841_v19  ;;  %3919 = vmatprep.subr.bf16.mxu1 %v7844_v20  ;;  %v7885_v20 = vld [vmem:[%s10336_s3 + $0xc00] ss:$16 sps:$4 sm:$0xff]  }
 0x25d   :  { %v1824_v26 = vpop.f32.mrb[28].mxu0  ;;  %v1865_v27 = vpop.f32.mrb[28].mxu1 }
 0x25e   :  { %v9613_v29 = vadd.f32 %v1824_v26, %v9515_v46  ;;  %v9616_v30 = vadd.f32 %v1865_v27, %v9518_v47  ;;  %v1826_v31 = vpop.f32.mrb[29].mxu0  ;;  %v1867_v32 = vpop.f32.mrb[29].mxu1  ;;  %v3865_v46 = vsel %vm71_vm1, %v6722_v44, 0  ;;  %v7857_v47 = vld [vmem:[%s10336_s3 + $0xb64] ss:$16 sps:$4 sm:$0xff]   ;;  %v6778_v26 = vcombine.low %v6752_v7, %v6752_v7 }
 0x25f   :  { %v9619_v33 = vadd.f32 %v1826_v31, %v9521_v50  ;;  %v9622_v34 = vadd.f32 %v1867_v32, %v9524_v51  ;;  %v1828_v35 = vpop.f32.mrb[30].mxu0  ;;  %v1869_v36 = vpop.f32.mrb[30].mxu1  ;;  %3879 = vmatpush1.bf16.msra.mxu0 %v7839_v21  ;;  %3920 = vmatpush1.bf16.msra.mxu1 %v7842_v22  ;;  %v7855_v50 = vld [vmem:[%s10336_s3 + $0xb60] ss:$16 sps:$4 sm:$0xff]   ;;  %v7858_v51 = vld [vmem:[%s10336_s3 + $0xb68] ss:$16 sps:$4 sm:$0xff]   ;;  %v6779_v22 = vcombine.high %v6752_v7, %v6752_v7 }
 0x260   :  { %v1829_v40 = vpop.f32.mrb[31].mxu0  ;;  %v1870_v41 = vpop.f32.mrb[31].mxu1  ;;  %3880 = vmatprep.subr.bf16.mxu0 %v7847_v23  ;;  %3921 = vmatprep.subr.bf16.mxu1 %v7850_v24  ;;  %v7888_v21 = vld [vmem:[%s10336_s3 + $0xc08] ss:$16 sps:$4 sm:$0xff]   ;;  %v6780_v27 = vcombine.low %v6753_v10, %v6753_v10  ;;  %v4119_v28 = vsel %vm71_vm1, %v6778_v26, 0 }
 0x261   :  { %v7900_v31 = vld [vmem:[%s10336_s3 + $0xc3c] ss:$16 sps:$4 sm:$0xff]   ;;  %v7903_v36 = vld [vmem:[%s10336_s3 + $0xc54] ss:$16 sps:$4 sm:$0xff]   ;;  %v7950_v26 = vld [vmem:[%s10336_s3 + $0xd48] ss:$16 sps:$4 sm:$0xff]  }
 0x262   :  { %v3956_v32 = vld [vmem:[#allocation2 + $0x1c] sm:$0x3]  ;;  %v7909_v40 = vld [vmem:[%s10336_s3 + $0xc74] ss:$16 sps:$4 sm:$0xff]  }
 0x263   :  { %3881 = vmatpush1.bf16.msra.mxu0 %v7845_v37  ;;  %3922 = vmatpush1.bf16.msra.mxu1 %v7848_v38  ;;  %v3957_v35 = vpack.c.bf16 %v3956_v32, %v3956_v32  ;;  %v7906_v37 = vld [vmem:[%s10336_s3 + $0xc5c] ss:$16 sps:$4 sm:$0xff]   ;;  %v7901_v38 = vld [vmem:[%s10336_s3 + $0xc50] ss:$16 sps:$4 sm:$0xff]   ;;  %v7915_v44 = vld [vmem:[%s10336_s3 + $0xc94] ss:$16 sps:$4 sm:$0xff]  }
 0x264   :  { %6724 = vmatprep.subr.msk.bf16.mxu0 %vm71_vm1, %v6721_v39  ;;  %6726 = vmatprep.subr.msk.bf16.mxu1 %vm71_vm1, %v6723_v42  ;;  %v7904_v39 = vld [vmem:[%s10336_s3 + $0xc58] ss:$16 sps:$4 sm:$0xff]   ;;  %v7912_v41 = vld [vmem:[%s10336_s3 + $0xc7c] ss:$16 sps:$4 sm:$0xff]   ;;  %v7907_v42 = vld [vmem:[%s10336_s3 + $0xc70] ss:$16 sps:$4 sm:$0xff]  }
 0x265   :  { %v7964_v32 = vld [vmem:[%s10336_s3 + $0xd8c] ss:$16 sps:$4 sm:$0xff]  }
 0x267   :  { %3883 = vmatpush1.bf16.msra.mxu0 %v3859_v45  ;;  %3924 = vmatpush1.bf16.msra.mxu1 %v3865_v46  ;;  %v7918_v45 = vld [vmem:[%s10336_s3 + $0xc9c] ss:$16 sps:$4 sm:$0xff]   ;;  %v7913_v46 = vld [vmem:[%s10336_s3 + $0xc90] ss:$16 sps:$4 sm:$0xff]  }
 0x268   :  { %4130 = vmatprep.subr.bf16.mxu0 %v7857_v47  ;;  %4171 = vmatprep.subr.bf16.mxu1 %v7860_v48  ;;  %v7916_v47 = vld [vmem:[%s10336_s3 + $0xc98] ss:$16 sps:$4 sm:$0xff]   ;;  %v7921_v48 = vld [vmem:[%s10336_s3 + $0xcb4] ss:$16 sps:$4 sm:$0xff]  }
 0x26a   :  { %6725 = vmatmul.mubr.msk.bf16.vlgmr.msra.gmra.mrb[60].mxu0 %vm511_vm13, %v3697_v52  ;;  %6727 = vmatmul.mubr.msk.bf16.vlgmr.msra.gmra.mrb[60].mxu1 %vm511_vm13, %v3697_v52  ;;  %v7927_v52 = vld [vmem:[%s10336_s3 + $0xcd4] ss:$16 sps:$4 sm:$0xff]  }
 0x26b   :  { %4131 = vmatpush1.bf16.msra.mxu0 %v7855_v50  ;;  %4172 = vmatpush1.bf16.msra.mxu1 %v7858_v51  ;;  %v7919_v50 = vld [vmem:[%s10336_s3 + $0xcb0] ss:$16 sps:$4 sm:$0xff]   ;;  %v7922_v51 = vld [vmem:[%s10336_s3 + $0xcb8] ss:$16 sps:$4 sm:$0xff]  }
 0x26c   :  { %4132 = vmatprep.subr.bf16.mxu0 %v7863_v53  ;;  %4173 = vmatprep.subr.bf16.mxu1 %v7866_v54  ;;  %v7930_v53 = vld [vmem:[%s10336_s3 + $0xcdc] ss:$16 sps:$4 sm:$0xff]   ;;  %v6810_v54 = vld [vmem:[%s10336_s3 + $0xcf0] sm:$0x33] }
 0x26d   :  { %4162 = vmatprep.mubr.bf16.mxu0 %v8158_v13  ;;  %4203 = vmatprep.mubr.bf16.mxu1 %v8158_v13 }
 0x26f   :  { %4133 = vmatpush1.bf16.msra.mxu0 %v7861_v55  ;;  %4174 = vmatpush1.bf16.msra.mxu1 %v7864_v56 }
 0x270   :  { %4134 = vmatprep.subr.bf16.mxu0 %v7869_v57  ;;  %4175 = vmatprep.subr.bf16.mxu1 %v7872_v58  ;;  %v6811_v57 = vld [vmem:[%s10336_s3 + $0xcf8] sm:$0x33] }
 0x271   :  { %v6839_v7 = vcombine.high %v6811_v57, %v6811_v57 }
 0x273   :  { %4135 = vmatpush1.bf16.msra.mxu0 %v7867_v59  ;;  %4176 = vmatpush1.bf16.msra.mxu1 %v7870_v60 }
 0x274   :  { %4136 = vmatprep.subr.bf16.mxu0 %v7875_v61  ;;  %4177 = vmatprep.subr.bf16.mxu1 %v7878_v62 }
 0x277   :  { %4137 = vmatpush1.bf16.msra.mxu0 %v7873_v63  ;;  %4178 = vmatpush1.bf16.msra.mxu1 %v7876_v0 }
 0x278   :  { %4138 = vmatprep.subr.bf16.mxu0 %v7881_v1  ;;  %4179 = vmatprep.subr.bf16.mxu1 %v7884_v2  ;;  %v7925_v2 = vld [vmem:[%s10336_s3 + $0xcd0] ss:$16 sps:$4 sm:$0xff]  }
 0x279   :  { %v2084_v8 = vpop.f32.mrb[32].mxu0  ;;  %v2125_v9 = vpop.f32.mrb[32].mxu1 }
 0x27a   :  { %v9711_v11 = vadd.f32 %v2084_v8, %v9613_v29  ;;  %v9714_v12 = vadd.f32 %v2125_v9, %v9616_v30  ;;  %v2086_v14 = vpop.f32.mrb[33].mxu0  ;;  %v2127_v15 = vpop.f32.mrb[33].mxu1  ;;  %v4125_v29 = vsel %vm71_vm1, %v6780_v27, 0  ;;  %v7897_v30 = vld [vmem:[%s10336_s3 + $0xc34] ss:$16 sps:$4 sm:$0xff]   ;;  %v6836_v8 = vcombine.low %v6810_v54, %v6810_v54 }
 0x27b   :  { %v9717_v16 = vadd.f32 %v2086_v14, %v9619_v33  ;;  %v9720_v17 = vadd.f32 %v2127_v15, %v9622_v34  ;;  %v2088_v18 = vpop.f32.mrb[34].mxu0  ;;  %v2129_v19 = vpop.f32.mrb[34].mxu1  ;;  %4139 = vmatpush1.bf16.msra.mxu0 %v7879_v3  ;;  %4180 = vmatpush1.bf16.msra.mxu1 %v7882_v4  ;;  %v7895_v33 = vld [vmem:[%s10336_s3 + $0xc30] ss:$16 sps:$4 sm:$0xff]   ;;  %v7898_v34 = vld [vmem:[%s10336_s3 + $0xc38] ss:$16 sps:$4 sm:$0xff]   ;;  %v6837_v4 = vcombine.high %v6810_v54, %v6810_v54 }
 0x27c   :  { %v2089_v23 = vpop.f32.mrb[35].mxu0  ;;  %v2130_v24 = vpop.f32.mrb[35].mxu1  ;;  %4140 = vmatprep.subr.bf16.mxu0 %v7887_v5  ;;  %4181 = vmatprep.subr.bf16.mxu1 %v7890_v6  ;;  %v7928_v3 = vld [vmem:[%s10336_s3 + $0xcd8] ss:$16 sps:$4 sm:$0xff]   ;;  %v6838_v9 = vcombine.low %v6811_v57, %v6811_v57  ;;  %v4379_v10 = vsel %vm71_vm1, %v6836_v8, 0 }
 0x27d   :  { %v7940_v14 = vld [vmem:[%s10336_s3 + $0xd0c] ss:$16 sps:$4 sm:$0xff]   ;;  %v7943_v19 = vld [vmem:[%s10336_s3 + $0xd24] ss:$16 sps:$4 sm:$0xff]   ;;  %v7990_v8 = vld [vmem:[%s10336_s3 + $0xe18] ss:$16 sps:$4 sm:$0xff]  }
 0x27e   :  { %v4216_v15 = vld [vmem:[#allocation2 + $0x1e] sm:$0x3]  ;;  %v7949_v23 = vld [vmem:[%s10336_s3 + $0xd44] ss:$16 sps:$4 sm:$0xff]  }
 0x27f   :  { %4141 = vmatpush1.bf16.msra.mxu0 %v7885_v20  ;;  %4182 = vmatpush1.bf16.msra.mxu1 %v7888_v21  ;;  %v4217_v18 = vpack.c.bf16 %v4216_v15, %v4216_v15  ;;  %v7946_v20 = vld [vmem:[%s10336_s3 + $0xd2c] ss:$16 sps:$4 sm:$0xff]   ;;  %v7941_v21 = vld [vmem:[%s10336_s3 + $0xd20] ss:$16 sps:$4 sm:$0xff]   ;;  %v7955_v27 = vld [vmem:[%s10336_s3 + $0xd64] ss:$16 sps:$4 sm:$0xff]  }
 0x280   :  { %6782 = vmatprep.subr.msk.bf16.mxu0 %vm71_vm1, %v6779_v22  ;;  %6784 = vmatprep.subr.msk.bf16.mxu1 %vm71_vm1, %v6781_v25  ;;  %v7944_v22 = vld [vmem:[%s10336_s3 + $0xd28] ss:$16 sps:$4 sm:$0xff]   ;;  %v7952_v24 = vld [vmem:[%s10336_s3 + $0xd4c] ss:$16 sps:$4 sm:$0xff]   ;;  %v7947_v25 = vld [vmem:[%s10336_s3 + $0xd40] ss:$16 sps:$4 sm:$0xff]  }
 0x281   :  { %v8004_v15 = vld [vmem:[%s10336_s3 + $0xe5c] ss:$16 sps:$4 sm:$0xff]  }
 0x283   :  { %4143 = vmatpush1.bf16.msra.mxu0 %v4119_v28  ;;  %4184 = vmatpush1.bf16.msra.mxu1 %v4125_v29  ;;  %v7958_v28 = vld [vmem:[%s10336_s3 + $0xd6c] ss:$16 sps:$4 sm:$0xff]   ;;  %v7953_v29 = vld [vmem:[%s10336_s3 + $0xd60] ss:$16 sps:$4 sm:$0xff]  }
 0x284   :  { %4390 = vmatprep.subr.bf16.mxu0 %v7897_v30  ;;  %4431 = vmatprep.subr.bf16.mxu1 %v7900_v31  ;;  %v7956_v30 = vld [vmem:[%s10336_s3 + $0xd68] ss:$16 sps:$4 sm:$0xff]   ;;  %v7961_v31 = vld [vmem:[%s10336_s3 + $0xd84] ss:$16 sps:$4 sm:$0xff]  }
 0x286   :  { %6783 = vmatmul.mubr.msk.bf16.vlgmr.msra.gmra.mrb[64].mxu0 %vm511_vm13, %v3957_v35  ;;  %6785 = vmatmul.mubr.msk.bf16.vlgmr.msra.gmra.mrb[64].mxu1 %vm511_vm13, %v3957_v35  ;;  %v7967_v35 = vld [vmem:[%s10336_s3 + $0xda4] ss:$16 sps:$4 sm:$0xff]  }
 0x287   :  { %4391 = vmatpush1.bf16.msra.mxu0 %v7895_v33  ;;  %4432 = vmatpush1.bf16.msra.mxu1 %v7898_v34  ;;  %v7959_v33 = vld [vmem:[%s10336_s3 + $0xd80] ss:$16 sps:$4 sm:$0xff]   ;;  %v7962_v34 = vld [vmem:[%s10336_s3 + $0xd88] ss:$16 sps:$4 sm:$0xff]  }
 0x288   :  { %4392 = vmatprep.subr.bf16.mxu0 %v7903_v36  ;;  %4433 = vmatprep.subr.bf16.mxu1 %v7906_v37  ;;  %v7970_v36 = vld [vmem:[%s10336_s3 + $0xdac] ss:$16 sps:$4 sm:$0xff]   ;;  %v6868_v37 = vld [vmem:[%s10336_s3 + $0xdc0] sm:$0x33] }
 0x289   :  { %4422 = vmatprep.mubr.bf16.mxu0 %v8158_v13  ;;  %4463 = vmatprep.mubr.bf16.mxu1 %v8158_v13 }
 0x28b   :  { %4393 = vmatpush1.bf16.msra.mxu0 %v7901_v38  ;;  %4434 = vmatpush1.bf16.msra.mxu1 %v7904_v39 }
 0x28c   :  { %4394 = vmatprep.subr.bf16.mxu0 %v7909_v40  ;;  %4435 = vmatprep.subr.bf16.mxu1 %v7912_v41  ;;  %v6869_v40 = vld [vmem:[%s10336_s3 + $0xdc8] sm:$0x33] }
 0x28d   :  { %v6897_v54 = vcombine.high %v6869_v40, %v6869_v40 }
 0x28f   :  { %4395 = vmatpush1.bf16.msra.mxu0 %v7907_v42  ;;  %4436 = vmatpush1.bf16.msra.mxu1 %v7910_v43 }
 0x290   :  { %4396 = vmatprep.subr.bf16.mxu0 %v7915_v44  ;;  %4437 = vmatprep.subr.bf16.mxu1 %v7918_v45 }
 0x293   :  { %4397 = vmatpush1.bf16.msra.mxu0 %v7913_v46  ;;  %4438 = vmatpush1.bf16.msra.mxu1 %v7916_v47 }
 0x294   :  { %4398 = vmatprep.subr.bf16.mxu0 %v7921_v48  ;;  %4439 = vmatprep.subr.bf16.mxu1 %v7924_v49  ;;  %v7965_v49 = vld [vmem:[%s10336_s3 + $0xda0] ss:$16 sps:$4 sm:$0xff]  }
 0x295   :  { %v2344_v55 = vpop.f32.mrb[36].mxu0  ;;  %v2385_v56 = vpop.f32.mrb[36].mxu1 }
 0x296   :  { %v9809_v58 = vadd.f32 %v2344_v55, %v9711_v11  ;;  %v9812_v59 = vadd.f32 %v2385_v56, %v9714_v12  ;;  %v2346_v60 = vpop.f32.mrb[37].mxu0  ;;  %v2387_v61 = vpop.f32.mrb[37].mxu1  ;;  %v4385_v11 = vsel %vm71_vm1, %v6838_v9, 0  ;;  %v7937_v12 = vld [vmem:[%s10336_s3 + $0xd04] ss:$16 sps:$4 sm:$0xff]   ;;  %v6894_v55 = vcombine.low %v6868_v37, %v6868_v37 }
 0x297   :  { %v9815_v62 = vadd.f32 %v2346_v60, %v9717_v16  ;;  %v9818_v63 = vadd.f32 %v2387_v61, %v9720_v17  ;;  %v2348_v0 = vpop.f32.mrb[38].mxu0  ;;  %v2389_v1 = vpop.f32.mrb[38].mxu1  ;;  %4399 = vmatpush1.bf16.msra.mxu0 %v7919_v50  ;;  %4440 = vmatpush1.bf16.msra.mxu1 %v7922_v51  ;;  %v7935_v16 = vld [vmem:[%s10336_s3 + $0xd00] ss:$16 sps:$4 sm:$0xff]   ;;  %v7938_v17 = vld [vmem:[%s10336_s3 + $0xd08] ss:$16 sps:$4 sm:$0xff]   ;;  %v6895_v51 = vcombine.high %v6868_v37, %v6868_v37 }
 0x298   :  { %v2349_v5 = vpop.f32.mrb[39].mxu0  ;;  %v2390_v6 = vpop.f32.mrb[39].mxu1  ;;  %4400 = vmatprep.subr.bf16.mxu0 %v7927_v52  ;;  %4441 = vmatprep.subr.bf16.mxu1 %v7930_v53  ;;  %v7968_v50 = vld [vmem:[%s10336_s3 + $0xda8] ss:$16 sps:$4 sm:$0xff]   ;;  %v6896_v56 = vcombine.low %v6869_v40, %v6869_v40  ;;  %v4639_v57 = vsel %vm71_vm1, %v6894_v55, 0 }
 0x299   :  { %v7980_v60 = vld [vmem:[%s10336_s3 + $0xddc] ss:$16 sps:$4 sm:$0xff]   ;;  %v4476_v61 = vld [vmem:[#allocation2 + $0x20] sm:$0x3]  ;;  %v7983_v1 = vld [vmem:[%s10336_s3 + $0xdf4] ss:$16 sps:$4 sm:$0xff]  }
 0x29a   :  { %v4477_v0 = vpack.c.bf16 %v4476_v61, %v4476_v61  ;;  %v7989_v5 = vld [vmem:[%s10336_s3 + $0xe14] ss:$16 sps:$4 sm:$0xff]   ;;  %v7992_v6 = vld [vmem:[%s10336_s3 + $0xe1c] ss:$16 sps:$4 sm:$0xff]   ;;  %v8030_v55 = vld [vmem:[%s10336_s3 + $0xee8] ss:$16 sps:$4 sm:$0xff]  }
 0x29b   :  { %4401 = vmatpush1.bf16.msra.mxu0 %v7925_v2  ;;  %4442 = vmatpush1.bf16.msra.mxu1 %v7928_v3  ;;  %v7986_v2 = vld [vmem:[%s10336_s3 + $0xdfc] ss:$16 sps:$4 sm:$0xff]   ;;  %v7981_v3 = vld [vmem:[%s10336_s3 + $0xdf0] ss:$16 sps:$4 sm:$0xff]   ;;  %v7995_v9 = vld [vmem:[%s10336_s3 + $0xe34] ss:$16 sps:$4 sm:$0xff]  }
 0x29c   :  { %6840 = vmatprep.subr.msk.bf16.mxu0 %vm71_vm1, %v6837_v4  ;;  %6842 = vmatprep.subr.msk.bf16.mxu1 %vm71_vm1, %v6839_v7  ;;  %v7984_v4 = vld [vmem:[%s10336_s3 + $0xdf8] ss:$16 sps:$4 sm:$0xff]   ;;  %v7987_v7 = vld [vmem:[%s10336_s3 + $0xe10] ss:$16 sps:$4 sm:$0xff]   ;;  %v8044_v61 = vld [vmem:[%s10336_s3 + $0xf2c] ss:$16 sps:$4 sm:$0xff]  }
 0x29f   :  { %4403 = vmatpush1.bf16.msra.mxu0 %v4379_v10  ;;  %4444 = vmatpush1.bf16.msra.mxu1 %v4385_v11  ;;  %v7998_v10 = vld [vmem:[%s10336_s3 + $0xe3c] ss:$16 sps:$4 sm:$0xff]   ;;  %v7993_v11 = vld [vmem:[%s10336_s3 + $0xe30] ss:$16 sps:$4 sm:$0xff]  }
 0x2a0   :  { %4650 = vmatprep.subr.bf16.mxu0 %v7937_v12  ;;  %4691 = vmatprep.subr.bf16.mxu1 %v7940_v14  ;;  %v7996_v12 = vld [vmem:[%s10336_s3 + $0xe38] ss:$16 sps:$4 sm:$0xff]   ;;  %v8001_v14 = vld [vmem:[%s10336_s3 + $0xe54] ss:$16 sps:$4 sm:$0xff]  }
 0x2a2   :  { %6841 = vmatmul.mubr.msk.bf16.vlgmr.msra.gmra.mrb[68].mxu0 %vm511_vm13, %v4217_v18  ;;  %6843 = vmatmul.mubr.msk.bf16.vlgmr.msra.gmra.mrb[68].mxu1 %vm511_vm13, %v4217_v18  ;;  %v8007_v18 = vld [vmem:[%s10336_s3 + $0xe74] ss:$16 sps:$4 sm:$0xff]  }
 0x2a3   :  { %4651 = vmatpush1.bf16.msra.mxu0 %v7935_v16  ;;  %4692 = vmatpush1.bf16.msra.mxu1 %v7938_v17  ;;  %v7999_v16 = vld [vmem:[%s10336_s3 + $0xe50] ss:$16 sps:$4 sm:$0xff]   ;;  %v8002_v17 = vld [vmem:[%s10336_s3 + $0xe58] ss:$16 sps:$4 sm:$0xff]  }
 0x2a4   :  { %4652 = vmatprep.subr.bf16.mxu0 %v7943_v19  ;;  %4693 = vmatprep.subr.bf16.mxu1 %v7946_v20  ;;  %v8010_v19 = vld [vmem:[%s10336_s3 + $0xe7c] ss:$16 sps:$4 sm:$0xff]   ;;  %v6926_v20 = vld [vmem:[%s10336_s3 + $0xe90] sm:$0x33] }
 0x2a5   :  { %4682 = vmatprep.mubr.bf16.mxu0 %v8158_v13  ;;  %4723 = vmatprep.mubr.bf16.mxu1 %v8158_v13 }
 0x2a7   :  { %4653 = vmatpush1.bf16.msra.mxu0 %v7941_v21  ;;  %4694 = vmatpush1.bf16.msra.mxu1 %v7944_v22 }
 0x2a8   :  { %4654 = vmatprep.subr.bf16.mxu0 %v7949_v23  ;;  %4695 = vmatprep.subr.bf16.mxu1 %v7952_v24  ;;  %v6927_v23 = vld [vmem:[%s10336_s3 + $0xe98] sm:$0x33] }
 0x2a9   :  { %v6955_v37 = vcombine.high %v6927_v23, %v6927_v23 }
 0x2ab   :  { %4655 = vmatpush1.bf16.msra.mxu0 %v7947_v25  ;;  %4696 = vmatpush1.bf16.msra.mxu1 %v7950_v26 }
 0x2ac   :  { %4656 = vmatprep.subr.bf16.mxu0 %v7955_v27  ;;  %4697 = vmatprep.subr.bf16.mxu1 %v7958_v28 }
 0x2af   :  { %4657 = vmatpush1.bf16.msra.mxu0 %v7953_v29  ;;  %4698 = vmatpush1.bf16.msra.mxu1 %v7956_v30 }
 0x2b0   :  { %4658 = vmatprep.subr.bf16.mxu0 %v7961_v31  ;;  %4699 = vmatprep.subr.bf16.mxu1 %v7964_v32  ;;  %v8005_v32 = vld [vmem:[%s10336_s3 + $0xe70] ss:$16 sps:$4 sm:$0xff]  }
 0x2b1   :  { %v2604_v38 = vpop.f32.mrb[40].mxu0  ;;  %v2645_v39 = vpop.f32.mrb[40].mxu1 }
 0x2b2   :  { %v9907_v41 = vadd.f32 %v2604_v38, %v9809_v58  ;;  %v9910_v42 = vadd.f32 %v2645_v39, %v9812_v59  ;;  %v2606_v43 = vpop.f32.mrb[41].mxu0  ;;  %v2647_v44 = vpop.f32.mrb[41].mxu1  ;;  %v4645_v58 = vsel %vm71_vm1, %v6896_v56, 0  ;;  %v7977_v59 = vld [vmem:[%s10336_s3 + $0xdd4] ss:$16 sps:$4 sm:$0xff]   ;;  %v6952_v38 = vcombine.low %v6926_v20, %v6926_v20 }
 0x2b3   :  { %v9913_v45 = vadd.f32 %v2606_v43, %v9815_v62  ;;  %v9916_v46 = vadd.f32 %v2647_v44, %v9818_v63  ;;  %v2608_v47 = vpop.f32.mrb[42].mxu0  ;;  %v2649_v48 = vpop.f32.mrb[42].mxu1  ;;  %4659 = vmatpush1.bf16.msra.mxu0 %v7959_v33  ;;  %4700 = vmatpush1.bf16.msra.mxu1 %v7962_v34  ;;  %v7975_v62 = vld [vmem:[%s10336_s3 + $0xdd0] ss:$16 sps:$4 sm:$0xff]   ;;  %v7978_v63 = vld [vmem:[%s10336_s3 + $0xdd8] ss:$16 sps:$4 sm:$0xff]   ;;  %v6953_v34 = vcombine.high %v6926_v20, %v6926_v20 }
 0x2b4   :  { %v2609_v52 = vpop.f32.mrb[43].mxu0  ;;  %v2650_v53 = vpop.f32.mrb[43].mxu1  ;;  %4660 = vmatprep.subr.bf16.mxu0 %v7967_v35  ;;  %4701 = vmatprep.subr.bf16.mxu1 %v7970_v36  ;;  %v8008_v33 = vld [vmem:[%s10336_s3 + $0xe78] ss:$16 sps:$4 sm:$0xff]   ;;  %v6954_v39 = vcombine.low %v6927_v23, %v6927_v23  ;;  %v4899_v40 = vsel %vm71_vm1, %v6952_v38, 0 }
 0x2b5   :  { %v8020_v43 = vld [vmem:[%s10336_s3 + $0xeac] ss:$16 sps:$4 sm:$0xff]   ;;  %v4736_v44 = vld [vmem:[#allocation2 + $0x22] sm:$0x3]  ;;  %v8023_v48 = vld [vmem:[%s10336_s3 + $0xec4] ss:$16 sps:$4 sm:$0xff]  }
 0x2b6   :  { %v4737_v47 = vpack.c.bf16 %v4736_v44, %v4736_v44  ;;  %v8029_v52 = vld [vmem:[%s10336_s3 + $0xee4] ss:$16 sps:$4 sm:$0xff]   ;;  %v8032_v53 = vld [vmem:[%s10336_s3 + $0xeec] ss:$16 sps:$4 sm:$0xff]   ;;  %v8070_v38 = vld [vmem:[%s10336_s3 + $0xfb8] ss:$16 sps:$4 sm:$0xff]  }
 0x2b7   :  { %4661 = vmatpush1.bf16.msra.mxu0 %v7965_v49  ;;  %4702 = vmatpush1.bf16.msra.mxu1 %v7968_v50  ;;  %v8026_v49 = vld [vmem:[%s10336_s3 + $0xecc] ss:$16 sps:$4 sm:$0xff]   ;;  %v8021_v50 = vld [vmem:[%s10336_s3 + $0xec0] ss:$16 sps:$4 sm:$0xff]   ;;  %v8035_v56 = vld [vmem:[%s10336_s3 + $0xf04] ss:$16 sps:$4 sm:$0xff]  }
 0x2b8   :  { %6898 = vmatprep.subr.msk.bf16.mxu0 %vm71_vm1, %v6895_v51  ;;  %6900 = vmatprep.subr.msk.bf16.mxu1 %vm71_vm1, %v6897_v54  ;;  %v8024_v51 = vld [vmem:[%s10336_s3 + $0xec8] ss:$16 sps:$4 sm:$0xff]   ;;  %v8027_v54 = vld [vmem:[%s10336_s3 + $0xee0] ss:$16 sps:$4 sm:$0xff]  }
 0x2b9   :  { %v8079_v44 = vld [vmem:[%s10336_s3 + $0xff0] ss:$16 sps:$4 sm:$0xff]  }
 0x2bb   :  { %4663 = vmatpush1.bf16.msra.mxu0 %v4639_v57  ;;  %4704 = vmatpush1.bf16.msra.mxu1 %v4645_v58  ;;  %v8038_v57 = vld [vmem:[%s10336_s3 + $0xf0c] ss:$16 sps:$4 sm:$0xff]   ;;  %v8033_v58 = vld [vmem:[%s10336_s3 + $0xf00] ss:$16 sps:$4 sm:$0xff]  }
 0x2bc   :  { %4910 = vmatprep.subr.bf16.mxu0 %v7977_v59  ;;  %4951 = vmatprep.subr.bf16.mxu1 %v7980_v60  ;;  %v8036_v59 = vld [vmem:[%s10336_s3 + $0xf08] ss:$16 sps:$4 sm:$0xff]   ;;  %v8041_v60 = vld [vmem:[%s10336_s3 + $0xf24] ss:$16 sps:$4 sm:$0xff]  }
 0x2be   :  { %6899 = vmatmul.mubr.msk.bf16.vlgmr.msra.gmra.mrb[72].mxu0 %vm511_vm13, %v4477_v0  ;;  %6901 = vmatmul.mubr.msk.bf16.vlgmr.msra.gmra.mrb[72].mxu1 %vm511_vm13, %v4477_v0  ;;  %v8047_v0 = vld [vmem:[%s10336_s3 + $0xf44] ss:$16 sps:$4 sm:$0xff]  }
 0x2bf   :  { %4911 = vmatpush1.bf16.msra.mxu0 %v7975_v62  ;;  %4952 = vmatpush1.bf16.msra.mxu1 %v7978_v63  ;;  %v8039_v62 = vld [vmem:[%s10336_s3 + $0xf20] ss:$16 sps:$4 sm:$0xff]   ;;  %v8042_v63 = vld [vmem:[%s10336_s3 + $0xf28] ss:$16 sps:$4 sm:$0xff]  }
 0x2c0   :  { %4912 = vmatprep.subr.bf16.mxu0 %v7983_v1  ;;  %4953 = vmatprep.subr.bf16.mxu1 %v7986_v2  ;;  %v8050_v1 = vld [vmem:[%s10336_s3 + $0xf4c] ss:$16 sps:$4 sm:$0xff]   ;;  %v6984_v2 = vld [vmem:[%s10336_s3 + $0xf60] sm:$0x33] }
 0x2c1   :  { %4942 = vmatprep.mubr.bf16.mxu0 %v8158_v13  ;;  %4983 = vmatprep.mubr.bf16.mxu1 %v8158_v13 }
 0x2c3   :  { %4913 = vmatpush1.bf16.msra.mxu0 %v7981_v3  ;;  %4954 = vmatpush1.bf16.msra.mxu1 %v7984_v4 }
 0x2c4   :  { %4914 = vmatprep.subr.bf16.mxu0 %v7989_v5  ;;  %4955 = vmatprep.subr.bf16.mxu1 %v7992_v6  ;;  %v6985_v5 = vld [vmem:[%s10336_s3 + $0xf68] sm:$0x33] }
 0x2c5   :  { %v7013_v20 = vcombine.high %v6985_v5, %v6985_v5 }
 0x2c7   :  { %4915 = vmatpush1.bf16.msra.mxu0 %v7987_v7  ;;  %4956 = vmatpush1.bf16.msra.mxu1 %v7990_v8 }
 0x2c8   :  { %4916 = vmatprep.subr.bf16.mxu0 %v7995_v9  ;;  %4957 = vmatprep.subr.bf16.mxu1 %v7998_v10 }
 0x2cb   :  { %4917 = vmatpush1.bf16.msra.mxu0 %v7993_v11  ;;  %4958 = vmatpush1.bf16.msra.mxu1 %v7996_v12 }
 0x2cc   :  { %4918 = vmatprep.subr.bf16.mxu0 %v8001_v14  ;;  %4959 = vmatprep.subr.bf16.mxu1 %v8004_v15  ;;  %v8045_v15 = vld [vmem:[%s10336_s3 + $0xf40] ss:$16 sps:$4 sm:$0xff]  }
 0x2cd   :  { %v2864_v21 = vpop.f32.mrb[44].mxu0  ;;  %v2905_v22 = vpop.f32.mrb[44].mxu1 }
 0x2ce   :  { %v10005_v24 = vadd.f32 %v2864_v21, %v9907_v41  ;;  %v10008_v25 = vadd.f32 %v2905_v22, %v9910_v42  ;;  %v2866_v26 = vpop.f32.mrb[45].mxu0  ;;  %v2907_v27 = vpop.f32.mrb[45].mxu1  ;;  %v4905_v41 = vsel %vm71_vm1, %v6954_v39, 0  ;;  %v8017_v42 = vld [vmem:[%s10336_s3 + $0xea4] ss:$16 sps:$4 sm:$0xff]   ;;  %v7010_v21 = vcombine.low %v6984_v2, %v6984_v2 }
 0x2cf   :  { %v10011_v28 = vadd.f32 %v2866_v26, %v9913_v45  ;;  %v10014_v29 = vadd.f32 %v2907_v27, %v9916_v46  ;;  %v2868_v30 = vpop.f32.mrb[46].mxu0  ;;  %v2909_v31 = vpop.f32.mrb[46].mxu1  ;;  %4919 = vmatpush1.bf16.msra.mxu0 %v7999_v16  ;;  %4960 = vmatpush1.bf16.msra.mxu1 %v8002_v17  ;;  %v8015_v45 = vld [vmem:[%s10336_s3 + $0xea0] ss:$16 sps:$4 sm:$0xff]   ;;  %v8018_v46 = vld [vmem:[%s10336_s3 + $0xea8] ss:$16 sps:$4 sm:$0xff]   ;;  %v7011_v17 = vcombine.high %v6984_v2, %v6984_v2 }
 0x2d0   :  { %v2869_v35 = vpop.f32.mrb[47].mxu0  ;;  %v2910_v36 = vpop.f32.mrb[47].mxu1  ;;  %4920 = vmatprep.subr.bf16.mxu0 %v8007_v18  ;;  %4961 = vmatprep.subr.bf16.mxu1 %v8010_v19  ;;  %v8048_v16 = vld [vmem:[%s10336_s3 + $0xf48] ss:$16 sps:$4 sm:$0xff]   ;;  %v7012_v22 = vcombine.low %v6985_v5, %v6985_v5  ;;  %v5159_v23 = vsel %vm71_vm1, %v7010_v21, 0 }
 0x2d1   :  { %v8060_v26 = vld [vmem:[%s10336_s3 + $0xf7c] ss:$16 sps:$4 sm:$0xff]   ;;  %v4996_v27 = vld [vmem:[#allocation2 + $0x24] sm:$0x3] }
 0x2d2   :  { %v4997_v30 = vpack.c.bf16 %v4996_v27, %v4996_v27  ;;  %v8063_v31 = vld [vmem:[%s10336_s3 + $0xf94] ss:$16 sps:$4 sm:$0xff]   ;;  %v8072_v36 = vld [vmem:[%s10336_s3 + $0xfbc] ss:$16 sps:$4 sm:$0xff]  }
 0x2d3   :  { %4921 = vmatpush1.bf16.msra.mxu0 %v8005_v32  ;;  %4962 = vmatpush1.bf16.msra.mxu1 %v8008_v33  ;;  %v8066_v32 = vld [vmem:[%s10336_s3 + $0xf9c] ss:$16 sps:$4 sm:$0xff]   ;;  %v8061_v33 = vld [vmem:[%s10336_s3 + $0xf90] ss:$16 sps:$4 sm:$0xff]   ;;  %v8069_v35 = vld [vmem:[%s10336_s3 + $0xfb4] ss:$16 sps:$4 sm:$0xff]  }
 0x2d4   :  { %6956 = vmatprep.subr.msk.bf16.mxu0 %vm71_vm1, %v6953_v34  ;;  %6958 = vmatprep.subr.msk.bf16.mxu1 %vm71_vm1, %v6955_v37  ;;  %v8064_v34 = vld [vmem:[%s10336_s3 + $0xf98] ss:$16 sps:$4 sm:$0xff]   ;;  %v8067_v37 = vld [vmem:[%s10336_s3 + $0xfb0] ss:$16 sps:$4 sm:$0xff]   ;;  %v8075_v39 = vld [vmem:[%s10336_s3 + $0xfd4] ss:$16 sps:$4 sm:$0xff]  }
 0x2d7   :  { %4923 = vmatpush1.bf16.msra.mxu0 %v4899_v40  ;;  %4964 = vmatpush1.bf16.msra.mxu1 %v4905_v41  ;;  %v8073_v40 = vld [vmem:[%s10336_s3 + $0xfd0] ss:$16 sps:$4 sm:$0xff]   ;;  %v8076_v41 = vld [vmem:[%s10336_s3 + $0xfd8] ss:$16 sps:$4 sm:$0xff]  }
 0x2d8   :  { %5170 = vmatprep.subr.bf16.mxu0 %v8017_v42  ;;  %5211 = vmatprep.subr.bf16.mxu1 %v8020_v43  ;;  %v8081_v42 = vld [vmem:[%s10336_s3 + $0xff4] ss:$16 sps:$4 sm:$0xff]   ;;  %v8084_v43 = vld [vmem:[%s10336_s3 + $0xffc] ss:$16 sps:$4 sm:$0xff]  }
 0x2da   :  { %6957 = vmatmul.mubr.msk.bf16.vlgmr.msra.gmra.mrb[76].mxu0 %vm511_vm13, %v4737_v47  ;;  %6959 = vmatmul.mubr.msk.bf16.vlgmr.msra.gmra.mrb[76].mxu1 %vm511_vm13, %v4737_v47  ;;  %v8090_v47 = vld [vmem:[%s10336_s3 + $0x101c] ss:$16 sps:$4 sm:$0xff]  }
 0x2db   :  { %5171 = vmatpush1.bf16.msra.mxu0 %v8015_v45  ;;  %5212 = vmatpush1.bf16.msra.mxu1 %v8018_v46  ;;  %v8082_v45 = vld [vmem:[%s10336_s3 + $0xff8] ss:$16 sps:$4 sm:$0xff]   ;;  %v8087_v46 = vld [vmem:[%s10336_s3 + $0x1014] ss:$16 sps:$4 sm:$0xff]  }
 0x2dc   :  { %5172 = vmatprep.subr.bf16.mxu0 %v8023_v48  ;;  %5213 = vmatprep.subr.bf16.mxu1 %v8026_v49  ;;  %v7042_v48 = vld [vmem:[%s10336_s3 + $0x1030] sm:$0x33] }
 0x2dd   :  { %5202 = vmatprep.mubr.bf16.mxu0 %v8158_v13  ;;  %5243 = vmatprep.mubr.bf16.mxu1 %v8158_v13  ;;  %v7068_v2 = vcombine.low %v7042_v48, %v7042_v48 }
 0x2df   :  { %5173 = vmatpush1.bf16.msra.mxu0 %v8021_v50  ;;  %5214 = vmatpush1.bf16.msra.mxu1 %v8024_v51  ;;  %v7043_v51 = vld [vmem:[%s10336_s3 + $0x1038] sm:$0x33] }
 0x2e0   :  { %5174 = vmatprep.subr.bf16.mxu0 %v8029_v52  ;;  %5215 = vmatprep.subr.bf16.mxu1 %v8032_v53 }
 0x2e3   :  { %5175 = vmatpush1.bf16.msra.mxu0 %v8027_v54  ;;  %5216 = vmatpush1.bf16.msra.mxu1 %v8030_v55 }
 0x2e4   :  { %5176 = vmatprep.subr.bf16.mxu0 %v8035_v56  ;;  %5217 = vmatprep.subr.bf16.mxu1 %v8038_v57 }
 0x2e7   :  { %5177 = vmatpush1.bf16.msra.mxu0 %v8033_v58  ;;  %5218 = vmatpush1.bf16.msra.mxu1 %v8036_v59 }
 0x2e8   :  { %5178 = vmatprep.subr.bf16.mxu0 %v8041_v60  ;;  %5219 = vmatprep.subr.bf16.mxu1 %v8044_v61  ;;  %v8085_v60 = vld [vmem:[%s10336_s3 + $0x1010] ss:$16 sps:$4 sm:$0xff]   ;;  %v8088_v61 = vld [vmem:[%s10336_s3 + $0x1018] ss:$16 sps:$4 sm:$0xff]  }
 0x2e9   :  { %v3124_v3 = vpop.f32.mrb[48].mxu0  ;;  %v3165_v4 = vpop.f32.mrb[48].mxu1 }
 0x2ea   :  { %v10103_v6 = vadd.f32 %v3124_v3, %v10005_v24  ;;  %v10106_v7 = vadd.f32 %v3165_v4, %v10008_v25  ;;  %v3126_v8 = vpop.f32.mrb[49].mxu0  ;;  %v3167_v9 = vpop.f32.mrb[49].mxu1  ;;  %v5165_v24 = vsel %vm71_vm1, %v7012_v22, 0  ;;  %v8057_v25 = vld [vmem:[%s10336_s3 + $0xf74] ss:$16 sps:$4 sm:$0xff]   ;;  %v7070_v3 = vcombine.low %v7043_v51, %v7043_v51 }
 0x2eb   :  { %v10109_v10 = vadd.f32 %v3126_v8, %v10011_v28  ;;  %v10112_v11 = vadd.f32 %v3167_v9, %v10014_v29  ;;  %v3128_v12 = vpop.f32.mrb[50].mxu0  ;;  %v3169_v14 = vpop.f32.mrb[50].mxu1  ;;  %5179 = vmatpush1.bf16.msra.mxu0 %v8039_v62  ;;  %5220 = vmatpush1.bf16.msra.mxu1 %v8042_v63  ;;  %v8055_v28 = vld [vmem:[%s10336_s3 + $0xf70] ss:$16 sps:$4 sm:$0xff]   ;;  %v8058_v29 = vld [vmem:[%s10336_s3 + $0xf78] ss:$16 sps:$4 sm:$0xff]   ;;  %v7069_v62 = vcombine.high %v7042_v48, %v7042_v48 }
 0x2ec   :  { %v3129_v18 = vpop.f32.mrb[51].mxu0  ;;  %v3170_v19 = vpop.f32.mrb[51].mxu1  ;;  %5180 = vmatprep.subr.bf16.mxu0 %v8047_v0  ;;  %5221 = vmatprep.subr.bf16.mxu1 %v8050_v1  ;;  %v7071_v1 = vcombine.high %v7043_v51, %v7043_v51  ;;  %v5419_v4 = vsel %vm71_vm1, %v7068_v2, 0  ;;  %v5425_v5 = vsel %vm71_vm1, %v7070_v3, 0  ;;  %v8111_v48 = vld [vmem:[%s10338_s5 + $0x60] sm:$0xff]   ;;  %v8117_v2 = vld [vmem:[%s10338_s5 + $0x28] sm:$0xff]  }
 0x2ed   :  { %v8118_v3 = vld [vmem:[%s10338_s5 + $0xa8] sm:$0xff]  }
 0x2ef   :  { %5181 = vmatpush1.bf16.msra.mxu0 %v8045_v15  ;;  %5222 = vmatpush1.bf16.msra.mxu1 %v8048_v16 }
 0x2f0   :  { %7014 = vmatprep.subr.msk.bf16.mxu0 %vm71_vm1, %v7011_v17  ;;  %7016 = vmatprep.subr.msk.bf16.mxu1 %vm71_vm1, %v7013_v20 }
 0x2f3   :  { %5183 = vmatpush1.bf16.msra.mxu0 %v5159_v23  ;;  %5224 = vmatpush1.bf16.msra.mxu1 %v5165_v24 }
 0x2f4   :  { %5430 = vmatprep.subr.bf16.mxu0 %v8057_v25  ;;  %5471 = vmatprep.subr.bf16.mxu1 %v8060_v26 }
 0x2f6   :  { %7015 = vmatmul.mubr.msk.bf16.vlgmr.msra.gmra.mrb[80].mxu0 %vm511_vm13, %v4997_v30  ;;  %7017 = vmatmul.mubr.msk.bf16.vlgmr.msra.gmra.mrb[80].mxu1 %vm511_vm13, %v4997_v30 }
 0x2f7   :  { %5431 = vmatpush1.bf16.msra.mxu0 %v8055_v28  ;;  %5472 = vmatpush1.bf16.msra.mxu1 %v8058_v29 }
 0x2f8   :  { %5432 = vmatprep.subr.bf16.mxu0 %v8063_v31  ;;  %5473 = vmatprep.subr.bf16.mxu1 %v8066_v32 }
 0x2f9   :  { %5462 = vmatprep.mubr.bf16.mxu0 %v8158_v13  ;;  %5503 = vmatprep.mubr.bf16.mxu1 %v8158_v13  ;;  %v8078_v13 = vld [vmem:[%s10336_s3 + $0xfdc] ss:$16 sps:$4 sm:$0xff]  }
 0x2fb   :  { %5433 = vmatpush1.bf16.msra.mxu0 %v8061_v33  ;;  %5474 = vmatpush1.bf16.msra.mxu1 %v8064_v34  ;;  %v8095_v33 = vld [vmem:[%s10338_s5 + $0x40] sm:$0xff]  }
 0x2fc   :  { %5434 = vmatprep.subr.bf16.mxu0 %v8069_v35  ;;  %5475 = vmatprep.subr.bf16.mxu1 %v8072_v36  ;;  %v8096_v34 = vld [vmem:[%s10338_s5 + $0xc0] sm:$0xff]  }
 0x2fd   :  { %v8097_v35 = vld [vmem:[%s10338_s5] sm:$0xff]  }
 0x2fe   :  { %v8098_v36 = vld [vmem:[%s10338_s5 + $0x80] sm:$0xff]  }
 0x2ff   :  { %5435 = vmatpush1.bf16.msra.mxu0 %v8067_v37  ;;  %5476 = vmatpush1.bf16.msra.mxu1 %v8070_v38  ;;  %v8099_v37 = vld [vmem:[%s10338_s5 + $0x48] sm:$0xff]  }
 0x300   :  { %5436 = vmatprep.subr.bf16.mxu0 %v8075_v39  ;;  %5477 = vmatprep.subr.bf16.mxu1 %v8078_v13  ;;  %v8100_v38 = vld [vmem:[%s10338_s5 + $0xc8] sm:$0xff]  }
 0x301   :  { %v8101_v39 = vld [vmem:[%s10338_s5 + $0x8] sm:$0xff]  }
 0x302   :  { %v8102_v13 = vld [vmem:[%s10338_s5 + $0x88] sm:$0xff]  }
 0x303   :  { %5437 = vmatpush1.bf16.msra.mxu0 %v8073_v40  ;;  %5478 = vmatpush1.bf16.msra.mxu1 %v8076_v41  ;;  %v8103_v40 = vld [vmem:[%s10338_s5 + $0x50] sm:$0xff]  }
 0x304   :  { %5438 = vmatprep.subr.bf16.mxu0 %v8081_v42  ;;  %5479 = vmatprep.subr.bf16.mxu1 %v8084_v43  ;;  %v8104_v41 = vld [vmem:[%s10338_s5 + $0xd0] sm:$0xff]  }
 0x305   :  { %v3384_v49 = vpop.f32.mrb[52].mxu0  ;;  %v3425_v50 = vpop.f32.mrb[52].mxu1  ;;  %v8105_v42 = vld [vmem:[%s10338_s5 + $0x10] sm:$0xff]  }
 0x306   :  { %v3432_v52 = vadd.f32 %v3384_v49, %v10103_v6  ;;  %v3434_v53 = vadd.f32 %v3425_v50, %v10106_v7  ;;  %v3386_v54 = vpop.f32.mrb[53].mxu0  ;;  %v3427_v55 = vpop.f32.mrb[53].mxu1  ;;  %v5256_v6 = vld [vmem:[#allocation2 + $0x26] sm:$0x3]  ;;  %v8106_v43 = vld [vmem:[%s10338_s5 + $0x90] sm:$0xff]  }
 0x307   :  { %v3433_v56 = vadd.f32 %v3386_v54, %v10109_v10  ;;  %v3435_v57 = vadd.f32 %v3427_v55, %v10112_v11  ;;  %v3388_v58 = vpop.f32.mrb[54].mxu0  ;;  %v3429_v59 = vpop.f32.mrb[54].mxu1  ;;  %5439 = vmatpush1.bf16.msra.mxu0 %v8079_v44  ;;  %5480 = vmatpush1.bf16.msra.mxu1 %v8082_v45  ;;  %v5257_v7 = vpack.c.bf16 %v5256_v6, %v5256_v6  ;;  %v8107_v44 = vld [vmem:[%s10338_s5 + $0x58] sm:$0xff]   ;;  %v8112_v49 = vld [vmem:[%s10338_s5 + $0xe0] sm:$0xff]   ;;  %v8121_v6 = vld [vmem:[%s10338_s5 + $0x30] sm:$0xff]  }
 0x308   :  { %v3389_v63 = vpop.f32.mrb[55].mxu0  ;;  %v3430_v0 = vpop.f32.mrb[55].mxu1  ;;  %5440 = vmatprep.subr.bf16.mxu0 %v8087_v46  ;;  %5481 = vmatprep.subr.bf16.mxu1 %v8090_v47  ;;  %v8108_v45 = vld [vmem:[%s10338_s5 + $0xd8] sm:$0xff]  }
 0x309   :  { %v8109_v46 = vld [vmem:[%s10338_s5 + $0x18] sm:$0xff]   ;;  %v8115_v0 = vld [vmem:[%s10338_s5 + $0x68] sm:$0xff]  }
 0x30a   :  { %v8110_v47 = vld [vmem:[%s10338_s5 + $0x98] sm:$0xff]  }
 0x30b   :  { %5441 = vmatpush1.bf16.msra.mxu0 %v8085_v60  ;;  %5482 = vmatpush1.bf16.msra.mxu1 %v8088_v61  ;;  %v8113_v60 = vld [vmem:[%s10338_s5 + $0x20] sm:$0xff]  }
 0x30c   :  { %7072 = vmatprep.subr.msk.bf16.mxu0 %vm71_vm1, %v7069_v62  ;;  %7074 = vmatprep.subr.msk.bf16.mxu1 %vm71_vm1, %v7071_v1  ;;  %v8114_v61 = vld [vmem:[%s10338_s5 + $0xa0] sm:$0xff]   ;;  %v8116_v1 = vld [vmem:[%s10338_s5 + $0xe8] sm:$0xff]  }
 0x30f   :  { %5443 = vmatpush1.bf16.msra.mxu0 %v5419_v4  ;;  %5484 = vmatpush1.bf16.msra.mxu1 %v5425_v5  ;;  %v8119_v4 = vld [vmem:[%s10338_s5 + $0x70] sm:$0xff]  }
 0x310   :  { %7139 = vmatprep.subr.bf16.mxu0 %v8095_v33  ;;  %7161 = vmatprep.subr.bf16.mxu1 %v8096_v34  ;;  %v8120_v5 = vld [vmem:[%s10338_s5 + $0xf0] sm:$0xff]  }
 0x312   :  { %7073 = vmatmul.mubr.msk.bf16.vlgmr.msra.gmra.mrb[84].mxu0 %vm511_vm13, %v5257_v7  ;;  %7075 = vmatmul.mubr.msk.bf16.vlgmr.msra.gmra.mrb[84].mxu1 %vm511_vm13, %v5257_v7  ;;  %v8122_v7 = vld [vmem:[%s10338_s5 + $0xb0] sm:$0xff]  }
 0x313   :  { %7140 = vmatpush3.bf16.msra.mxu0 %v8097_v35  ;;  %7162 = vmatpush3.bf16.msra.mxu1 %v8098_v36 }
 0x314   :  { %7141 = vmatprep.subr.bf16.mxu0 %v8099_v37  ;;  %7163 = vmatprep.subr.bf16.mxu1 %v8100_v38 }
 0x317   :  { %7142 = vmatpush3.bf16.msra.mxu0 %v8101_v39  ;;  %7164 = vmatpush3.bf16.msra.mxu1 %v8102_v13 }
 0x318   :  { %7143 = vmatprep.subr.bf16.mxu0 %v8103_v40  ;;  %7165 = vmatprep.subr.bf16.mxu1 %v8104_v41 }
 0x31b   :  { %7144 = vmatpush3.bf16.msra.mxu0 %v8105_v42  ;;  %7166 = vmatpush3.bf16.msra.mxu1 %v8106_v43 }
 0x31c   :  { %7145 = vmatprep.subr.bf16.mxu0 %v8107_v44  ;;  %7167 = vmatprep.subr.bf16.mxu1 %v8108_v45 }
 0x31f   :  { %7146 = vmatpush3.bf16.msra.mxu0 %v8109_v46  ;;  %7168 = vmatpush3.bf16.msra.mxu1 %v8110_v47 }
 0x320   :  { %7147 = vmatprep.subr.bf16.mxu0 %v8111_v48  ;;  %7169 = vmatprep.subr.bf16.mxu1 %v8112_v49 }
 0x321   :  { %v3644_v8 = vpop.f32.mrb[56].mxu0  ;;  %v3685_v9 = vpop.f32.mrb[56].mxu1 }
 0x322   :  { %v3692_v10 = vadd.f32 %v3644_v8, %v3432_v52  ;;  %v3694_v11 = vadd.f32 %v3685_v9, %v3434_v53  ;;  %v3646_v12 = vpop.f32.mrb[57].mxu0  ;;  %v3687_v14 = vpop.f32.mrb[57].mxu1  ;;  %v8123_v8 = vld [vmem:[%s10338_s5 + $0x78] sm:$0xff]  }
 0x323   :  { %v3693_v15 = vadd.f32 %v3646_v12, %v3433_v56  ;;  %v3695_v16 = vadd.f32 %v3687_v14, %v3435_v57  ;;  %v3648_v17 = vpop.f32.mrb[58].mxu0  ;;  %v3689_v18 = vpop.f32.mrb[58].mxu1  ;;  %7148 = vmatpush3.bf16.msra.mxu0 %v8113_v60  ;;  %7170 = vmatpush3.bf16.msra.mxu1 %v8114_v61  ;;  %v8124_v9 = vld [vmem:[%s10338_s5 + $0xf8] sm:$0xff]   ;;  %v5518_v60 = vlaneseq }
 0x324   :  { %v3649_v19 = vpop.f32.mrb[59].mxu0  ;;  %v3690_v20 = vpop.f32.mrb[59].mxu1  ;;  %7149 = vmatprep.subr.bf16.mxu0 %v8115_v0  ;;  %7171 = vmatprep.subr.bf16.mxu1 %v8116_v1  ;;  %v5516_v0 = vld [vmem:[%s10337_s4] sm:$0xf] }
 0x325   :  { %v5519_v61 = vshrl.u32 %v5518_v60, 7 }
 0x327   :  { %7150 = vmatpush3.bf16.msra.mxu0 %v8117_v2  ;;  %7172 = vmatpush3.bf16.msra.mxu1 %v8118_v3  ;;  %v5524_v1 = vsub.s32 1, %v5519_v61  ;;  %v5532_v2 = vsub.s32 3, %v5519_v61 }
 0x328   :  { %7151 = vmatprep.subr.bf16.mxu0 %v8119_v4  ;;  %7173 = vmatprep.subr.bf16.mxu1 %v8120_v5 }
 0x32b   :  { %7152 = vmatpush3.bf16.msra.mxu0 %v8121_v6  ;;  %7174 = vmatpush3.bf16.msra.mxu1 %v8122_v7  ;;  %v5525_v7 = vrot.slane %v5516_v0, %v5524_v1 }
 0x32c   :  { %7153 = vmatprep.subr.bf16.mxu0 %v8123_v8  ;;  %7175 = vmatprep.subr.bf16.mxu1 %v8124_v9  ;;  %v5533_v8 = vrot.slane %v5516_v0, %v5532_v2 }
 0x33d   :  { %v3904_v21 = vpop.f32.mrb[60].mxu0  ;;  %v3945_v22 = vpop.f32.mrb[60].mxu1 }
 0x33e   :  { %v3952_v23 = vadd.f32 %v3904_v21, %v3692_v10  ;;  %v3954_v24 = vadd.f32 %v3945_v22, %v3694_v11  ;;  %v3906_v25 = vpop.f32.mrb[61].mxu0  ;;  %v3947_v26 = vpop.f32.mrb[61].mxu1  ;;  %v8125_v10 = vld [vmem:[%s10338_s5 + $0x38] sm:$0xff]  }
 0x33f   :  { %v3953_v27 = vadd.f32 %v3906_v25, %v3693_v15  ;;  %v3955_v28 = vadd.f32 %v3947_v26, %v3695_v16  ;;  %v3908_v29 = vpop.f32.mrb[62].mxu0  ;;  %v3949_v30 = vpop.f32.mrb[62].mxu1  ;;  %v8126_v11 = vld [vmem:[%s10338_s5 + $0xb8] sm:$0xff]   ;;  %7154 = vmatpush3.bf16.msra.mxu0 %v8125_v10 }
 0x340   :  { %v3909_v31 = vpop.f32.mrb[63].mxu0  ;;  %v3950_v32 = vpop.f32.mrb[63].mxu1  ;;  %7176 = vmatpush3.bf16.msra.mxu1 %v8126_v11 }
 0x359   :  { %v4164_v50 = vpop.f32.mrb[64].mxu0  ;;  %v4205_v51 = vpop.f32.mrb[64].mxu1 }
 0x35a   :  { %v4212_v52 = vadd.f32 %v4164_v50, %v3952_v23  ;;  %v4214_v53 = vadd.f32 %v4205_v51, %v3954_v24  ;;  %v4166_v54 = vpop.f32.mrb[65].mxu0  ;;  %v4207_v55 = vpop.f32.mrb[65].mxu1 }
 0x35b   :  { %v4213_v56 = vadd.f32 %v4166_v54, %v3953_v27  ;;  %v4215_v57 = vadd.f32 %v4207_v55, %v3955_v28  ;;  %v4168_v58 = vpop.f32.mrb[66].mxu0  ;;  %v4209_v59 = vpop.f32.mrb[66].mxu1 }
 0x35c   :  { %v4169_v62 = vpop.f32.mrb[67].mxu0  ;;  %v4210_v63 = vpop.f32.mrb[67].mxu1 }
 0x35d   :  { %v5520_v62 = vsub.s32 0, %v5519_v61  ;;  %v5528_v63 = vsub.s32 2, %v5519_v61 }
 0x35f   :  { %v5521_v3 = vrot.slane %v5516_v0, %v5520_v62  ;;  %v5529_v4 = vrot.slane %v5516_v0, %v5528_v63 }
 0x375   :  { %v4424_v12 = vpop.f32.mrb[68].mxu0  ;;  %v4465_v14 = vpop.f32.mrb[68].mxu1 }
 0x376   :  { %v4472_v15 = vadd.f32 %v4424_v12, %v4212_v52  ;;  %v4474_v16 = vadd.f32 %v4465_v14, %v4214_v53  ;;  %v4426_v17 = vpop.f32.mrb[69].mxu0  ;;  %v4467_v18 = vpop.f32.mrb[69].mxu1 }
 0x377   :  { %v4473_v19 = vadd.f32 %v4426_v17, %v4213_v56  ;;  %v4475_v20 = vadd.f32 %v4467_v18, %v4215_v57  ;;  %v4428_v21 = vpop.f32.mrb[70].mxu0  ;;  %v4469_v22 = vpop.f32.mrb[70].mxu1 }
 0x378   :  { %v4429_v23 = vpop.f32.mrb[71].mxu0  ;;  %v4470_v24 = vpop.f32.mrb[71].mxu1 }
 0x391   :  { %v4684_v25 = vpop.f32.mrb[72].mxu0  ;;  %v4725_v26 = vpop.f32.mrb[72].mxu1 }
 0x392   :  { %v4732_v27 = vadd.f32 %v4684_v25, %v4472_v15  ;;  %v4734_v28 = vadd.f32 %v4725_v26, %v4474_v16  ;;  %v4686_v29 = vpop.f32.mrb[73].mxu0  ;;  %v4727_v30 = vpop.f32.mrb[73].mxu1 }
 0x393   :  { %v4733_v31 = vadd.f32 %v4686_v29, %v4473_v19  ;;  %v4735_v32 = vadd.f32 %v4727_v30, %v4475_v20  ;;  %v4688_v33 = vpop.f32.mrb[74].mxu0  ;;  %v4729_v34 = vpop.f32.mrb[74].mxu1 }
 0x394   :  { %v4689_v35 = vpop.f32.mrb[75].mxu0  ;;  %v4730_v36 = vpop.f32.mrb[75].mxu1  ;;  %v7076_v34 = vld [vmem:[%s10339_s6] ss:$0 sm:$0xff]  ;;  %s8160_s6 = smov [#allocation3]  }
 0x395   :  { %s5914_s27 = sshll.u32 %s8160_s6, 4  ;;  %s5915_s27 = int_to_ptr.vmem [resolvable:$true] %s5914_s27 }
 0x396   :  { %s8131_s28 = scalar_lea.vmem %s5915_s27, 32  ;;  %p8136_p1 = scmp.lt.s32.totalorder %s5915_s27, %s5915_s27 }
 0x397   :  { %p8132_p0 = scmp.ne.s32.totalorder %s5915_s27, %s8131_s28  ;;  %p8137_p2 = scmp.lt.s32.totalorder %s8131_s28, %s8131_s28 }
 0x399   :  { %p8138_p3 = por %p8137_p2, %p8136_p1 }
 0x39b   :  { %p8139_p4 = pnand %p8138_p3, %p8132_p0 }
 0x3ad   :  { %v4944_v37 = vpop.f32.mrb[76].mxu0  ;;  %v4985_v38 = vpop.f32.mrb[76].mxu1 }
 0x3ae   :  { %v4992_v39 = vadd.f32 %v4944_v37, %v4732_v27  ;;  %v4994_v13 = vadd.f32 %v4985_v38, %v4734_v28  ;;  %v4946_v40 = vpop.f32.mrb[77].mxu0  ;;  %v4987_v41 = vpop.f32.mrb[77].mxu1 }
 0x3af   :  { %v4993_v42 = vadd.f32 %v4946_v40, %v4733_v31  ;;  %v4995_v43 = vadd.f32 %v4987_v41, %v4735_v32  ;;  %v4948_v44 = vpop.f32.mrb[78].mxu0  ;;  %v4989_v45 = vpop.f32.mrb[78].mxu1 }
 0x3b0   :  { %v4949_v46 = vpop.f32.mrb[79].mxu0  ;;  %v4990_v47 = vpop.f32.mrb[79].mxu1 }
 0x3c9   :  { %v5204_v48 = vpop.f32.mrb[80].mxu0  ;;  %v5245_v49 = vpop.f32.mrb[80].mxu1 }
 0x3ca   :  { %v5252_v50 = vadd.f32 %v5204_v48, %v4992_v39  ;;  %v5254_v51 = vadd.f32 %v5245_v49, %v4994_v13  ;;  %v5206_v52 = vpop.f32.mrb[81].mxu0  ;;  %v5247_v53 = vpop.f32.mrb[81].mxu1 }
 0x3cb   :  { %v5253_v54 = vadd.f32 %v5206_v52, %v4993_v42  ;;  %v5255_v55 = vadd.f32 %v5247_v53, %v4995_v43  ;;  %v5208_v56 = vpop.f32.mrb[82].mxu0  ;;  %v5249_v57 = vpop.f32.mrb[82].mxu1 }
 0x3cc   :  { %v5209_v58 = vpop.f32.mrb[83].mxu0  ;;  %v5250_v59 = vpop.f32.mrb[83].mxu1 }
 0x3e5   :  { %v5464_v5 = vpop.f32.mrb[84].mxu0  ;;  %v5505_v6 = vpop.f32.mrb[84].mxu1 }
 0x3e6   :  { %v5512_v9 = vadd.f32 %v5464_v5, %v5252_v50  ;;  %v5514_v10 = vadd.f32 %v5505_v6, %v5254_v51  ;;  %v5466_v11 = vpop.f32.mrb[85].mxu0  ;;  %v5507_v12 = vpop.f32.mrb[85].mxu1 }
 0x3e7   :  { %v5513_v14 = vadd.f32 %v5466_v11, %v5253_v54  ;;  %v5515_v15 = vadd.f32 %v5507_v12, %v5255_v55  ;;  %v5468_v16 = vpop.f32.mrb[86].mxu0  ;;  %v5509_v17 = vpop.f32.mrb[86].mxu1 }
 0x3e8   :  { %v5538_v18 = vadd.f32 %v5521_v3, %v5512_v9  ;;  %v5540_v19 = vadd.f32 %v5529_v4, %v5514_v10  ;;  %v5469_v20 = vpop.f32.mrb[87].mxu0  ;;  %v5510_v21 = vpop.f32.mrb[87].mxu1 }
 0x3e9   :  { %v5539_v22 = vadd.f32 %v5525_v7, %v5513_v14  ;;  %v5541_v23 = vadd.f32 %v5533_v8, %v5515_v15 }
 0x3ea   :  { %v5542_v24 = vmax.f32 %v5538_v18, 0.0  ;;  %v5544_v25 = vmax.f32 %v5540_v19, 0.0 }
 0x3eb   :  { %v5543_v26 = vmax.f32 %v5539_v22, 0.0  ;;  %v5545_v27 = vmax.f32 %v5541_v23, 0.0 }
 0x3ec   :  { %v5546_v30 = vpack.c.bf16 %v5542_v24, %v5542_v24  ;;  %v5548_v31 = vpack.c.bf16 %v5544_v25, %v5544_v25 }
 0x3ed   :  { %v5547_v28 = vpack.c.bf16 %v5543_v26, %v5543_v26  ;;  %v5549_v29 = vpack.c.bf16 %v5545_v27, %v5545_v27 }
 0x3ef   :  { %5845 = vmatprep.mubr.bf16.mxu0 %v5547_v28  ;;  %5885 = vmatprep.mubr.bf16.mxu1 %v5549_v29 }
 0x3f0   :  { %5846 = vmatmul.mubr.bf16.vlgmr.msra.gmra.mrb[88].mxu0 %v5546_v30  ;;  %5886 = vmatmul.mubr.bf16.vlgmr.msra.gmra.mrb[88].mxu1 %v5548_v31 }
 0x4c3   :  { %v7155_v32 = vpop.f32.mrb[88].mxu0  ;;  %v7177_v33 = vpop.f32.mrb[88].mxu1 }
 0x4c4   :  { %v7156_v35 = vpop.f32.mrb[89].mxu0  ;;  %v7178_v36 = vpop.f32.mrb[89].mxu1 }
 0x4c5   :  { %v7157_v37 = vadd.f32 %v7156_v35, %v7155_v32  ;;  %v7179_v38 = vadd.f32 %v7178_v36, %v7177_v33  ;;  %v7158_v39 = vpop.f32.mrb[90].mxu0  ;;  %v7180_v13 = vpop.f32.mrb[90].mxu1 }
 0x4c6   :  { %v7159_v40 = vpop.f32.mrb[91].mxu0  ;;  %v7181_v41 = vpop.f32.mrb[91].mxu1 }
 0x4c7   :  { %v5848_v42 = vadd.f32 %v7157_v37, %v7076_v34 }
 0x4c9   :  { %v5888_v43 = vadd.f32 %v7179_v38, %v5848_v42 }
 0x4cb   :  { %v5894_v44 = vsel %vm5893_vm14, %v5888_v43, -inf }
 0x4cc   :  { %5895 = vmax.xlane.f32.xlu1 %v5894_v44 }
 0x559   :  { %v5896_v45 = vpop.xlane.xlu1 %5895 }
 0x55a   :  { %v5897_v46 = vsub.f32 %v5888_v43, %v5896_v45 }
 0x55c   :  { %v5898_v47 = vmul.f32 1.442695, %v5897_v46 }
 0x55e   :  { %8127 = vpow2.f32 %v5898_v47 }
 0x568   :  { %v8128_v48 = vpop.eup %8127 }
 0x569   :  { %v5900_v49 = vsel %vm5893_vm14, %v8128_v48, 0.0 }
 0x56a   :  { %5901 = vadd.xlane.f32.xlu0 %v5900_v49 }
 0x5f7   :  { %v5902_v50 = vpop.xlane.xlu0 %5901 }
 0x5f8   :  { %8129 = vlog2.f32 %v5902_v50 }
 0x602   :  { %v8130_v51 = vpop.eup %8129 }
 0x603   :  { %v5904_v52 = vmul.f32 0.6931472, %v8130_v51 }
 0x605   :  { %v5905_v53 = vadd.f32 %v5904_v52, %v5896_v45 }
 0x607   :  { %v5906_v54 = vsub.f32 %v5888_v43, %v5905_v53 }
 0x609   :  { %5907 = vst.msk [vmem:[#allocation3] sm:$0x3] %vm5893_vm14, %v5906_v54 }
 0x60a   :  { %8142 = shalt.err (!%p8139_p4)
}
 0x60b   :  { %s8143_s8 = scalar_lea.hbm %s10340_s7, 32 }
 0x60c   :  { %p8144_p5 = scmp.ne.s32.totalorder %s10340_s7, %s8143_s8  ;;  %p8147_p6 = scmp.lt.u32.totalorder %s8143_s8, %s10340_s7 }
 0x60e   :  { %p8149_p7 = pnand %p8147_p6, %p8144_p5 }
 0x610   :  { %8152 = shalt.err (!%p8149_p7)
}
 0x611   :  { %5917 = dma.vmem_to_hbm [thread:$0]  %s5915_s27, 32, %s10340_s7, [#allocation4]  }
 0x612   :  { %8153 = dma.done.wait [#allocation4], 32  }
 0x613   :  { %8154 = vsyncadd [#allocation4], 4294967264 }
 0x614   :  { %5921 = vsyncpa [#allocation4], 1 }

</bundles_post_ra>
